<compile_context>
chip_gen: v7x
topology: tpu7x:2x2x1
jax: 0.10.0
libtpu: 0.0.40
codegen_flags: <defaults>
</compile_context>

<pallas_src>
import jax
import jax.numpy as jnp
from jax import lax
from jax.experimental import pallas as pl
from jax.experimental.pallas import tpu as pltpu

# ---- config (MultiBoxLoss.__init__ args / cfg['variance']) -------------------
NUM_CLASSES    = 2
OVERLAP_THRESH = 0.35
NEGPOS_RATIO   = 3
VARIANCE       = (0.1, 0.2)

_PK_ROWS      = 12     # precomputed per-prior constant rows (incl. validity)
_BISECT_ITERS = 24     # threshold-bisection steps for hard-negative mining
_LANES        = 128


def _smooth_l1(d):
    ad = jnp.abs(d)
    return jnp.where(ad < 1.0, 0.5 * d * d, ad - 0.5)


def _softplus(x):
    # numerically stable log(1 + exp(x))
    return jnp.maximum(x, 0.0) + jnp.log(1.0 + jnp.exp(-jnp.abs(x)))


def _rsum(x):
    return jnp.sum(jnp.sum(x, axis=1, keepdims=True), axis=0, keepdims=True)


def _rmax(x):
    return jnp.max(jnp.max(x, axis=1, keepdims=True), axis=0, keepdims=True)


def _rmin(x):
    return jnp.min(jnp.min(x, axis=1, keepdims=True), axis=0, keepdims=True)


# ================= fused kernel: match + encode + mined loss ==================
def _make_kernel(num_objs, p_real):
    """Kernel factory; num_objs / p_real are trace-time constants."""
    inv_var1 = 1.0 / VARIANCE[1]
    k_cap = float(p_real - 1)

    def kernel(targets_ref, pk_ref, locp_ref, margin_ref, out_ref):
        # ---- hoisted per-prior constants, lane+sublane dense (R, 128) --------
        pcx       = pk_ref[0, 0]
        pcy       = pk_ref[0, 1]
        px1       = pk_ref[0, 2]
        py1       = pk_ref[0, 3]
        px2       = pk_ref[0, 4]
        py2       = pk_ref[0, 5]
        area_p    = pk_ref[0, 6]
        inv_v0_pw = pk_ref[0, 7]
        inv_v0_ph = pk_ref[0, 8]
        inv_pw    = pk_ref[0, 9]
        inv_ph    = pk_ref[0, 10]
        pvalid    = pk_ref[0, 11]

        S = pcx.shape                                             # (R, 128)
        lin = (lax.broadcasted_iota(jnp.int32, S, 0) * _LANES
               + lax.broadcasted_iota(jnp.int32, S, 1))           # prior index

        # ---- ground-truth table for this image (tiny) ------------------------
        t   = targets_ref[0]                                      # (O, 5)
        tx1 = t[:, 0:1]; ty1 = t[:, 1:2]
        tx2 = t[:, 2:3]; ty2 = t[:, 3:4]
        lab = t[:, 4:5]
        tw  = tx2 - tx1
        th  = ty2 - ty1
        tcx = 0.5 * (tx1 + tx2)
        tcy = 0.5 * (ty1 + ty2)
        ta  = tw * th
        tvalid = (lab > 0.0) & (tw > 0.0) & (th > 0.0)            # (O, 1)

        # ---- match(): running best-GT per prior + force-match best prior -----
        bt_ov = jnp.zeros(S, jnp.float32)
        m_cx  = jnp.zeros(S, jnp.float32)
        m_cy  = jnp.zeros(S, jnp.float32)
        m_w   = jnp.ones(S, jnp.float32)       # 1.0 -> log() safe when unmatched
        m_h   = jnp.ones(S, jnp.float32)
        m_lab = jnp.zeros(S, jnp.float32)

        # TODO(synk): for very large num_objs switch to a fori_loop over an
        # SMEM-resident GT table instead of this trace-time unrolled loop.
        for j in range(num_objs):
            x1 = tx1[j:j + 1, :]; y1 = ty1[j:j + 1, :]
            x2 = tx2[j:j + 1, :]; y2 = ty2[j:j + 1, :]
            cxj = tcx[j:j + 1, :]; cyj = tcy[j:j + 1, :]
            wj  = tw[j:j + 1, :];  hj  = th[j:j + 1, :]
            aj  = ta[j:j + 1, :];  labj = lab[j:j + 1, :]
            vj  = tvalid[j:j + 1, :]

            # IoU of GT j with every prior (EUP reciprocal for the denominator)
            iw = jnp.maximum(jnp.minimum(x2, px2) - jnp.maximum(x1, px1), 0.0)
            ih = jnp.maximum(jnp.minimum(y2, py2) - jnp.maximum(y1, py1), 0.0)
            inter = iw * ih
            ov = inter * pl.reciprocal(aj + area_p - inter, approx=True)
            ov = jnp.where(vj, ov, 0.0)

            # running best-truth (first-argmax tie-break)
            is_new = ov > bt_ov
            # best prior for this GT (for the force-match step)
            bp_ov  = _rmax(ov)                                     # (1, 1)
            bp_idx = _rmin(jnp.where(ov == bp_ov, lin, 2 ** 30))   # (1, 1) int32
            force  = (lin == bp_idx) & vj
            upd    = is_new | force

            bt_ov = jnp.where(force, 2.0, jnp.where(is_new, ov, bt_ov))
            m_cx  = jnp.where(upd, cxj,  m_cx)
            m_cy  = jnp.where(upd, cyj,  m_cy)
            m_w   = jnp.where(upd, wj,   m_w)
            m_h   = jnp.where(upd, hj,   m_h)
            m_lab = jnp.where(upd, labj, m_lab)

        pos      = (bt_ov >= OVERLAP_THRESH) & (m_lab > 0.0)       # (R, 128)
        num_posf = _rsum(pos.astype(jnp.float32))                  # (1, 1)

        # ---- encode(matched, priors, variance) + smooth-L1 over positives ----
        lp0 = locp_ref[0, 0]; lp1 = locp_ref[0, 1]
        lp2 = locp_ref[0, 2]; lp3 = locp_ref[0, 3]
        gcx = (m_cx - pcx) * inv_v0_pw
        gcy = (m_cy - pcy) * inv_v0_ph
        gw  = jnp.log(m_w * inv_pw) * inv_var1
        gh  = jnp.log(m_h * inv_ph) * inv_var1
        sl1 = (_smooth_l1(lp0 - gcx) + _smooth_l1(lp1 - gcy)
               + _smooth_l1(lp2 - gw) + _smooth_l1(lp3 - gh))
        loss_l = _rsum(jnp.where(pos, sl1, 0.0))                   # (1, 1)

        # ---- 2-class cross entropy from the logit margin (c1 - c0) -----------
        margin = margin_ref[0]                                     # (R, 128)
        ce = _softplus(jnp.where(pos, -margin, margin))
        ce_pos = _rsum(jnp.where(pos, ce, 0.0))

        # ---- hard-negative mining: top-K CE sum (count bisection + CVaR id) --
        lc = jnp.where((~pos) & (pvalid > 0.0), ce, 0.0)           # mining scores
        k  = jnp.minimum(float(NEGPOS_RATIO) * num_posf, k_cap)    # (1, 1)
        hi0 = _rmax(lc) + 1.0
        lo0 = jnp.zeros((1, 1), jnp.float32)

        def bisect(_, carry):
            lo, hi = carry
            mid = 0.5 * (lo + hi)
            cnt = _rsum(jnp.where(lc >= mid, 1.0, 0.0))
            ge = cnt >= k
            return jnp.where(ge, mid, lo), jnp.where(ge, hi, mid)

        lo, _ = lax.fori_loop(0, _BISECT_ITERS, bisect, (lo0, hi0))
        # sum of top-k values == k*t + sum(relu(x - t)) at t = k-th largest
        neg_sum = k * lo + _rsum(jnp.maximum(lc - lo, 0.0))
        loss_c = ce_pos + neg_sum

        # ---- merged per-(head, image) partials: [loss_l, loss_c, num_pos] ----
        lane = lax.broadcasted_iota(jnp.int32, (1, 3), 1)
        out_ref[0, 0] = jnp.where(lane == 0, loss_l,
                                  jnp.where(lane == 1, loss_c, num_posf))

    return kernel


# ============================== JAX wrapper ===================================
def _pad_p(p):
    return max(1024, ((p + 1023) // 1024) * 1024)


def _prior_constants(priors, num_priors, p_pad):
    """Point-form corners, area, encode reciprocals and a validity row,
    reshaped to (12, P_pad/128, 128).  Padding priors are placed far outside
    the unit image with unit size so they never match and never produce infs."""
    pri = priors[:num_priors].astype(jnp.float32)
    extra = p_pad - num_priors
    if extra > 0:
        dummy = jnp.tile(jnp.asarray([[-10.0, -10.0, 1.0, 1.0]], jnp.float32),
                         (extra, 1))
        pri = jnp.concatenate([pri, dummy], axis=0)
    pcx, pcy, pw, ph = pri[:, 0], pri[:, 1], pri[:, 2], pri[:, 3]
    px1 = pcx - 0.5 * pw; py1 = pcy - 0.5 * ph
    px2 = pcx + 0.5 * pw; py2 = pcy + 0.5 * ph
    valid = (jnp.arange(p_pad) < num_priors).astype(jnp.float32)
    feats = jnp.stack(
        [pcx, pcy, px1, py1, px2, py2, pw * ph,
         1.0 / (VARIANCE[0] * pw), 1.0 / (VARIANCE[0] * ph),
         1.0 / pw, 1.0 / ph, valid], axis=0)                     # (12, P_pad)
    return feats.reshape(_PK_ROWS, p_pad // _LANES, _LANES)


def _vmem_limit_bytes():
    try:
        cap = int(pltpu.get_tpu_info().vmem_capacity_bytes)
    except Exception:
        cap = 128 * 1024 * 1024
    # lift v5e's 16 MiB scoped default, stay well inside v7x's 64 MiB
    return int(min(max(cap // 2, 32 * 1024 * 1024), 96 * 1024 * 1024))


def multibox_loss(predictions, targets):
    """MultiBoxLoss.forward with pyramid_anchor=True, odm=True, use_pa=True,
    refinedet=False: predictions is the 9-tuple
    (face_loc, face_conf, face_priors, head_loc, head_conf, head_priors,
     body_loc, body_conf, body_priors).  Returns ((ll_face,ll_head,ll_body),
    (lc_face,lc_head,lc_body))."""
    locs   = (predictions[0], predictions[3], predictions[6])
    confs  = (predictions[1], predictions[4], predictions[7])
    priors = (predictions[2], predictions[5], predictions[8])

    B, P, _ = locs[0].shape
    C = confs[0].shape[-1]
    O = targets.shape[1]
    H = 3
    # TODO(synk): general num_classes > 2 would need the full per-class LSE
    # path; the lightDSFD config is binary (background / face).
    assert C == 2, "2-class (background/face) fast path only"

    P_pad = _pad_p(P)
    R = P_pad // _LANES

    # lane/sublane-dense relayout: priors live on (R, 128) tiles in-kernel.
    # TODO(synk): emit lane-dense loc from the model head to drop this transpose
    # (the conf transpose is already gone: only the 2-class margin is passed).
    def relayout_loc(l):
        l = jnp.transpose(l.astype(jnp.float32), (0, 2, 1))       # (B, 4, P)
        l = jnp.pad(l, ((0, 0), (0, 0), (0, P_pad - P)))
        return l.reshape(B, 4, R, _LANES)

    def relayout_margin(c):
        m = (c[..., 1] - c[..., 0]).astype(jnp.float32)           # (B, P)
        m = jnp.pad(m, ((0, 0), (0, P_pad - P)))
        return m.reshape(B, R, _LANES)

    locp   = jnp.concatenate([relayout_loc(l) for l in locs], axis=0)      # (H*B,4,R,128)
    margin = jnp.concatenate([relayout_margin(c) for c in confs], axis=0)  # (H*B,R,128)
    pk     = jnp.stack([_prior_constants(p, P, P_pad) for p in priors], 0) # (H,12,R,128)

    kernel = _make_kernel(O, P)

    out = pl.pallas_call(
        kernel,
        out_shape=jax.ShapeDtypeStruct((H, B, 1, 3), jnp.float32),
        grid_spec=pltpu.PrefetchScalarGridSpec(
            num_scalar_prefetch=0,
            grid=(H, B),
            in_specs=[
                pl.BlockSpec((1, O, 5), lambda h, b: (b, 0, 0)),
                pl.BlockSpec((1, _PK_ROWS, R, _LANES), lambda h, b: (h, 0, 0, 0)),
                pl.BlockSpec((1, 4, R, _LANES), lambda h, b: (h * B + b, 0, 0, 0)),
                pl.BlockSpec((1, R, _LANES), lambda h, b: (h * B + b, 0, 0)),
            ],
            out_specs=pl.BlockSpec((1, 1, 1, 3), lambda h, b: (h, b, 0, 0)),
        ),
        compiler_params=pltpu.CompilerParams(
            dimension_semantics=("parallel", "parallel"),
            vmem_limit_bytes=_vmem_limit_bytes()),
    )(targets.astype(jnp.float32), pk, locp, margin)

    sums = out.reshape(H, B, 3).sum(axis=1)                       # (H, 3)
    # N = total matched positives per head (guard N == 0, where the original
    # torch code would divide by zero).
    n = jnp.maximum(sums[:, 2], 1.0)
    loss_l = sums[:, 0] / n
    loss_c = sums[:, 1] / n
    return ((loss_l[0], loss_l[1], loss_l[2]),
            (loss_c[0], loss_c[1], loss_c[2]))


# =============================================================================
if __name__ == "__main__":
    key = jax.random.PRNGKey(0)
    B, O, P, C = 2, 3, 256, NUM_CLASSES          # small synthetic shapes
    keys = jax.random.split(key, 12)

    def make_priors(k):
        k1, k2 = jax.random.split(k)
        centers = jax.random.uniform(k1, (P, 2), minval=0.1, maxval=0.9)
        sizes   = jax.random.uniform(k2, (P, 2), minval=0.05, maxval=0.3)
        return jnp.concatenate([centers, sizes], axis=1).astype(jnp.float32)

    preds = []
    for i in range(3):                            # face / head / body heads
        loc  = (0.1 * jax.random.normal(keys[3 * i], (B, P, 4))).astype(jnp.float32)
        conf = jax.random.normal(keys[3 * i + 1], (B, P, C)).astype(jnp.float32)
        pri  = make_priors(keys[3 * i + 2])
        preds += [loc, conf, pri]

    # targets: [batch, num_objs, 5] = (x1, y1, x2, y2, label); label 1 == face
    # TODO(synk): PyTorch takes a python list of variable-length GT tensors;
    # here a fixed num_objs per image is assumed (padded rows may use label 0).
    xy1 = jax.random.uniform(keys[9], (B, O, 2), minval=0.05, maxval=0.55)
    wh  = jax.random.uniform(keys[10], (B, O, 2), minval=0.1, maxval=0.35)
    labels = jnp.ones((B, O, 1), jnp.float32)
    targets = jnp.concatenate([xy1, xy1 + wh, labels], axis=-1).astype(jnp.float32)

    loss_l, loss_c = jax.jit(multibox_loss)(tuple(preds), targets)
    jax.block_until_ready((loss_l, loss_c))
    print("KERNEL_OK")
</pallas_src>

<mosaic_0001>
module attributes {stable_mosaic.version = 11 : i64} {
  func.func @kernel(%arg0: i32, %arg1: i32, %arg2: memref<1x3x5xf32, #tpu.memory_space<vmem>>, %arg3: memref<1x12x8x128xf32, #tpu.memory_space<vmem>>, %arg4: memref<1x4x8x128xf32, #tpu.memory_space<vmem>>, %arg5: memref<1x8x128xf32, #tpu.memory_space<vmem>>, %arg6: memref<1x1x1x3xf32, #tpu.memory_space<vmem>>) attributes {dimension_semantics = [#tpu.dimension_semantics<parallel>, #tpu.dimension_semantics<parallel>], iteration_bounds = array<i64: 3, 2>, scalar_prefetch = 0 : i64, scratch_operands = 0 : i64, tpu.core_type = #tpu.core_type<tc>, window_params = [{transform_indices = @transform_0, window_bounds = array<i64: 1, 3, 5>}, {transform_indices = @transform_1, window_bounds = array<i64: 1, 12, 8, 128>}, {transform_indices = @transform_2, window_bounds = array<i64: 1, 4, 8, 128>}, {transform_indices = @transform_3, window_bounds = array<i64: 1, 8, 128>}, {transform_indices = @transform_4, window_bounds = array<i64: 1, 1, 1, 3>}]} {
    %c0 = arith.constant 0 : index
    %c0_0 = arith.constant 0 : index
    %c0_1 = arith.constant 0 : index
    %c0_2 = arith.constant 0 : index
    %0 = vector.load %arg3[%c0, %c0_0, %c0_1, %c0_2] : memref<1x12x8x128xf32, #tpu.memory_space<vmem>>, vector<1x1x8x128xf32>
    %1 = vector.shape_cast %0 : vector<1x1x8x128xf32> to vector<8x128xf32>
    %c0_3 = arith.constant 0 : index
    %c1 = arith.constant 1 : index
    %c0_4 = arith.constant 0 : index
    %c0_5 = arith.constant 0 : index
    %2 = vector.load %arg3[%c0_3, %c1, %c0_4, %c0_5] : memref<1x12x8x128xf32, #tpu.memory_space<vmem>>, vector<1x1x8x128xf32>
    %3 = vector.shape_cast %2 : vector<1x1x8x128xf32> to vector<8x128xf32>
    %c0_6 = arith.constant 0 : index
    %c2 = arith.constant 2 : index
    %c0_7 = arith.constant 0 : index
    %c0_8 = arith.constant 0 : index
    %4 = vector.load %arg3[%c0_6, %c2, %c0_7, %c0_8] : memref<1x12x8x128xf32, #tpu.memory_space<vmem>>, vector<1x1x8x128xf32>
    %5 = vector.shape_cast %4 : vector<1x1x8x128xf32> to vector<8x128xf32>
    %c0_9 = arith.constant 0 : index
    %c3 = arith.constant 3 : index
    %c0_10 = arith.constant 0 : index
    %c0_11 = arith.constant 0 : index
    %6 = vector.load %arg3[%c0_9, %c3, %c0_10, %c0_11] : memref<1x12x8x128xf32, #tpu.memory_space<vmem>>, vector<1x1x8x128xf32>
    %7 = vector.shape_cast %6 : vector<1x1x8x128xf32> to vector<8x128xf32>
    %c0_12 = arith.constant 0 : index
    %c4 = arith.constant 4 : index
    %c0_13 = arith.constant 0 : index
    %c0_14 = arith.constant 0 : index
    %8 = vector.load %arg3[%c0_12, %c4, %c0_13, %c0_14] : memref<1x12x8x128xf32, #tpu.memory_space<vmem>>, vector<1x1x8x128xf32>
    %9 = vector.shape_cast %8 : vector<1x1x8x128xf32> to vector<8x128xf32>
    %c0_15 = arith.constant 0 : index
    %c5 = arith.constant 5 : index
    %c0_16 = arith.constant 0 : index
    %c0_17 = arith.constant 0 : index
    %10 = vector.load %arg3[%c0_15, %c5, %c0_16, %c0_17] : memref<1x12x8x128xf32, #tpu.memory_space<vmem>>, vector<1x1x8x128xf32>
    %11 = vector.shape_cast %10 : vector<1x1x8x128xf32> to vector<8x128xf32>
    %c0_18 = arith.constant 0 : index
    %c6 = arith.constant 6 : index
    %c0_19 = arith.constant 0 : index
    %c0_20 = arith.constant 0 : index
    %12 = vector.load %arg3[%c0_18, %c6, %c0_19, %c0_20] : memref<1x12x8x128xf32, #tpu.memory_space<vmem>>, vector<1x1x8x128xf32>
    %13 = vector.shape_cast %12 : vector<1x1x8x128xf32> to vector<8x128xf32>
    %c0_21 = arith.constant 0 : index
    %c7 = arith.constant 7 : index
    %c0_22 = arith.constant 0 : index
    %c0_23 = arith.constant 0 : index
    %14 = vector.load %arg3[%c0_21, %c7, %c0_22, %c0_23] : memref<1x12x8x128xf32, #tpu.memory_space<vmem>>, vector<1x1x8x128xf32>
    %15 = vector.shape_cast %14 : vector<1x1x8x128xf32> to vector<8x128xf32>
    %c0_24 = arith.constant 0 : index
    %c8 = arith.constant 8 : index
    %c0_25 = arith.constant 0 : index
    %c0_26 = arith.constant 0 : index
    %16 = vector.load %arg3[%c0_24, %c8, %c0_25, %c0_26] : memref<1x12x8x128xf32, #tpu.memory_space<vmem>>, vector<1x1x8x128xf32>
    %17 = vector.shape_cast %16 : vector<1x1x8x128xf32> to vector<8x128xf32>
    %c0_27 = arith.constant 0 : index
    %c9 = arith.constant 9 : index
    %c0_28 = arith.constant 0 : index
    %c0_29 = arith.constant 0 : index
    %18 = vector.load %arg3[%c0_27, %c9, %c0_28, %c0_29] : memref<1x12x8x128xf32, #tpu.memory_space<vmem>>, vector<1x1x8x128xf32>
    %19 = vector.shape_cast %18 : vector<1x1x8x128xf32> to vector<8x128xf32>
    %c0_30 = arith.constant 0 : index
    %c10 = arith.constant 10 : index
    %c0_31 = arith.constant 0 : index
    %c0_32 = arith.constant 0 : index
    %20 = vector.load %arg3[%c0_30, %c10, %c0_31, %c0_32] : memref<1x12x8x128xf32, #tpu.memory_space<vmem>>, vector<1x1x8x128xf32>
    %21 = vector.shape_cast %20 : vector<1x1x8x128xf32> to vector<8x128xf32>
    %c0_33 = arith.constant 0 : index
    %c11 = arith.constant 11 : index
    %c0_34 = arith.constant 0 : index
    %c0_35 = arith.constant 0 : index
    %22 = vector.load %arg3[%c0_33, %c11, %c0_34, %c0_35] : memref<1x12x8x128xf32, #tpu.memory_space<vmem>>, vector<1x1x8x128xf32>
    %23 = vector.shape_cast %22 : vector<1x1x8x128xf32> to vector<8x128xf32>
    %24 = tpu.iota {dimensions = array<i32: 0>} : vector<8x128xi32>
    %c128_i32 = arith.constant 128 : i32
    %25 = vector.broadcast %c128_i32 : i32 to vector<8x128xi32>
    %26 = arith.muli %24, %25 : vector<8x128xi32>
    %27 = tpu.iota {dimensions = array<i32: 1>} : vector<8x128xi32>
    %28 = arith.addi %26, %27 : vector<8x128xi32>
    %c0_36 = arith.constant 0 : index
    %c0_37 = arith.constant 0 : index
    %c0_38 = arith.constant 0 : index
    %29 = vector.load %arg2[%c0_36, %c0_37, %c0_38] : memref<1x3x5xf32, #tpu.memory_space<vmem>>, vector<1x3x5xf32>
    %30 = vector.shape_cast %29 : vector<1x3x5xf32> to vector<3x5xf32>
    %31 = vector.extract_strided_slice %30 {offsets = [0, 0], sizes = [3, 1], strides = [1, 1]} : vector<3x5xf32> to vector<3x1xf32>
    %32 = vector.extract_strided_slice %30 {offsets = [0, 1], sizes = [3, 1], strides = [1, 1]} : vector<3x5xf32> to vector<3x1xf32>
    %33 = vector.extract_strided_slice %30 {offsets = [0, 2], sizes = [3, 1], strides = [1, 1]} : vector<3x5xf32> to vector<3x1xf32>
    %34 = vector.extract_strided_slice %30 {offsets = [0, 3], sizes = [3, 1], strides = [1, 1]} : vector<3x5xf32> to vector<3x1xf32>
    %35 = vector.extract_strided_slice %30 {offsets = [0, 4], sizes = [3, 1], strides = [1, 1]} : vector<3x5xf32> to vector<3x1xf32>
    %36 = arith.subf %33, %31 : vector<3x1xf32>
    %37 = arith.subf %34, %32 : vector<3x1xf32>
    %38 = arith.addf %31, %33 : vector<3x1xf32>
    %cst = arith.constant 5.000000e-01 : f32
    %39 = vector.broadcast %cst : f32 to vector<3x1xf32>
    %40 = arith.mulf %39, %38 : vector<3x1xf32>
    %41 = arith.addf %32, %34 : vector<3x1xf32>
    %cst_39 = arith.constant 5.000000e-01 : f32
    %42 = vector.broadcast %cst_39 : f32 to vector<3x1xf32>
    %43 = arith.mulf %42, %41 : vector<3x1xf32>
    %44 = arith.mulf %36, %37 : vector<3x1xf32>
    %cst_40 = arith.constant 0.000000e+00 : f32
    %45 = vector.broadcast %cst_40 : f32 to vector<3x1xf32>
    %46 = arith.cmpf ogt, %35, %45 : vector<3x1xf32>
    %cst_41 = arith.constant 0.000000e+00 : f32
    %47 = vector.broadcast %cst_41 : f32 to vector<3x1xf32>
    %48 = arith.cmpf ogt, %36, %47 : vector<3x1xf32>
    %49 = arith.andi %46, %48 : vector<3x1xi1>
    %cst_42 = arith.constant 0.000000e+00 : f32
    %50 = vector.broadcast %cst_42 : f32 to vector<3x1xf32>
    %51 = arith.cmpf ogt, %37, %50 : vector<3x1xf32>
    %52 = arith.andi %49, %51 : vector<3x1xi1>
    %cst_43 = arith.constant 0.000000e+00 : f32
    %53 = vector.broadcast %cst_43 : f32 to vector<8x128xf32>
    %cst_44 = arith.constant 0.000000e+00 : f32
    %54 = vector.broadcast %cst_44 : f32 to vector<8x128xf32>
    %cst_45 = arith.constant 0.000000e+00 : f32
    %55 = vector.broadcast %cst_45 : f32 to vector<8x128xf32>
    %cst_46 = arith.constant 1.000000e+00 : f32
    %56 = vector.broadcast %cst_46 : f32 to vector<8x128xf32>
    %cst_47 = arith.constant 1.000000e+00 : f32
    %57 = vector.broadcast %cst_47 : f32 to vector<8x128xf32>
    %cst_48 = arith.constant 0.000000e+00 : f32
    %58 = vector.broadcast %cst_48 : f32 to vector<8x128xf32>
    %59 = vector.extract_strided_slice %31 {offsets = [0, 0], sizes = [1, 1], strides = [1, 1]} : vector<3x1xf32> to vector<1x1xf32>
    %60 = vector.extract_strided_slice %32 {offsets = [0, 0], sizes = [1, 1], strides = [1, 1]} : vector<3x1xf32> to vector<1x1xf32>
    %61 = vector.extract_strided_slice %33 {offsets = [0, 0], sizes = [1, 1], strides = [1, 1]} : vector<3x1xf32> to vector<1x1xf32>
    %62 = vector.extract_strided_slice %34 {offsets = [0, 0], sizes = [1, 1], strides = [1, 1]} : vector<3x1xf32> to vector<1x1xf32>
    %63 = vector.extract_strided_slice %40 {offsets = [0, 0], sizes = [1, 1], strides = [1, 1]} : vector<3x1xf32> to vector<1x1xf32>
    %64 = vector.extract_strided_slice %43 {offsets = [0, 0], sizes = [1, 1], strides = [1, 1]} : vector<3x1xf32> to vector<1x1xf32>
    %65 = vector.extract_strided_slice %36 {offsets = [0, 0], sizes = [1, 1], strides = [1, 1]} : vector<3x1xf32> to vector<1x1xf32>
    %66 = vector.extract_strided_slice %37 {offsets = [0, 0], sizes = [1, 1], strides = [1, 1]} : vector<3x1xf32> to vector<1x1xf32>
    %67 = vector.extract_strided_slice %44 {offsets = [0, 0], sizes = [1, 1], strides = [1, 1]} : vector<3x1xf32> to vector<1x1xf32>
    %68 = vector.extract_strided_slice %35 {offsets = [0, 0], sizes = [1, 1], strides = [1, 1]} : vector<3x1xf32> to vector<1x1xf32>
    %69 = vector.extract_strided_slice %52 {offsets = [0, 0], sizes = [1, 1], strides = [1, 1]} : vector<3x1xi1> to vector<1x1xi1>
    %70 = vector.broadcast %61 : vector<1x1xf32> to vector<8x128xf32>
    %71 = arith.minimumf %70, %9 : vector<8x128xf32>
    %72 = vector.broadcast %59 : vector<1x1xf32> to vector<8x128xf32>
    %73 = arith.maximumf %72, %5 : vector<8x128xf32>
    %74 = arith.subf %71, %73 : vector<8x128xf32>
    %cst_49 = arith.constant 0.000000e+00 : f32
    %75 = vector.broadcast %cst_49 : f32 to vector<8x128xf32>
    %76 = arith.maximumf %74, %75 : vector<8x128xf32>
    %77 = vector.broadcast %62 : vector<1x1xf32> to vector<8x128xf32>
    %78 = arith.minimumf %77, %11 : vector<8x128xf32>
    %79 = vector.broadcast %60 : vector<1x1xf32> to vector<8x128xf32>
    %80 = arith.maximumf %79, %7 : vector<8x128xf32>
    %81 = arith.subf %78, %80 : vector<8x128xf32>
    %cst_50 = arith.constant 0.000000e+00 : f32
    %82 = vector.broadcast %cst_50 : f32 to vector<8x128xf32>
    %83 = arith.maximumf %81, %82 : vector<8x128xf32>
    %84 = arith.mulf %76, %83 : vector<8x128xf32>
    %85 = vector.broadcast %67 : vector<1x1xf32> to vector<8x128xf32>
    %86 = arith.addf %85, %13 : vector<8x128xf32>
    %87 = arith.subf %86, %84 : vector<8x128xf32>
    %88 = tpu.reciprocal %87 {approx = true} : vector<8x128xf32> -> vector<8x128xf32>
    %89 = arith.mulf %84, %88 : vector<8x128xf32>
    %cst_51 = arith.constant 0.000000e+00 : f32
    %90 = vector.shape_cast %69 : vector<1x1xi1> to vector<1x1xi1>
    %91 = vector.broadcast %90 : vector<1x1xi1> to vector<8x128xi1>
    %92 = vector.broadcast %cst_51 : f32 to vector<8x128xf32>
    %93 = arith.select %91, %89, %92 : vector<8x128xi1>, vector<8x128xf32>
    %94 = arith.cmpf ogt, %93, %53 : vector<8x128xf32>
    %cst_52 = arith.constant dense<0xFF800000> : vector<8xf32>
    %95 = vector.multi_reduction <maximumf>, %93, %cst_52 [1] : vector<8x128xf32> to vector<8xf32>
    %96 = vector.shape_cast %95 : vector<8xf32> to vector<8x1xf32>
    %cst_53 = arith.constant dense<0xFF800000> : vector<1xf32>
    %97 = vector.multi_reduction <maximumf>, %96, %cst_53 [0] : vector<8x1xf32> to vector<1xf32>
    %98 = vector.shape_cast %97 : vector<1xf32> to vector<1x1xf32>
    %99 = vector.broadcast %98 : vector<1x1xf32> to vector<8x128xf32>
    %100 = arith.cmpf oeq, %93, %99 : vector<8x128xf32>
    %c1073741824_i32 = arith.constant 1073741824 : i32
    %101 = vector.broadcast %c1073741824_i32 : i32 to vector<8x128xi32>
    %102 = arith.select %100, %28, %101 : vector<8x128xi1>, vector<8x128xi32>
    %cst_54 = arith.constant dense<2147483647> : vector<8xi32>
    %103 = vector.multi_reduction <minsi>, %102, %cst_54 [1] : vector<8x128xi32> to vector<8xi32>
    %104 = vector.shape_cast %103 : vector<8xi32> to vector<8x1xi32>
    %cst_55 = arith.constant dense<2147483647> : vector<1xi32>
    %105 = vector.multi_reduction <minsi>, %104, %cst_55 [0] : vector<8x1xi32> to vector<1xi32>
    %106 = vector.shape_cast %105 : vector<1xi32> to vector<1x1xi32>
    %107 = vector.broadcast %106 : vector<1x1xi32> to vector<8x128xi32>
    %108 = arith.cmpi eq, %28, %107 : vector<8x128xi32>
    %109 = vector.broadcast %69 : vector<1x1xi1> to vector<8x128xi1>
    %110 = arith.andi %108, %109 : vector<8x128xi1>
    %111 = arith.ori %94, %110 : vector<8x128xi1>
    %112 = arith.select %94, %93, %53 : vector<8x128xi1>, vector<8x128xf32>
    %cst_56 = arith.constant 2.000000e+00 : f32
    %113 = vector.broadcast %cst_56 : f32 to vector<8x128xf32>
    %114 = arith.select %110, %113, %112 : vector<8x128xi1>, vector<8x128xf32>
    %115 = vector.shape_cast %63 : vector<1x1xf32> to vector<1x1xf32>
    %116 = vector.broadcast %115 : vector<1x1xf32> to vector<8x128xf32>
    %117 = arith.select %111, %116, %54 : vector<8x128xi1>, vector<8x128xf32>
    %118 = vector.shape_cast %64 : vector<1x1xf32> to vector<1x1xf32>
    %119 = vector.broadcast %118 : vector<1x1xf32> to vector<8x128xf32>
    %120 = arith.select %111, %119, %55 : vector<8x128xi1>, vector<8x128xf32>
    %121 = vector.shape_cast %65 : vector<1x1xf32> to vector<1x1xf32>
    %122 = vector.broadcast %121 : vector<1x1xf32> to vector<8x128xf32>
    %123 = arith.select %111, %122, %56 : vector<8x128xi1>, vector<8x128xf32>
    %124 = vector.shape_cast %66 : vector<1x1xf32> to vector<1x1xf32>
    %125 = vector.broadcast %124 : vector<1x1xf32> to vector<8x128xf32>
    %126 = arith.select %111, %125, %57 : vector<8x128xi1>, vector<8x128xf32>
    %127 = vector.shape_cast %68 : vector<1x1xf32> to vector<1x1xf32>
    %128 = vector.broadcast %127 : vector<1x1xf32> to vector<8x128xf32>
    %129 = arith.select %111, %128, %58 : vector<8x128xi1>, vector<8x128xf32>
    %130 = vector.extract_strided_slice %31 {offsets = [1, 0], sizes = [1, 1], strides = [1, 1]} : vector<3x1xf32> to vector<1x1xf32>
    %131 = vector.extract_strided_slice %32 {offsets = [1, 0], sizes = [1, 1], strides = [1, 1]} : vector<3x1xf32> to vector<1x1xf32>
    %132 = vector.extract_strided_slice %33 {offsets = [1, 0], sizes = [1, 1], strides = [1, 1]} : vector<3x1xf32> to vector<1x1xf32>
    %133 = vector.extract_strided_slice %34 {offsets = [1, 0], sizes = [1, 1], strides = [1, 1]} : vector<3x1xf32> to vector<1x1xf32>
    %134 = vector.extract_strided_slice %40 {offsets = [1, 0], sizes = [1, 1], strides = [1, 1]} : vector<3x1xf32> to vector<1x1xf32>
    %135 = vector.extract_strided_slice %43 {offsets = [1, 0], sizes = [1, 1], strides = [1, 1]} : vector<3x1xf32> to vector<1x1xf32>
    %136 = vector.extract_strided_slice %36 {offsets = [1, 0], sizes = [1, 1], strides = [1, 1]} : vector<3x1xf32> to vector<1x1xf32>
    %137 = vector.extract_strided_slice %37 {offsets = [1, 0], sizes = [1, 1], strides = [1, 1]} : vector<3x1xf32> to vector<1x1xf32>
    %138 = vector.extract_strided_slice %44 {offsets = [1, 0], sizes = [1, 1], strides = [1, 1]} : vector<3x1xf32> to vector<1x1xf32>
    %139 = vector.extract_strided_slice %35 {offsets = [1, 0], sizes = [1, 1], strides = [1, 1]} : vector<3x1xf32> to vector<1x1xf32>
    %140 = vector.extract_strided_slice %52 {offsets = [1, 0], sizes = [1, 1], strides = [1, 1]} : vector<3x1xi1> to vector<1x1xi1>
    %141 = vector.broadcast %132 : vector<1x1xf32> to vector<8x128xf32>
    %142 = arith.minimumf %141, %9 : vector<8x128xf32>
    %143 = vector.broadcast %130 : vector<1x1xf32> to vector<8x128xf32>
    %144 = arith.maximumf %143, %5 : vector<8x128xf32>
    %145 = arith.subf %142, %144 : vector<8x128xf32>
    %cst_57 = arith.constant 0.000000e+00 : f32
    %146 = vector.broadcast %cst_57 : f32 to vector<8x128xf32>
    %147 = arith.maximumf %145, %146 : vector<8x128xf32>
    %148 = vector.broadcast %133 : vector<1x1xf32> to vector<8x128xf32>
    %149 = arith.minimumf %148, %11 : vector<8x128xf32>
    %150 = vector.broadcast %131 : vector<1x1xf32> to vector<8x128xf32>
    %151 = arith.maximumf %150, %7 : vector<8x128xf32>
    %152 = arith.subf %149, %151 : vector<8x128xf32>
    %cst_58 = arith.constant 0.000000e+00 : f32
    %153 = vector.broadcast %cst_58 : f32 to vector<8x128xf32>
    %154 = arith.maximumf %152, %153 : vector<8x128xf32>
    %155 = arith.mulf %147, %154 : vector<8x128xf32>
    %156 = vector.broadcast %138 : vector<1x1xf32> to vector<8x128xf32>
    %157 = arith.addf %156, %13 : vector<8x128xf32>
    %158 = arith.subf %157, %155 : vector<8x128xf32>
    %159 = tpu.reciprocal %158 {approx = true} : vector<8x128xf32> -> vector<8x128xf32>
    %160 = arith.mulf %155, %159 : vector<8x128xf32>
    %cst_59 = arith.constant 0.000000e+00 : f32
    %161 = vector.shape_cast %140 : vector<1x1xi1> to vector<1x1xi1>
    %162 = vector.broadcast %161 : vector<1x1xi1> to vector<8x128xi1>
    %163 = vector.broadcast %cst_59 : f32 to vector<8x128xf32>
    %164 = arith.select %162, %160, %163 : vector<8x128xi1>, vector<8x128xf32>
    %165 = arith.cmpf ogt, %164, %114 : vector<8x128xf32>
    %cst_60 = arith.constant dense<0xFF800000> : vector<8xf32>
    %166 = vector.multi_reduction <maximumf>, %164, %cst_60 [1] : vector<8x128xf32> to vector<8xf32>
    %167 = vector.shape_cast %166 : vector<8xf32> to vector<8x1xf32>
    %cst_61 = arith.constant dense<0xFF800000> : vector<1xf32>
    %168 = vector.multi_reduction <maximumf>, %167, %cst_61 [0] : vector<8x1xf32> to vector<1xf32>
    %169 = vector.shape_cast %168 : vector<1xf32> to vector<1x1xf32>
    %170 = vector.broadcast %169 : vector<1x1xf32> to vector<8x128xf32>
    %171 = arith.cmpf oeq, %164, %170 : vector<8x128xf32>
    %c1073741824_i32_62 = arith.constant 1073741824 : i32
    %172 = vector.broadcast %c1073741824_i32_62 : i32 to vector<8x128xi32>
    %173 = arith.select %171, %28, %172 : vector<8x128xi1>, vector<8x128xi32>
    %cst_63 = arith.constant dense<2147483647> : vector<8xi32>
    %174 = vector.multi_reduction <minsi>, %173, %cst_63 [1] : vector<8x128xi32> to vector<8xi32>
    %175 = vector.shape_cast %174 : vector<8xi32> to vector<8x1xi32>
    %cst_64 = arith.constant dense<2147483647> : vector<1xi32>
    %176 = vector.multi_reduction <minsi>, %175, %cst_64 [0] : vector<8x1xi32> to vector<1xi32>
    %177 = vector.shape_cast %176 : vector<1xi32> to vector<1x1xi32>
    %178 = vector.broadcast %177 : vector<1x1xi32> to vector<8x128xi32>
    %179 = arith.cmpi eq, %28, %178 : vector<8x128xi32>
    %180 = vector.broadcast %140 : vector<1x1xi1> to vector<8x128xi1>
    %181 = arith.andi %179, %180 : vector<8x128xi1>
    %182 = arith.ori %165, %181 : vector<8x128xi1>
    %183 = arith.select %165, %164, %114 : vector<8x128xi1>, vector<8x128xf32>
    %cst_65 = arith.constant 2.000000e+00 : f32
    %184 = vector.broadcast %cst_65 : f32 to vector<8x128xf32>
    %185 = arith.select %181, %184, %183 : vector<8x128xi1>, vector<8x128xf32>
    %186 = vector.shape_cast %134 : vector<1x1xf32> to vector<1x1xf32>
    %187 = vector.broadcast %186 : vector<1x1xf32> to vector<8x128xf32>
    %188 = arith.select %182, %187, %117 : vector<8x128xi1>, vector<8x128xf32>
    %189 = vector.shape_cast %135 : vector<1x1xf32> to vector<1x1xf32>
    %190 = vector.broadcast %189 : vector<1x1xf32> to vector<8x128xf32>
    %191 = arith.select %182, %190, %120 : vector<8x128xi1>, vector<8x128xf32>
    %192 = vector.shape_cast %136 : vector<1x1xf32> to vector<1x1xf32>
    %193 = vector.broadcast %192 : vector<1x1xf32> to vector<8x128xf32>
    %194 = arith.select %182, %193, %123 : vector<8x128xi1>, vector<8x128xf32>
    %195 = vector.shape_cast %137 : vector<1x1xf32> to vector<1x1xf32>
    %196 = vector.broadcast %195 : vector<1x1xf32> to vector<8x128xf32>
    %197 = arith.select %182, %196, %126 : vector<8x128xi1>, vector<8x128xf32>
    %198 = vector.shape_cast %139 : vector<1x1xf32> to vector<1x1xf32>
    %199 = vector.broadcast %198 : vector<1x1xf32> to vector<8x128xf32>
    %200 = arith.select %182, %199, %129 : vector<8x128xi1>, vector<8x128xf32>
    %201 = vector.extract_strided_slice %31 {offsets = [2, 0], sizes = [1, 1], strides = [1, 1]} : vector<3x1xf32> to vector<1x1xf32>
    %202 = vector.extract_strided_slice %32 {offsets = [2, 0], sizes = [1, 1], strides = [1, 1]} : vector<3x1xf32> to vector<1x1xf32>
    %203 = vector.extract_strided_slice %33 {offsets = [2, 0], sizes = [1, 1], strides = [1, 1]} : vector<3x1xf32> to vector<1x1xf32>
    %204 = vector.extract_strided_slice %34 {offsets = [2, 0], sizes = [1, 1], strides = [1, 1]} : vector<3x1xf32> to vector<1x1xf32>
    %205 = vector.extract_strided_slice %40 {offsets = [2, 0], sizes = [1, 1], strides = [1, 1]} : vector<3x1xf32> to vector<1x1xf32>
    %206 = vector.extract_strided_slice %43 {offsets = [2, 0], sizes = [1, 1], strides = [1, 1]} : vector<3x1xf32> to vector<1x1xf32>
    %207 = vector.extract_strided_slice %36 {offsets = [2, 0], sizes = [1, 1], strides = [1, 1]} : vector<3x1xf32> to vector<1x1xf32>
    %208 = vector.extract_strided_slice %37 {offsets = [2, 0], sizes = [1, 1], strides = [1, 1]} : vector<3x1xf32> to vector<1x1xf32>
    %209 = vector.extract_strided_slice %44 {offsets = [2, 0], sizes = [1, 1], strides = [1, 1]} : vector<3x1xf32> to vector<1x1xf32>
    %210 = vector.extract_strided_slice %35 {offsets = [2, 0], sizes = [1, 1], strides = [1, 1]} : vector<3x1xf32> to vector<1x1xf32>
    %211 = vector.extract_strided_slice %52 {offsets = [2, 0], sizes = [1, 1], strides = [1, 1]} : vector<3x1xi1> to vector<1x1xi1>
    %212 = vector.broadcast %203 : vector<1x1xf32> to vector<8x128xf32>
    %213 = arith.minimumf %212, %9 : vector<8x128xf32>
    %214 = vector.broadcast %201 : vector<1x1xf32> to vector<8x128xf32>
    %215 = arith.maximumf %214, %5 : vector<8x128xf32>
    %216 = arith.subf %213, %215 : vector<8x128xf32>
    %cst_66 = arith.constant 0.000000e+00 : f32
    %217 = vector.broadcast %cst_66 : f32 to vector<8x128xf32>
    %218 = arith.maximumf %216, %217 : vector<8x128xf32>
    %219 = vector.broadcast %204 : vector<1x1xf32> to vector<8x128xf32>
    %220 = arith.minimumf %219, %11 : vector<8x128xf32>
    %221 = vector.broadcast %202 : vector<1x1xf32> to vector<8x128xf32>
    %222 = arith.maximumf %221, %7 : vector<8x128xf32>
    %223 = arith.subf %220, %222 : vector<8x128xf32>
    %cst_67 = arith.constant 0.000000e+00 : f32
    %224 = vector.broadcast %cst_67 : f32 to vector<8x128xf32>
    %225 = arith.maximumf %223, %224 : vector<8x128xf32>
    %226 = arith.mulf %218, %225 : vector<8x128xf32>
    %227 = vector.broadcast %209 : vector<1x1xf32> to vector<8x128xf32>
    %228 = arith.addf %227, %13 : vector<8x128xf32>
    %229 = arith.subf %228, %226 : vector<8x128xf32>
    %230 = tpu.reciprocal %229 {approx = true} : vector<8x128xf32> -> vector<8x128xf32>
    %231 = arith.mulf %226, %230 : vector<8x128xf32>
    %cst_68 = arith.constant 0.000000e+00 : f32
    %232 = vector.shape_cast %211 : vector<1x1xi1> to vector<1x1xi1>
    %233 = vector.broadcast %232 : vector<1x1xi1> to vector<8x128xi1>
    %234 = vector.broadcast %cst_68 : f32 to vector<8x128xf32>
    %235 = arith.select %233, %231, %234 : vector<8x128xi1>, vector<8x128xf32>
    %236 = arith.cmpf ogt, %235, %185 : vector<8x128xf32>
    %cst_69 = arith.constant dense<0xFF800000> : vector<8xf32>
    %237 = vector.multi_reduction <maximumf>, %235, %cst_69 [1] : vector<8x128xf32> to vector<8xf32>
    %238 = vector.shape_cast %237 : vector<8xf32> to vector<8x1xf32>
    %cst_70 = arith.constant dense<0xFF800000> : vector<1xf32>
    %239 = vector.multi_reduction <maximumf>, %238, %cst_70 [0] : vector<8x1xf32> to vector<1xf32>
    %240 = vector.shape_cast %239 : vector<1xf32> to vector<1x1xf32>
    %241 = vector.broadcast %240 : vector<1x1xf32> to vector<8x128xf32>
    %242 = arith.cmpf oeq, %235, %241 : vector<8x128xf32>
    %c1073741824_i32_71 = arith.constant 1073741824 : i32
    %243 = vector.broadcast %c1073741824_i32_71 : i32 to vector<8x128xi32>
    %244 = arith.select %242, %28, %243 : vector<8x128xi1>, vector<8x128xi32>
    %cst_72 = arith.constant dense<2147483647> : vector<8xi32>
    %245 = vector.multi_reduction <minsi>, %244, %cst_72 [1] : vector<8x128xi32> to vector<8xi32>
    %246 = vector.shape_cast %245 : vector<8xi32> to vector<8x1xi32>
    %cst_73 = arith.constant dense<2147483647> : vector<1xi32>
    %247 = vector.multi_reduction <minsi>, %246, %cst_73 [0] : vector<8x1xi32> to vector<1xi32>
    %248 = vector.shape_cast %247 : vector<1xi32> to vector<1x1xi32>
    %249 = vector.broadcast %248 : vector<1x1xi32> to vector<8x128xi32>
    %250 = arith.cmpi eq, %28, %249 : vector<8x128xi32>
    %251 = vector.broadcast %211 : vector<1x1xi1> to vector<8x128xi1>
    %252 = arith.andi %250, %251 : vector<8x128xi1>
    %253 = arith.ori %236, %252 : vector<8x128xi1>
    %254 = arith.select %236, %235, %185 : vector<8x128xi1>, vector<8x128xf32>
    %cst_74 = arith.constant 2.000000e+00 : f32
    %255 = vector.broadcast %cst_74 : f32 to vector<8x128xf32>
    %256 = arith.select %252, %255, %254 : vector<8x128xi1>, vector<8x128xf32>
    %257 = vector.shape_cast %205 : vector<1x1xf32> to vector<1x1xf32>
    %258 = vector.broadcast %257 : vector<1x1xf32> to vector<8x128xf32>
    %259 = arith.select %253, %258, %188 : vector<8x128xi1>, vector<8x128xf32>
    %260 = vector.shape_cast %206 : vector<1x1xf32> to vector<1x1xf32>
    %261 = vector.broadcast %260 : vector<1x1xf32> to vector<8x128xf32>
    %262 = arith.select %253, %261, %191 : vector<8x128xi1>, vector<8x128xf32>
    %263 = vector.shape_cast %207 : vector<1x1xf32> to vector<1x1xf32>
    %264 = vector.broadcast %263 : vector<1x1xf32> to vector<8x128xf32>
    %265 = arith.select %253, %264, %194 : vector<8x128xi1>, vector<8x128xf32>
    %266 = vector.shape_cast %208 : vector<1x1xf32> to vector<1x1xf32>
    %267 = vector.broadcast %266 : vector<1x1xf32> to vector<8x128xf32>
    %268 = arith.select %253, %267, %197 : vector<8x128xi1>, vector<8x128xf32>
    %269 = vector.shape_cast %210 : vector<1x1xf32> to vector<1x1xf32>
    %270 = vector.broadcast %269 : vector<1x1xf32> to vector<8x128xf32>
    %271 = arith.select %253, %270, %200 : vector<8x128xi1>, vector<8x128xf32>
    %cst_75 = arith.constant 3.500000e-01 : f32
    %272 = vector.broadcast %cst_75 : f32 to vector<8x128xf32>
    %273 = arith.cmpf oge, %256, %272 : vector<8x128xf32>
    %cst_76 = arith.constant 0.000000e+00 : f32
    %274 = vector.broadcast %cst_76 : f32 to vector<8x128xf32>
    %275 = arith.cmpf ogt, %271, %274 : vector<8x128xf32>
    %276 = arith.andi %273, %275 : vector<8x128xi1>
    %277 = arith.extui %276 : vector<8x128xi1> to vector<8x128xi32>
    %278 = arith.sitofp %277 : vector<8x128xi32> to vector<8x128xf32>
    %cst_77 = arith.constant dense<0.000000e+00> : vector<8xf32>
    %279 = vector.multi_reduction <add>, %278, %cst_77 [1] : vector<8x128xf32> to vector<8xf32>
    %280 = vector.shape_cast %279 : vector<8xf32> to vector<8x1xf32>
    %cst_78 = arith.constant dense<0.000000e+00> : vector<1xf32>
    %281 = vector.multi_reduction <add>, %280, %cst_78 [0] : vector<8x1xf32> to vector<1xf32>
    %282 = vector.shape_cast %281 : vector<1xf32> to vector<1x1xf32>
    %c0_79 = arith.constant 0 : index
    %c0_80 = arith.constant 0 : index
    %c0_81 = arith.constant 0 : index
    %c0_82 = arith.constant 0 : index
    %283 = vector.load %arg4[%c0_79, %c0_80, %c0_81, %c0_82] : memref<1x4x8x128xf32, #tpu.memory_space<vmem>>, vector<1x1x8x128xf32>
    %284 = vector.shape_cast %283 : vector<1x1x8x128xf32> to vector<8x128xf32>
    %c0_83 = arith.constant 0 : index
    %c1_84 = arith.constant 1 : index
    %c0_85 = arith.constant 0 : index
    %c0_86 = arith.constant 0 : index
    %285 = vector.load %arg4[%c0_83, %c1_84, %c0_85, %c0_86] : memref<1x4x8x128xf32, #tpu.memory_space<vmem>>, vector<1x1x8x128xf32>
    %286 = vector.shape_cast %285 : vector<1x1x8x128xf32> to vector<8x128xf32>
    %c0_87 = arith.constant 0 : index
    %c2_88 = arith.constant 2 : index
    %c0_89 = arith.constant 0 : index
    %c0_90 = arith.constant 0 : index
    %287 = vector.load %arg4[%c0_87, %c2_88, %c0_89, %c0_90] : memref<1x4x8x128xf32, #tpu.memory_space<vmem>>, vector<1x1x8x128xf32>
    %288 = vector.shape_cast %287 : vector<1x1x8x128xf32> to vector<8x128xf32>
    %c0_91 = arith.constant 0 : index
    %c3_92 = arith.constant 3 : index
    %c0_93 = arith.constant 0 : index
    %c0_94 = arith.constant 0 : index
    %289 = vector.load %arg4[%c0_91, %c3_92, %c0_93, %c0_94] : memref<1x4x8x128xf32, #tpu.memory_space<vmem>>, vector<1x1x8x128xf32>
    %290 = vector.shape_cast %289 : vector<1x1x8x128xf32> to vector<8x128xf32>
    %291 = arith.subf %259, %1 : vector<8x128xf32>
    %292 = arith.mulf %291, %15 : vector<8x128xf32>
    %293 = arith.subf %262, %3 : vector<8x128xf32>
    %294 = arith.mulf %293, %17 : vector<8x128xf32>
    %295 = arith.mulf %265, %19 : vector<8x128xf32>
    %296 = math.log %295 : vector<8x128xf32>
    %cst_95 = arith.constant 5.000000e+00 : f32
    %297 = vector.broadcast %cst_95 : f32 to vector<8x128xf32>
    %298 = arith.mulf %296, %297 : vector<8x128xf32>
    %299 = arith.mulf %268, %21 : vector<8x128xf32>
    %300 = math.log %299 : vector<8x128xf32>
    %cst_96 = arith.constant 5.000000e+00 : f32
    %301 = vector.broadcast %cst_96 : f32 to vector<8x128xf32>
    %302 = arith.mulf %300, %301 : vector<8x128xf32>
    %303 = arith.subf %284, %292 : vector<8x128xf32>
    %304 = math.absf %303 : vector<8x128xf32>
    %cst_97 = arith.constant 1.000000e+00 : f32
    %305 = vector.broadcast %cst_97 : f32 to vector<8x128xf32>
    %306 = arith.cmpf olt, %304, %305 : vector<8x128xf32>
    %cst_98 = arith.constant 5.000000e-01 : f32
    %307 = vector.broadcast %cst_98 : f32 to vector<8x128xf32>
    %308 = arith.mulf %307, %303 : vector<8x128xf32>
    %309 = arith.mulf %308, %303 : vector<8x128xf32>
    %cst_99 = arith.constant 5.000000e-01 : f32
    %310 = vector.broadcast %cst_99 : f32 to vector<8x128xf32>
    %311 = arith.subf %304, %310 : vector<8x128xf32>
    %312 = arith.select %306, %309, %311 : vector<8x128xi1>, vector<8x128xf32>
    %313 = arith.subf %286, %294 : vector<8x128xf32>
    %314 = math.absf %313 : vector<8x128xf32>
    %cst_100 = arith.constant 1.000000e+00 : f32
    %315 = vector.broadcast %cst_100 : f32 to vector<8x128xf32>
    %316 = arith.cmpf olt, %314, %315 : vector<8x128xf32>
    %cst_101 = arith.constant 5.000000e-01 : f32
    %317 = vector.broadcast %cst_101 : f32 to vector<8x128xf32>
    %318 = arith.mulf %317, %313 : vector<8x128xf32>
    %319 = arith.mulf %318, %313 : vector<8x128xf32>
    %cst_102 = arith.constant 5.000000e-01 : f32
    %320 = vector.broadcast %cst_102 : f32 to vector<8x128xf32>
    %321 = arith.subf %314, %320 : vector<8x128xf32>
    %322 = arith.select %316, %319, %321 : vector<8x128xi1>, vector<8x128xf32>
    %323 = arith.addf %312, %322 : vector<8x128xf32>
    %324 = arith.subf %288, %298 : vector<8x128xf32>
    %325 = math.absf %324 : vector<8x128xf32>
    %cst_103 = arith.constant 1.000000e+00 : f32
    %326 = vector.broadcast %cst_103 : f32 to vector<8x128xf32>
    %327 = arith.cmpf olt, %325, %326 : vector<8x128xf32>
    %cst_104 = arith.constant 5.000000e-01 : f32
    %328 = vector.broadcast %cst_104 : f32 to vector<8x128xf32>
    %329 = arith.mulf %328, %324 : vector<8x128xf32>
    %330 = arith.mulf %329, %324 : vector<8x128xf32>
    %cst_105 = arith.constant 5.000000e-01 : f32
    %331 = vector.broadcast %cst_105 : f32 to vector<8x128xf32>
    %332 = arith.subf %325, %331 : vector<8x128xf32>
    %333 = arith.select %327, %330, %332 : vector<8x128xi1>, vector<8x128xf32>
    %334 = arith.addf %323, %333 : vector<8x128xf32>
    %335 = arith.subf %290, %302 : vector<8x128xf32>
    %336 = math.absf %335 : vector<8x128xf32>
    %cst_106 = arith.constant 1.000000e+00 : f32
    %337 = vector.broadcast %cst_106 : f32 to vector<8x128xf32>
    %338 = arith.cmpf olt, %336, %337 : vector<8x128xf32>
    %cst_107 = arith.constant 5.000000e-01 : f32
    %339 = vector.broadcast %cst_107 : f32 to vector<8x128xf32>
    %340 = arith.mulf %339, %335 : vector<8x128xf32>
    %341 = arith.mulf %340, %335 : vector<8x128xf32>
    %cst_108 = arith.constant 5.000000e-01 : f32
    %342 = vector.broadcast %cst_108 : f32 to vector<8x128xf32>
    %343 = arith.subf %336, %342 : vector<8x128xf32>
    %344 = arith.select %338, %341, %343 : vector<8x128xi1>, vector<8x128xf32>
    %345 = arith.addf %334, %344 : vector<8x128xf32>
    %cst_109 = arith.constant 0.000000e+00 : f32
    %346 = vector.broadcast %cst_109 : f32 to vector<8x128xf32>
    %347 = arith.select %276, %345, %346 : vector<8x128xi1>, vector<8x128xf32>
    %cst_110 = arith.constant dense<0.000000e+00> : vector<8xf32>
    %348 = vector.multi_reduction <add>, %347, %cst_110 [1] : vector<8x128xf32> to vector<8xf32>
    %349 = vector.shape_cast %348 : vector<8xf32> to vector<8x1xf32>
    %cst_111 = arith.constant dense<0.000000e+00> : vector<1xf32>
    %350 = vector.multi_reduction <add>, %349, %cst_111 [0] : vector<8x1xf32> to vector<1xf32>
    %351 = vector.shape_cast %350 : vector<1xf32> to vector<1x1xf32>
    %c0_112 = arith.constant 0 : index
    %c0_113 = arith.constant 0 : index
    %c0_114 = arith.constant 0 : index
    %352 = vector.load %arg5[%c0_112, %c0_113, %c0_114] : memref<1x8x128xf32, #tpu.memory_space<vmem>>, vector<1x8x128xf32>
    %353 = vector.shape_cast %352 : vector<1x8x128xf32> to vector<8x128xf32>
    %cst_115 = arith.constant 0.000000e+00 : f32
    %354 = vector.broadcast %cst_115 : f32 to vector<8x128xf32>
    %355 = arith.subf %354, %353 : vector<8x128xf32>
    %356 = arith.select %276, %355, %353 : vector<8x128xi1>, vector<8x128xf32>
    %cst_116 = arith.constant 0.000000e+00 : f32
    %357 = vector.broadcast %cst_116 : f32 to vector<8x128xf32>
    %358 = arith.maximumf %356, %357 : vector<8x128xf32>
    %359 = math.absf %356 : vector<8x128xf32>
    %cst_117 = arith.constant 0.000000e+00 : f32
    %360 = vector.broadcast %cst_117 : f32 to vector<8x128xf32>
    %361 = arith.subf %360, %359 : vector<8x128xf32>
    %362 = math.exp %361 : vector<8x128xf32>
    %cst_118 = arith.constant 1.000000e+00 : f32
    %363 = vector.broadcast %cst_118 : f32 to vector<8x128xf32>
    %364 = arith.addf %363, %362 : vector<8x128xf32>
    %365 = math.log %364 : vector<8x128xf32>
    %366 = arith.addf %358, %365 : vector<8x128xf32>
    %cst_119 = arith.constant 0.000000e+00 : f32
    %367 = vector.broadcast %cst_119 : f32 to vector<8x128xf32>
    %368 = arith.select %276, %366, %367 : vector<8x128xi1>, vector<8x128xf32>
    %cst_120 = arith.constant dense<0.000000e+00> : vector<8xf32>
    %369 = vector.multi_reduction <add>, %368, %cst_120 [1] : vector<8x128xf32> to vector<8xf32>
    %370 = vector.shape_cast %369 : vector<8xf32> to vector<8x1xf32>
    %cst_121 = arith.constant dense<0.000000e+00> : vector<1xf32>
    %371 = vector.multi_reduction <add>, %370, %cst_121 [0] : vector<8x1xf32> to vector<1xf32>
    %372 = vector.shape_cast %371 : vector<1xf32> to vector<1x1xf32>
    %cst_122 = arith.constant dense<true> : vector<8x128xi1>
    %373 = arith.xori %276, %cst_122 : vector<8x128xi1>
    %cst_123 = arith.constant 0.000000e+00 : f32
    %374 = vector.broadcast %cst_123 : f32 to vector<8x128xf32>
    %375 = arith.cmpf ogt, %23, %374 : vector<8x128xf32>
    %376 = arith.andi %373, %375 : vector<8x128xi1>
    %cst_124 = arith.constant 0.000000e+00 : f32
    %377 = vector.broadcast %cst_124 : f32 to vector<8x128xf32>
    %378 = arith.select %376, %366, %377 : vector<8x128xi1>, vector<8x128xf32>
    %cst_125 = arith.constant 3.000000e+00 : f32
    %379 = vector.broadcast %cst_125 : f32 to vector<1x1xf32>
    %380 = arith.mulf %379, %282 : vector<1x1xf32>
    %cst_126 = arith.constant 2.550000e+02 : f32
    %381 = vector.broadcast %cst_126 : f32 to vector<1x1xf32>
    %382 = arith.minimumf %380, %381 : vector<1x1xf32>
    %cst_127 = arith.constant dense<0xFF800000> : vector<8xf32>
    %383 = vector.multi_reduction <maximumf>, %378, %cst_127 [1] : vector<8x128xf32> to vector<8xf32>
    %384 = vector.shape_cast %383 : vector<8xf32> to vector<8x1xf32>
    %cst_128 = arith.constant dense<0xFF800000> : vector<1xf32>
    %385 = vector.multi_reduction <maximumf>, %384, %cst_128 [0] : vector<8x1xf32> to vector<1xf32>
    %386 = vector.shape_cast %385 : vector<1xf32> to vector<1x1xf32>
    %cst_129 = arith.constant 1.000000e+00 : f32
    %387 = vector.broadcast %cst_129 : f32 to vector<1x1xf32>
    %388 = arith.addf %386, %387 : vector<1x1xf32>
    %cst_130 = arith.constant 0.000000e+00 : f32
    %389 = vector.broadcast %cst_130 : f32 to vector<1x1xf32>
    %c0_i32 = arith.constant 0 : i32
    %c24_i32 = arith.constant 24 : i32
    %390 = arith.addi %c0_i32, %c24_i32 : i32
    %c1_i32 = arith.constant 1 : i32
    %391:2 = scf.for %arg7 = %c0_i32 to %390 step %c1_i32 iter_args(%arg8 = %389, %arg9 = %388) -> (vector<1x1xf32>, vector<1x1xf32>)  : i32 {
      %419 = arith.addf %arg8, %arg9 : vector<1x1xf32>
      %cst_140 = arith.constant 5.000000e-01 : f32
      %420 = vector.broadcast %cst_140 : f32 to vector<1x1xf32>
      %421 = arith.mulf %420, %419 : vector<1x1xf32>
      %422 = vector.broadcast %421 : vector<1x1xf32> to vector<8x128xf32>
      %423 = arith.cmpf oge, %378, %422 : vector<8x128xf32>
      %cst_141 = arith.constant 1.000000e+00 : f32
      %cst_142 = arith.constant 0.000000e+00 : f32
      %424 = vector.broadcast %cst_141 : f32 to vector<8x128xf32>
      %425 = vector.broadcast %cst_142 : f32 to vector<8x128xf32>
      %426 = arith.select %423, %424, %425 : vector<8x128xi1>, vector<8x128xf32>
      %cst_143 = arith.constant dense<0.000000e+00> : vector<8xf32>
      %427 = vector.multi_reduction <add>, %426, %cst_143 [1] : vector<8x128xf32> to vector<8xf32>
      %428 = vector.shape_cast %427 : vector<8xf32> to vector<8x1xf32>
      %cst_144 = arith.constant dense<0.000000e+00> : vector<1xf32>
      %429 = vector.multi_reduction <add>, %428, %cst_144 [0] : vector<8x1xf32> to vector<1xf32>
      %430 = vector.shape_cast %429 : vector<1xf32> to vector<1x1xf32>
      %431 = arith.cmpf oge, %430, %382 : vector<1x1xf32>
      %432 = arith.select %431, %421, %arg8 : vector<1x1xi1>, vector<1x1xf32>
      %433 = arith.select %431, %arg9, %421 : vector<1x1xi1>, vector<1x1xf32>
      scf.yield %432, %433 : vector<1x1xf32>, vector<1x1xf32>
    }
    %392 = arith.mulf %382, %391#0 : vector<1x1xf32>
    %393 = vector.broadcast %391#0 : vector<1x1xf32> to vector<8x128xf32>
    %394 = arith.subf %378, %393 : vector<8x128xf32>
    %cst_131 = arith.constant 0.000000e+00 : f32
    %395 = vector.broadcast %cst_131 : f32 to vector<8x128xf32>
    %396 = arith.maximumf %394, %395 : vector<8x128xf32>
    %cst_132 = arith.constant dense<0.000000e+00> : vector<8xf32>
    %397 = vector.multi_reduction <add>, %396, %cst_132 [1] : vector<8x128xf32> to vector<8xf32>
    %398 = vector.shape_cast %397 : vector<8xf32> to vector<8x1xf32>
    %cst_133 = arith.constant dense<0.000000e+00> : vector<1xf32>
    %399 = vector.multi_reduction <add>, %398, %cst_133 [0] : vector<8x1xf32> to vector<1xf32>
    %400 = vector.shape_cast %399 : vector<1xf32> to vector<1x1xf32>
    %401 = arith.addf %392, %400 : vector<1x1xf32>
    %402 = arith.addf %372, %401 : vector<1x1xf32>
    %403 = tpu.iota {dimensions = array<i32: 1>} : vector<1x3xi32>
    %c0_i32_134 = arith.constant 0 : i32
    %404 = vector.broadcast %c0_i32_134 : i32 to vector<1x3xi32>
    %405 = arith.cmpi eq, %403, %404 : vector<1x3xi32>
    %c1_i32_135 = arith.constant 1 : i32
    %406 = vector.broadcast %c1_i32_135 : i32 to vector<1x3xi32>
    %407 = arith.cmpi eq, %403, %406 : vector<1x3xi32>
    %408 = vector.shape_cast %402 : vector<1x1xf32> to vector<1x1xf32>
    %409 = vector.broadcast %408 : vector<1x1xf32> to vector<1x3xf32>
    %410 = vector.shape_cast %282 : vector<1x1xf32> to vector<1x1xf32>
    %411 = vector.broadcast %410 : vector<1x1xf32> to vector<1x3xf32>
    %412 = arith.select %407, %409, %411 : vector<1x3xi1>, vector<1x3xf32>
    %413 = vector.shape_cast %351 : vector<1x1xf32> to vector<1x1xf32>
    %414 = vector.broadcast %413 : vector<1x1xf32> to vector<1x3xf32>
    %415 = arith.select %405, %414, %412 : vector<1x3xi1>, vector<1x3xf32>
    %c0_136 = arith.constant 0 : index
    %c0_137 = arith.constant 0 : index
    %c0_138 = arith.constant 0 : index
    %c0_139 = arith.constant 0 : index
    %416 = vector.load %arg6[%c0_136, %c0_137, %c0_138, %c0_139] : memref<1x1x1x3xf32, #tpu.memory_space<vmem>>, vector<1x1x1x3xf32>
    %417 = vector.shape_cast %416 : vector<1x1x1x3xf32> to vector<1x3xf32>
    %418 = vector.shape_cast %415 : vector<1x3xf32> to vector<1x1x1x3xf32>
    tpu.vector_store %arg6[%c0_136, %c0_137, %c0_138, %c0_139], %418 {strides = array<i32>} : memref<1x1x1x3xf32, #tpu.memory_space<vmem>>, vector<1x1x1x3xf32>,
    return
  }
  func.func @transform_0(%arg0: i32, %arg1: i32) -> (i32, i32, i32) {
    %c0_i32 = arith.constant 0 : i32
    %c0_i32_0 = arith.constant 0 : i32
    %c0_i32_1 = arith.constant 0 : i32
    return %arg1, %c0_i32, %c0_i32_0 : i32, i32, i32
  }
  func.func @transform_1(%arg0: i32, %arg1: i32) -> (i32, i32, i32, i32) {
    %c0_i32 = arith.constant 0 : i32
    %c0_i32_0 = arith.constant 0 : i32
    %c0_i32_1 = arith.constant 0 : i32
    %c0_i32_2 = arith.constant 0 : i32
    return %arg0, %c0_i32, %c0_i32_0, %c0_i32_1 : i32, i32, i32, i32
  }
  func.func @transform_2(%arg0: i32, %arg1: i32) -> (i32, i32, i32, i32) {
    %c2_i32 = arith.constant 2 : i32
    %0 = arith.muli %arg0, %c2_i32 : i32
    %1 = arith.addi %0, %arg1 : i32
    %c0_i32 = arith.constant 0 : i32
    %c0_i32_0 = arith.constant 0 : i32
    %c0_i32_1 = arith.constant 0 : i32
    %c0_i32_2 = arith.constant 0 : i32
    return %1, %c0_i32, %c0_i32_0, %c0_i32_1 : i32, i32, i32, i32
  }
  func.func @transform_3(%arg0: i32, %arg1: i32) -> (i32, i32, i32) {
    %c2_i32 = arith.constant 2 : i32
    %0 = arith.muli %arg0, %c2_i32 : i32
    %1 = arith.addi %0, %arg1 : i32
    %c0_i32 = arith.constant 0 : i32
    %c0_i32_0 = arith.constant 0 : i32
    %c0_i32_1 = arith.constant 0 : i32
    return %1, %c0_i32, %c0_i32_0 : i32, i32, i32
  }
  func.func @transform_4(%arg0: i32, %arg1: i32) -> (i32, i32, i32, i32) {
    %c0_i32 = arith.constant 0 : i32
    %c0_i32_0 = arith.constant 0 : i32
    %c0_i32_1 = arith.constant 0 : i32
    return %arg0, %arg1, %c0_i32, %c0_i32_0 : i32, i32, i32, i32
  }
}

</mosaic_0001>

<bundles_post_ra>
// kernel: multibox_loss.1
= control target key start
LH: loop header
LB: loop body
LE: loop exit
PB: predicated region body
PF: predicated region fallthrough
CT: control target
= control target key end

     0   :  { %s5652_s0 = inlined_call_operand.hbm [shape: f32[2,3,5], index: 0, kind: input, shape index: {}]   ;;  %s5653_s1 = inlined_call_operand.hbm [shape: f32[3,12,8,128], index: 1, kind: input, shape index: {}]   ;;  %s5654_s2 = inlined_call_operand.hbm [shape: f32[6,4,8,128], index: 2, kind: input, shape index: {}]   ;;  %s5655_s3 = inlined_call_operand.hbm [shape: f32[6,8,128], index: 3, kind: input, shape index: {}]   ;;  %s5656_s4 = inlined_call_operand.hbm [shape: f32[3,2,1,3], index: 4, kind: output, shape index: {}]  }
   0x1   :  { %5778 = sst [smem:[#allocation75_spill]] %s5652_s0 }
   0x2   :  { %5779 = sst [smem:[#allocation76_spill]] %s5653_s1 }
   0x3   :  { %5780 = sst [smem:[#allocation77_spill]] %s5654_s2 }
   0x4   :  { %5781 = sst [smem:[#allocation78_spill]] %s5655_s3 }
   0x5   :  { %5782 = sst [smem:[#allocation79_spill]] %s5656_s4 }
   0x6   :  { %9 = vsyncpa [#allocation3], 0 }
   0x7   :  { %11 = vsyncpa [#allocation3 + $0x1], 0 }
   0x8   :  { %12 = vsyncpa [#allocation6], 0 }
   0x9   :  { %14 = vsyncpa [#allocation6 + $0x1], 0 }
   0xa   :  { %15 = vsyncpa [#allocation9], 0 }
   0xb   :  { %17 = vsyncpa [#allocation9 + $0x1], 0 }
   0xc   :  { %18 = vsyncpa [#allocation4], 0 }
   0xd   :  { %20 = vsyncpa [#allocation4 + $0x1], 0  ;;  %s2970_s15 = smov 0   ;;  %s2972_s16 = smov 0  }
   0xe   :  { %s2974_s17 = smov 0   ;;  %s2976_s18 = smov 0  }
   0xf   :  { %s2978_s19 = smov 0   ;;  %s2980_s20 = smov 0  }
  0x10   :  { %s2982_s21 = smov 0   ;;  %s2984_s22 = smov 0  }
  0x11   :  { %s2986_s23 = smov 0   ;;  %s2988_s24 = smov 0  }
  0x12   :  { %s2990_s25 = smov 0   ;;  %s2992_s26 = smov 0  }
  0x13   :  { %s2994_s27 = smov 0   ;;  %s2996_s28 = smov 0  }
  0x14   :  { %s2998_s29 = smov 0   ;;  %s3000_s30 = smov 0  }
  0x15   :  { %s3002_s5 = smov 0  }
  0x16 LB: > { %5783 = sst [smem:[#allocation16_spill]] %s2877_s22  ;;  %p53_p0 = scmp.eq.s32.totalorder %s2913_s5, 0  ;;  %s2913_s5 = sphi %s3002_s5, %s26_s5   ;;  %s2909_s30 = sphi %s3000_s30, %s6286_s30   ;;  %s2905_s29 = sphi %s2998_s29, %s6285_s29   ;;  %s2901_s28 = sphi %s2996_s28, %s6284_s28   ;;  %s2897_s27 = sphi %s2994_s27, %s6272_s27   ;;  %s2893_s26 = sphi %s2992_s26, %s6271_s26   ;;  %s2889_s25 = sphi %s2990_s25, %s6283_s25   ;;  %s2885_s24 = sphi %s2988_s24, %s6282_s24   ;;  %s2881_s23 = sphi %s2986_s23, %s6269_s23   ;;  %s2877_s22 = sphi %s2984_s22, %s6268_s22   ;;  %s2873_s21 = sphi %s2982_s21, %s6267_s21   ;;  %s2869_s20 = sphi %s2980_s20, %s6281_s20   ;;  %s2865_s19 = sphi %s2978_s19, %s6280_s19   ;;  %s2861_s18 = sphi %s2976_s18, %s6279_s18   ;;  %s2857_s17 = sphi %s2974_s17, %s6278_s17   ;;  %s2853_s16 = sphi %s2972_s16, %s6277_s16   ;;  %s2849_s15 = sphi %s2970_s15, %s6276_s15  }
  0x17   : > { %5784 = sst [smem:[#allocation17_spill]] %s2881_s23  ;;  %p78_p1 = scmp.ne.s32.totalorder %s2881_s23, %s2877_s22 }
  0x18   : > { %5785 = sst [smem:[#allocation18_spill]] %s2893_s26  ;;  %p5659_p3 = scmp.lt.s32.totalorder %s2913_s5, 6 }
  0x19   : > { %5786 = sst [smem:[#allocation19_spill]] %s2897_s27  ;;  %p80_p4 = por %p78_p1, %p53_p0 }
  0x1a   : > { %5787 = sst [smem:[#allocation20_spill]] %s2901_s28  ;;  %s214_s7 = sand.u32 1, %s2913_s5  }
  0x1b   : > { %5788 = sst [smem:[#allocation21_spill]] %s2905_s29  ;;  %s216_s8 = sand.u32 1, %s2881_s23  }
  0x1c   : > { %5789 = sst [smem:[#allocation22_spill]] %s2909_s30  ;;  %s2291_s9 = smul.u32 96, %s216_s8 }
  0x1d   : > { %p3068_p5 = pnand %p5659_p3, %p80_p4  ;;  %s2292_s11 = smul.u32 1536, %s2909_s30 }
  0x1e   : > { %s5791_s1 = sld [smem:[#allocation76_spill]]  ;;  %s218_s6 = scalar_lea.vmem [#allocation5], %s2291_s9 }
  0x1f   : > { %s225_s4 = sshll.u32 %s218_s6, 4  ;;  %s3080_s8 = scalar_lea.sflag [#allocation6], %s214_s7  ;;  %s3078_s4 = int_to_ptr.vmem [resolvable:$true] %s225_s4 }
  0x20   : > { %p2601_p7 = pneg %p3068_p5 }
  0x24   : > { %s3076_s14 = scalar_lea.hbm %s5791_s1, %s2292_s11  ;;  %s2604_s13 = scalar_lea.hbm %s5791_s1, 4608 }
  0x25   : > { %s2599_s27 = scalar_lea.hbm %s3076_s14, 1536  ;;  %p2605_p10 = scmp.lt.u32.totalorder %s3076_s14, %s5791_s1 }
  0x26   : > { %p2600_p6 = scmp.ne.s32.totalorder %s3076_s14, %s2599_s27  ;;  %p2606_p11 = scmp.lt.u32.totalorder %s2604_s13, %s2599_s27 }
  0x27   : > { %p2608_p13 = scmp.lt.u32.totalorder %s2599_s27, %s3076_s14 }
  0x28   : > { %p2602_p8 = pnand %p2601_p7, %p2600_p6  ;;  %p2607_p12 = por %p2606_p11, %p2605_p10 }
  0x2a   : > { %p2603_p9 = pneg %p2602_p8  ;;  %p2609_p1 = por %p2608_p13, %p2607_p12 }
  0x2c   : > { %p2610_p4 = pnand %p2609_p1, %p2603_p9 }
  0x2e   : > { %2613 = shalt.err (!%p2610_p4)
}
  0x2f   : > { %s2614_s6 = scalar_lea.vmem %s3078_s4, 1536  ;;  %s2927_s7 = smov [#allocation5]  }
  0x30   : > { %p2615_p6 = scmp.ne.s32.totalorder %s3078_s4, %s2614_s6  ;;  %s2619_s9 = sshll.u32 %s2927_s7, 4  ;;  %s2620_s9 = int_to_ptr.vmem [resolvable:$false] %s2619_s9 }
  0x31   : > { %s2621_s3 = scalar_lea.vmem %s2620_s9, 3072  ;;  %p2622_p2 = scmp.lt.s32.totalorder %s3078_s4, %s2620_s9 }
  0x32   : > { %p2617_p8 = pnand %p2615_p6, %p2601_p7  ;;  %p2623_p10 = scmp.lt.s32.totalorder %s2621_s3, %s2614_s6 }
  0x34   : > { %p2618_p3 = pneg %p2617_p8  ;;  %p2624_p11 = por %p2623_p10, %p2622_p2 }
  0x36   : > { %p2625_p12 = pnand %p2624_p11, %p2618_p3 }
  0x38   : > { %2628 = shalt.err (!%p2625_p12)
}
  0x39   : > { %s5660_s27 = smov 128   ;;  %s5661_s28 = smov 8  }
  0x3a   : > { %2370 = dma.hbm_to_vmem [thread:$0]  (!%p3068_p5), %s3076_s14, 1536, %s3078_s4, %s3080_s8, %s5660_s27, %s5660_s27, %s5661_s28  }
  0x3b   : > { %p2263_p2 = scmp.ge.s32.totalorder %s2913_s5, 1  ;;  %p276_p3 = scmp.lt.s32.totalorder %s2913_s5, 7 }
  0x3c   : > { %s3118_s12 = sadd.s32 4294967295, %s2913_s5   ;;  %s35_s6 = sadd.s32 1, %s2905_s29 }
  0x3d   : > { %p3113_p7 = pnand %p2263_p2, %p276_p3  ;;  %p36_p9 = scmp.ge.s32.totalorder %s35_s6, 2 }
  0x3e   : > { %s38_s10 = sadd.s32 1, %s2909_s30  ;;  %s45_s4 = sadd.s32 1, %s2893_s26 }
  0x3f   : > { %s5792_s11 = scalar_select %p3113_p7, 1, 0 }
  0x40   : > { %p52_p5 = scmp.ne.s32.totalorder %s2893_s26, %s2889_s25  ;;  %s6288_s6 = smov (%p36_p9, %s35_s6), 0 }
  0x41   : > { %5793 = sst [smem:[#allocation23_spill]] %s6288_s6  ;;  %s6290_s10 = smov (!%p36_p9, %s38_s10), %s2909_s30 }
  0x42   : > { %s42_s14 = ssub.s32 %s2905_s29, %s6288_s6  ;;  %p3133_p13 = por %p53_p0, %p52_p5 }
  0x43   : > { %p40_p1 = scmp.ge.s32.totalorder %s6290_s10, 3  ;;  %p43_p4 = scmp.eq.s32.totalorder %s42_s14, 0 }
  0x44   : > { %p58_p6 = scmp.ne.s32.totalorder %s2889_s25, %s2885_s24  ;;  %p59_p8 = scmp.eq.s32.totalorder %s3118_s12, 0 }
  0x45   : > { %s6292_s10 = smov (%p40_p1, %s6290_s10), 0  ;;  %p5799_p12 = scmp.ne.s32.totalorder %s2877_s22, %s2873_s21 }
  0x46   : > { %5795 = sst [smem:[#allocation24_spill]] %s6292_s10  ;;  %p3147_p10 = por %p59_p8, %p58_p6 }
  0x47   : > { %s3143_s9 = scalar_select %p43_p4, %s2893_s26, %s45_s4  }
  0x48   : > { %s5797_s3 = scalar_select %p3147_p10, 1, 0 }
  0x49   : > { %5796 = sst [smem:[#allocation25_spill]] %s3143_s9  ;;  %s68_s27 = ssub.s32 %s2909_s30, %s6292_s10 }
  0x4a   : > { %5798 = sst [smem:[#allocation26_spill]] %s5797_s3  ;;  %p69_p11 = scmp.eq.s32.totalorder %s68_s27, 0 }
  0x4b   : > { %p3158_p2 = por %p5799_p12, %p59_p8  ;;  %s2247_s4 = sshll.u32 %s2909_s30, 1 }
  0x4c   : > { %s2248_s28 = sshll.u32 %s6292_s10, 1  ;;  %s5801_s13 = sadd.s32 1, %s2881_s23 }
  0x4d   : > { %s5800_s24 = scalar_select %p3158_p2, 1, 0 }
  0x4e   : > { %s3167_s1 = scalar_select %p69_p11, %s2881_s23, %s5801_s13  }
  0x4f   : > { %s3170_s9 = sadd.s32 %s2905_s29, %s2247_s4  ;;  %s97_s21 = sadd.s32 %s2248_s28, %s6288_s6 }
  0x50   : > { %5802 = sst [smem:[#allocation27_spill]] %s3167_s1  ;;  %s98_s22 = ssub.s32 %s3170_s9, %s97_s21 }
  0x51   : > { %s101_s3 = sadd.s32 1, %s2869_s20  ;;  %p99_p3 = scmp.eq.s32.totalorder %s98_s22, 0 }
  0x52   : > { %p108_p9 = scmp.ne.s32.totalorder %s2869_s20, %s2865_s19  ;;  %p114_p5 = scmp.ne.s32.totalorder %s2865_s19, %s2861_s18 }
  0x53   : > { %s156_s30 = sor.u32 %s68_s27, %s42_s14  ;;  %s159_s4 = sadd.s32 1, %s2857_s17 }
  0x54   : > { %s3180_s10 = scalar_select %p99_p3, %s2869_s20, %s101_s3  }
  0x55   : > { %p3184_p1 = por %p114_p5, %p59_p8  ;;  %p157_p4 = scmp.eq.s32.totalorder %s156_s30, 0 }
  0x56   : > { %5803 = sst [smem:[#allocation28_spill]] %s3180_s10  ;;  %p169_p6 = scmp.ne.s32.totalorder %s2857_s17, %s2853_s16 }
  0x57   : > { %s5804_s13 = scalar_select %p3184_p1, 1, 0 }
  0x58   : > { %s3192_s22 = scalar_select %p157_p4, %s2857_s17, %s159_s4  }
  0x59   : > { %p170_p11 = scmp.eq.s32.totalorder %s3118_s12, 5  ;;  %p175_p12 = scmp.ne.s32.totalorder %s2853_s16, %s2849_s15 }
  0x5a   : > { %5805 = sst [smem:[#allocation29_spill]] %s3192_s22  ;;  %s5806_s18 = sadd.s32 4294967294, %s2913_s5  }
  0x5b   : > { %p176_p3 = scmp.eq.s32.totalorder %s5806_s18, 5  ;;  %s196_s27 = sand.u32 1, %s2893_s26  }
  0x5c   : > { %p3200_p8 = por %p170_p11, %p169_p6  ;;  %s2253_s14 = sshll.u32 %s196_s27, 2 }
  0x5d   : > { %p3204_p5 = por %p176_p3, %p175_p12  ;;  %s2254_s3 = sshll.u32 %s2905_s29, 6 }
  0x5e   : > { %s5807_s28 = scalar_select %p3200_p8, 1, 0 }
  0x5f   : > { %s5808_s30 = scalar_select %p3204_p5, 1, 0 }
  0x60   : > { %s5809_s0 = sld [smem:[#allocation75_spill]]  ;;  %s200_s18 = scalar_lea.vmem [#allocation2], %s2253_s14 }
  0x61   : > { %s207_s26 = sshll.u32 %s200_s18, 4  ;;  %p5810_p4 = scmp.lt.s32.totalorder %s2913_s5, 6  ;;  %s3214_s26 = int_to_ptr.vmem [resolvable:$true] %s207_s26 }
  0x62   : > { %p3229_p11 = por %p108_p9, %p53_p0  ;;  %s197_s21 = scalar_lea.sflag [#allocation3], %s196_s27 }
  0x63   : > { %p3220_p6 = pnand %p5810_p4, %p3133_p13 }
  0x65   : > { %p2631_p13 = pneg %p3220_p6 }
  0x66   : > { %s3212_s4 = scalar_lea.hbm %s5809_s0, %s2254_s3  ;;  %s3234_s3 = sand.u32 1, %s2869_s20  }
  0x67   : > { %s2256_s14 = sshll.u32 %s3234_s3, 5  ;;  %s2629_s18 = scalar_lea.hbm %s3212_s4, 64 }
  0x68   : > { %p2630_p12 = scmp.ne.s32.totalorder %s3212_s4, %s2629_s18  ;;  %s2634_s23 = scalar_lea.hbm %s5809_s0, 128 }
  0x69   : > { %p2635_p0 = scmp.lt.u32.totalorder %s3212_s4, %s5809_s0  ;;  %p2636_p9 = scmp.lt.u32.totalorder %s2634_s23, %s2629_s18 }
  0x6a   : > { %p2632_p3 = pnand %p2631_p13, %p2630_p12  ;;  %p2638_p8 = scmp.lt.u32.totalorder %s2629_s18, %s3212_s4 }
  0x6b   : > { %p2637_p5 = por %p2636_p9, %p2635_p0 }
  0x6c   : > { %p2633_p4 = pneg %p2632_p3 }
  0x6d   : > { %p2639_p1 = por %p2638_p8, %p2637_p5 }
  0x6f   : > { %p2640_p2 = pnand %p2639_p1, %p2633_p4 }
  0x71   : > { %2643 = shalt.err (!%p2640_p2)
}
  0x72   : > { %s2644_s27 = scalar_lea.vmem %s3214_s26, 64  ;;  %s2930_s29 = smov [#allocation2]  }
  0x73   : > { %p2645_p12 = scmp.ne.s32.totalorder %s3214_s26, %s2644_s27  ;;  %s2649_s7 = sshll.u32 %s2930_s29, 4  ;;  %s2650_s7 = int_to_ptr.vmem [resolvable:$false] %s2649_s7 }
  0x74   : > { %s2651_s10 = scalar_lea.vmem %s2650_s7, 128  ;;  %p2652_p7 = scmp.lt.s32.totalorder %s3214_s26, %s2650_s7 }
  0x75   : > { %p2647_p3 = pnand %p2645_p12, %p2631_p13  ;;  %p2653_p0 = scmp.lt.s32.totalorder %s2651_s10, %s2644_s27 }
  0x77   : > { %p2648_p10 = pneg %p2647_p3  ;;  %p2654_p9 = por %p2653_p0, %p2652_p7 }
  0x79   : > { %p2655_p8 = pnand %p2654_p9, %p2648_p10 }
  0x7b   : > { %2658 = shalt.err (!%p2655_p8)
}
  0x7c   : > { %2367 = dma.hbm_to_vmem [thread:$0]  (!%p3220_p6), %s3212_s4, 64, %s3214_s26, %s197_s21  }
  0x7d   : > { %s2290_s23 = sshll.u32 %s3170_s9, 9  ;;  %s5813_s2 = sld [smem:[#allocation77_spill]] }
  0x7e   : > { %s239_s1 = scalar_lea.vmem [#allocation7], %s2256_s14  ;;  %p5814_p7 = scmp.lt.s32.totalorder %s2913_s5, 6 }
  0x7f   : > { %s248_s27 = sshll.u32 %s239_s1, 4  ;;  %s2260_s26 = sshll.u32 %s3234_s3, 3  ;;  %s3270_s27 = int_to_ptr.vmem [resolvable:$true] %s248_s27 }
  0x80   : > { %p3276_p10 = pnand %p5814_p7, %p3229_p11 }
  0x82   : > { %p2661_p1 = pneg %p3276_p10 }
  0x83   : > { %s3266_s29 = scalar_lea.hbm %s5813_s2, %s2290_s23  ;;  %s2664_s6 = scalar_lea.hbm %s5813_s2, 3072 }
  0x84   : > { %s2659_s4 = scalar_lea.hbm %s3266_s29, 512  ;;  %p2665_p11 = scmp.lt.u32.totalorder %s3266_s29, %s5813_s2 }
  0x85   : > { %p2660_p2 = scmp.ne.s32.totalorder %s3266_s29, %s2659_s4  ;;  %p2666_p13 = scmp.lt.u32.totalorder %s2664_s6, %s2659_s4 }
  0x86   : > { %p2668_p12 = scmp.lt.u32.totalorder %s2659_s4, %s3266_s29 }
  0x87   : > { %p2662_p5 = pnand %p2661_p1, %p2660_p2  ;;  %p2667_p4 = por %p2666_p13, %p2665_p11 }
  0x89   : > { %p2663_p6 = pneg %p2662_p5  ;;  %p2669_p3 = por %p2668_p12, %p2667_p4 }
  0x8b   : > { %p2670_p0 = pnand %p2669_p3, %p2663_p6 }
  0x8d   : > { %2673 = shalt.err (!%p2670_p0)
}
  0x8e   : > { %s2674_s22 = scalar_lea.vmem %s3270_s27, 512  ;;  %s2931_s18 = smov [#allocation7]  }
  0x8f   : > { %p2675_p9 = scmp.ne.s32.totalorder %s3270_s27, %s2674_s22  ;;  %s2679_s1 = sshll.u32 %s2931_s18, 4  ;;  %s2680_s1 = int_to_ptr.vmem [resolvable:$false] %s2679_s1 }
  0x90   : > { %s2681_s14 = scalar_lea.vmem %s2680_s1, 1024  ;;  %p2682_p2 = scmp.lt.s32.totalorder %s3270_s27, %s2680_s1 }
  0x91   : > { %p2677_p8 = pnand %p2675_p9, %p2661_p1  ;;  %p2683_p5 = scmp.lt.s32.totalorder %s2681_s14, %s2674_s22 }
  0x93   : > { %p2678_p7 = pneg %p2677_p8  ;;  %p2684_p11 = por %p2683_p5, %p2682_p2 }
  0x95   : > { %p2685_p13 = pnand %p2684_p11, %p2678_p7 }
  0x97   : > { %2688 = shalt.err (!%p2685_p13)
}
  0x98   : > { %s5816_s4 = smov 8   ;;  %s5817_s21 = smov 128  }
  0x99   : > { %2373 = dma.hbm_to_vmem [thread:$0]  (!%p3276_p10), %s3266_s29, 512, %s3270_s27, %s3080_s8, %s5817_s21, %s5817_s21, %s5816_s4  }
  0x9a   : > { %s2262_s6 = sshll.u32 %s3170_s9, 7  ;;  %s262_s10 = scalar_lea.vmem [#allocation8], %s2260_s26 }
  0x9b   : > { %s271_s23 = sshll.u32 %s262_s10, 4  ;;  %s5818_s1 = sld [smem:[#allocation78_spill]]  ;;  %s272_s23 = int_to_ptr.vmem [resolvable:$true] %s271_s23 }
  0x9c   : > { %s259_s0 = scalar_lea.sflag [#allocation9], %s3234_s3 }
  0xa1   : > { %s3316_s14 = scalar_lea.hbm %s5818_s1, %s2262_s6  ;;  %s2694_s29 = scalar_lea.hbm %s5818_s1, 768 }
  0xa2   : > { %s2689_s2 = scalar_lea.hbm %s3316_s14, 128  ;;  %p2695_p3 = scmp.lt.u32.totalorder %s3316_s14, %s5818_s1 }
  0xa3   : > { %p2690_p6 = scmp.ne.s32.totalorder %s3316_s14, %s2689_s2  ;;  %p2696_p0 = scmp.lt.u32.totalorder %s2694_s29, %s2689_s2 }
  0xa4   : > { %p2698_p8 = scmp.lt.u32.totalorder %s2689_s2, %s3316_s14 }
  0xa5   : > { %p2692_p4 = pnand %p2690_p6, %p2661_p1  ;;  %p2697_p9 = por %p2696_p0, %p2695_p3 }
  0xa7   : > { %p2693_p12 = pneg %p2692_p4  ;;  %p2699_p7 = por %p2698_p8, %p2697_p9 }
  0xa9   : > { %p2700_p2 = pnand %p2699_p7, %p2693_p12 }
  0xab   : > { %2703 = shalt.err (!%p2700_p2)
}
  0xac   : > { %s2704_s3 = scalar_lea.vmem %s272_s23, 128  ;;  %s2932_s4 = smov [#allocation8]  }
  0xad   : > { %p2705_p5 = scmp.ne.s32.totalorder %s272_s23, %s2704_s3  ;;  %s2709_s21 = sshll.u32 %s2932_s4, 4  ;;  %s2710_s21 = int_to_ptr.vmem [resolvable:$false] %s2709_s21 }
  0xae   : > { %s2711_s6 = scalar_lea.vmem %s2710_s21, 256  ;;  %p2712_p6 = scmp.lt.s32.totalorder %s272_s23, %s2710_s21 }
  0xaf   : > { %p2707_p11 = pnand %p2705_p5, %p2661_p1  ;;  %p2713_p4 = scmp.lt.s32.totalorder %s2711_s6, %s2704_s3 }
  0xb1   : > { %p2708_p13 = pneg %p2707_p11  ;;  %p2714_p0 = por %p2713_p4, %p2712_p6 }
  0xb3   : > { %p2715_p3 = pnand %p2714_p0, %p2708_p13 }
  0xb5   : > { %2718 = shalt.err (!%p2715_p3)
}
  0xb6   : > { %2376 = dma.hbm_to_vmem [thread:$0]  (!%p3276_p10), %s3316_s14, 128, %s272_s23, %s259_s0  }
  0xb7   : > { %p5819_p12 = scmp.ne.s32.totalorder %s5792_s11, 0 }
  0xb9   : > { %280 = sbr.rel (%p5819_p12) target bundleno = 1845 (0x735), region = 36 }
  0xc0   : > { %s5820_s2 = sld [smem:[#allocation26_spill]]  ;;  %s282_s10 = sand.u32 1, %s2889_s25  }
  0xc1   : > { %s2264_s22 = sshll.u32 %s282_s10, 2  ;;  %s283_s18 = scalar_lea.sflag [#allocation3], %s282_s10 }
  0xc2   : > { %s286_s8 = scalar_lea.vmem [#allocation2], %s2264_s22 }
  0xc6   : > { %p5821_p1 = scmp.ne.s32.totalorder %s5820_s2, 0 }
  0xc8   : > { %2828 = dma.done.wait (%p5821_p1), %s283_s18, 64  }
  0xc9   : > { %2830 = vsyncadd (%p5821_p1), %s283_s18, 4294967232  ;;  %s5822_s9 = sld [smem:[#allocation16_spill]]  ;;  %s291_s7 = sand.u32 1, %s3118_s12  }
  0xca   : > { %s292_s23 = scalar_lea.sflag [#allocation6], %s291_s7  ;;  %p5823_p10 = scmp.ne.s32.totalorder %s5800_s24, 0 }
  0xcf   : > { %s293_s29 = sand.u32 1, %s5822_s9  }
  0xd0   : > { %s2293_s0 = smul.u32 96, %s293_s29 }
  0xd2   : > { %s3347_s11 = scalar_lea.vmem [#allocation5], %s2293_s0 }
  0xd3   : > { %2832 = dma.done.wait (%p5823_p10), %s292_s23, 1536  }
  0xd4   : > { %2834 = vsyncadd (%p5823_p10), %s292_s23, 4294965760  ;;  %s302_s14 = sand.u32 1, %s2865_s19   ;;  %p5824_p9 = scmp.ne.s32.totalorder %s5804_s13, 0 }
  0xd5   : > { %s2265_s27 = sshll.u32 %s302_s14, 5 }
  0xd6   : > { %s3354_s26 = scalar_lea.vmem [#allocation7], %s2265_s27 }
  0xd7   : > { %2836 = dma.done.wait (%p5824_p9), %s292_s23, 512  }
  0xd8   : > { %2838 = vsyncadd (%p5824_p9), %s292_s23, 4294966784  ;;  %s2266_s12 = sshll.u32 %s302_s14, 3  ;;  %s310_s3 = scalar_lea.sflag [#allocation9], %s302_s14 }
  0xd9   : > { %s3360_s4 = scalar_lea.vmem [#allocation8], %s2266_s12 }
  0xda   : > { %2840 = dma.done.wait (%p5824_p9), %s310_s3, 128  }
  0xdb   : > { %2842 = vsyncadd (%p5824_p9), %s310_s3, 4294967168  ;;  %v3366_v0 = vld [vmem:[%s286_s8] sm:$0x7]  ;;  %s2933_s24 = smov 2   ;;  %s2934_s21 = smov 126   ;;  %v5680_v7 = vmov 0  }
  0xdc   : > { %387 = vrot.lane.b32.xlu0 %v3366_v0, %s2933_s24  ;;  %s2935_s6 = smov 127   ;;  %s2936_s2 = smov 124   ;;  %v3377_v1 = vrot.slane %v3366_v0, 1  ;;  %v3382_v2 = vrot.slane %v3366_v0, 2  ;;  %v2940_v12 = vmov 4   ;;  %vm401_vm1 = vcmp.gt.f32.partialorder %v3366_v0, 0.0 }
  0xdd   : > { %s5675_s13 = smov 125   ;;  %s2939_s22 = smov 1   ;;  %2556 = vset.pattern.permute.xlu0 %v2940_v12  ;;  %v3435_v40 = vld [vmem:[%s3347_s11 + $0x28] sm:$0xff]  ;;  %v3438_v42 = vld [vmem:[%s3347_s11 + $0x18] sm:$0xff]  ;;  %v2270_v44 = vld [vmem:[%s3347_s11 + $0x20] sm:$0xff]  ;;  %vm5707_vm7 = vcmask 1041409  }
  0xde   : > { %v2268_v46 = vld [vmem:[%s3347_s11 + $0x10] sm:$0xff]  ;;  %vm5689_vm8 = vcmask 1042434   ;;  %vm5685_vm9 = vcmask 1043459   ;;  %vm5686_vm10 = vcmask 1044484   ;;  %vm5688_vm11 = vcmask 1045509  }
  0xdf   : > { %v3445_v55 = vld [vmem:[%s3347_s11 + $0x30] sm:$0xff]  ;;  %vm5687_vm12 = vcmask 1046534   ;;  %vm5679_vm13 = vcmask 1047559   ;;  %vm5678_vm14 = vcmask 1040384   ;;  %vm5677_vm15 = vcmask 1047553  }
  0xe0   : > { %391 = vrot.lane.b32.xlu0 %v3366_v0, %s2934_s21 }
  0xe4   : > { %428 = vrot.lane.b32.xlu0 %v3366_v0, %s2935_s6 }
  0xe8   : > { %707 = vrot.lane.b32.xlu0 %v3366_v0, %s2936_s2 }
  0xec   : > { %733 = vrot.lane.b32.xlu0 %v3377_v1, %s5675_s13 }
  0xf0   : > { %1170 = vrot.lane.b32.xlu0 %v3382_v2, %s2934_s21 }
 0x14e   : > { %v388_v3 = vpop.permute.xlu0 %387 }
 0x14f   : > { %v3388_v4 = vsub.f32 %v3366_v0, %v388_v3 }
 0x151   : > { %397 = vrot.lane.b32.xlu1 %v3388_v4, %s2935_s6  ;;  %681 = vrot.lane.b32.xlu0 %v3388_v4, %s2934_s21  ;;  %vm402_vm0 = vcmp.gt.f32.partialorder %v3388_v4, 0.0  ;;  %v1057_v9 = vrot.slane %v3388_v4, 1 }
 0x152   : > { %v392_v5 = vpop.permute.xlu0 %391  ;;  %v403_v8 = vsel %vm402_vm0, 1, %v5680_v7  ;;  %vm5684_vm0 = vcmask 1041408  }
 0x153   : > { %v394_v6 = vadd.f32 %v392_v5, %v3366_v0  ;;  %2294 = vpush %v392_v5 }
 0x154   : > { %2296 = vpush %v3366_v0 }
 0x155   : > { %422 = vrot.lane.b32.xlu1 %v3366_v0, %s5675_s13  ;;  %408 = vrot.lane.b32.xlu0 %v403_v8, %s2939_s22  ;;  %v3401_v10 = vmul.f32 0.5, %v394_v6 }
 0x156   : > { %v429_v13 = vpop.permute.xlu0 %428 }
 0x157   : > { %v984_v11 = vrot.slane %v3401_v10, 1  ;;  %v5682_v39 = vrot.slane %v3401_v10, 2 }
 0x159   : > { %1095 = vrot.lane.b32.xlu0 %v1057_v9, %s5675_s13  ;;  %721 = vrot.lane.b32.xlu1 %v3377_v1, %s2934_s21 }
 0x15a   : > { %v708_v14 = vpop.permute.xlu0 %707 }
 0x15d   : > { %739 = vrot.lane.b32.xlu1 %v3377_v1, %s2935_s6  ;;  %1020 = vrot.lane.b32.xlu0 %v984_v11, %s2935_s6 }
 0x15e   : > { %v734_v19 = vpop.permute.xlu0 %733 }
 0x161   : > { %1132 = vrot.lane.b32.xlu1 %v3377_v1, %s2936_s2 }
 0x162   : > { %v1171_v21 = vpop.permute.xlu0 %1170 }
 0x165   : > { %694 = vrot.lane.b32.xlu1 %v3388_v4, %s5675_s13 }
 0x169   : > { %404 = vrot.lane.b32.xlu1 %v403_v8, %s2933_s24 }
 0x16d   : > { %668 = vrot.lane.b32.xlu1 %v3401_v10, %s2935_s6 }
 0x171   : > { %1058 = vrot.lane.b32.xlu1 %v1057_v9, %s2934_s21 }
 0x184   : > { %s2295_s18 = spop %2294 }
 0x185   : > { %s2297_s8 = spop %2296  ;;  %v413_v45 = vstv %s2295_s18 }
 0x186   : > { %v417_v47 = vstv %s2297_s8  ;;  %v415_v50 = vmin.f32 %v413_v45, %v2270_v44 }
 0x187   : > { %v419_v51 = vmax.f32 %v417_v47, %v2268_v46 }
 0x189   : > { %v420_v53 = vsub.f32 %v415_v50, %v419_v51 }
 0x18b   : > { %v421_v56 = vmax.f32 %v420_v53, 0.0 }
 0x1c3   : > { %v398_v15 = vpop.permute.xlu1 %397  ;;  %v682_v25 = vpop.permute.xlu0 %681 }
 0x1c4   : > { %v400_v16 = vmul.f32 %v398_v15, %v3388_v4 }
 0x1c6   : > { %438 = vrot.lane.b32.xlu0 %v400_v16, %s2934_s21  ;;  %v748_v17 = vrot.slane %v400_v16, 1  ;;  %v1197_v22 = vrot.slane %v400_v16, 2 }
 0x1c7   : > { %v423_v18 = vpop.permute.xlu1 %422  ;;  %v409_v27 = vpop.permute.xlu0 %408 }
 0x1c8   : > { %2298 = vpush %v423_v18  ;;  %749 = vrot.lane.b32.xlu1 %v748_v17, %s2934_s21  ;;  %vm410_vm3 = vcmp.ne.s32.totalorder %v409_v27, 0 }
 0x1c9   : > { %2300 = vpush %v429_v13 }
 0x1ca   : > { %1188 = vrot.lane.b32.xlu0 %v3382_v2, %s2935_s6 }
 0x1cb   : > { %v722_v20 = vpop.permute.xlu1 %721  ;;  %v1096_v30 = vpop.permute.xlu0 %1095 }
 0x1cc   : > { %1182 = vrot.lane.b32.xlu1 %v3382_v2, %s5675_s13 }
 0x1cf   : > { %v740_v23 = vpop.permute.xlu1 %739  ;;  %v1021_v31 = vpop.permute.xlu0 %1020 }
 0x1d0   : > { %1198 = vrot.lane.b32.xlu1 %v1197_v22, %s2934_s21 }
 0x1d3   : > { %v1133_v24 = vpop.permute.xlu1 %1132 }
 0x1d7   : > { %v695_v26 = vpop.permute.xlu1 %694 }
 0x1db   : > { %v405_v28 = vpop.permute.xlu1 %404 }
 0x1dc   : > { %vm406_vm2 = vcmp.ne.s32.totalorder %v405_v28, 0 }
 0x1dd   : > { %vm407_vm4 = vmand %vm401_vm1, %vm406_vm2  ;;  %vm5683_vm1 = vcmask 1047554  }
 0x1de   : > { %vm411_vm5 = vmand %vm407_vm4, %vm410_vm3 }
 0x1df   : > { %v447_v29 = vsel %vm411_vm5, 1, %v5680_v7  ;;  %v669_v32 = vpop.permute.xlu1 %668 }
 0x1e0   : > { %449 = vperm.xlu0 %2556, %v447_v29  }
 0x1e3   : > { %v1059_v34 = vpop.permute.xlu1 %1058 }
 0x1f9   : > { %s2299_s9 = spop %2298 }
 0x1fa   : > { %s2301_s7 = spop %2300  ;;  %v425_v41 = vstv %s2299_s9 }
 0x1fb   : > { %v431_v43 = vstv %s2301_s7  ;;  %v427_v48 = vmin.f32 %v425_v41, %v3435_v40 }
 0x1fc   : > { %v433_v49 = vmax.f32 %v431_v43, %v3438_v42 }
 0x1fe   : > { %v434_v52 = vsub.f32 %v427_v48, %v433_v49 }
 0x200   : > { %v435_v54 = vmax.f32 %v434_v52, 0.0 }
 0x202   : > { %v436_v58 = vmul.f32 %v435_v54, %v421_v56 }
 0x238   : > { %v439_v33 = vpop.permute.xlu0 %438 }
 0x239   : > { %2302 = vpush %v439_v33 }
 0x23a   : > { %2304 = vpush %v3401_v10  ;;  %v750_v35 = vpop.permute.xlu1 %749 }
 0x23b   : > { %2306 = vpush %v669_v32 }
 0x23c   : > { %2308 = vpush %v682_v25  ;;  %v1189_v37 = vpop.permute.xlu0 %1188 }
 0x23d   : > { %2310 = vpush %v695_v26 }
 0x23e   : > { %2312 = vpush %v708_v14  ;;  %v1183_v36 = vpop.permute.xlu1 %1182 }
 0x23f   : > { %2314 = vpush %v722_v20 }
 0x240   : > { %2316 = vpush %v3377_v1 }
 0x241   : > { %2318 = vpush %v734_v19 }
 0x242   : > { %2320 = vpush %v740_v23  ;;  %v1199_v38 = vpop.permute.xlu1 %1198 }
 0x243   : > { %2322 = vpush %v750_v35 }
 0x244   : > { %2324 = vpush %v984_v11 }
 0x245   : > { %2326 = vpush %v1021_v31 }
 0x246   : > { %2328 = vpush %v1059_v34 }
 0x247   : > { %2330 = vpush %v1096_v30 }
 0x248   : > { %2332 = vpush %v1133_v24 }
 0x249   : > { %2334 = vpush %v1171_v21 }
 0x24a   : > { %2336 = vpush %v3382_v2 }
 0x24b   : > { %2338 = vpush %v1183_v36 }
 0x24c   : > { %2340 = vpush %v1189_v37 }
 0x24d   : > { %2342 = vpush %v1199_v38 }
 0x24e   : > { %2344 = vpush %v5682_v39 }
 0x25f   : > { %v3472_v27 = vpop.permute.xlu0 %449 }
 0x260   : > { %vm5676_vm6 = vcmp.eq.s32.totalorder %v3472_v27, 1 }
 0x26a   : > { %s2303_s29 = spop %2302 }
 0x26b   : > { %v441_v57 = vstv %s2303_s29  ;;  %s3447_s0 = spop %2304 }
 0x26c   : > { %v443_v59 = vadd.f32 %v3445_v55, %v441_v57  ;;  %s3450_s23 = spop %2306 }
 0x26d   : > { %s3452_s14 = spop %2308 }
 0x26e   : > { %v444_v60 = vsub.f32 %v443_v59, %v436_v58  ;;  %s3454_s27 = spop %2310 }
 0x26f   : > { %s3456_s12 = spop %2312 }
 0x270   : > { %2557 = vrcp.f32 %v444_v60  ;;  %s2315_s3 = spop %2314 }
 0x271   : > { %v724_v61 = vstv %s2315_s3  ;;  %s2317_s24 = spop %2316 }
 0x272   : > { %v726_v62 = vmin.f32 %v724_v61, %v2270_v44  ;;  %v728_v63 = vstv %s2317_s24  ;;  %s2319_s22 = spop %2318 }
 0x273   : > { %v730_v0 = vmax.f32 %v728_v63, %v2268_v46  ;;  %v736_v1 = vstv %s2319_s22  ;;  %s2321_s18 = spop %2320 }
 0x274   : > { %v738_v3 = vmin.f32 %v736_v1, %v3435_v40  ;;  %v742_v5 = vstv %s2321_s18  ;;  %s2323_s8 = spop %2322 }
 0x275   : > { %v731_v6 = vsub.f32 %v726_v62, %v730_v0  ;;  %v744_v8 = vmax.f32 %v742_v5, %v3438_v42  ;;  %s3460_s9 = spop %2324  ;;  %v752_v12 = vstv %s2323_s8 }
 0x276   : > { %s3462_s7 = spop %2326  ;;  %v754_v17 = vadd.f32 %v3445_v55, %v752_v12 }
 0x277   : > { %v732_v9 = vmax.f32 %v731_v6, 0.0  ;;  %v745_v11 = vsub.f32 %v738_v3, %v744_v8  ;;  %s3464_s29 = spop %2328 }
 0x278   : > { %s3466_s3 = spop %2330 }
 0x279   : > { %v746_v13 = vmax.f32 %v745_v11, 0.0  ;;  %s3468_s24 = spop %2332 }
 0x27a   : > { %v2558_v14 = vpop.eup %2557  ;;  %s2335_s22 = spop %2334 }
 0x27b   : > { %v446_v15 = vmul.f32 %v2558_v14, %v436_v58  ;;  %v747_v16 = vmul.f32 %v746_v13, %v732_v9  ;;  %v1173_v18 = vstv %s2335_s22  ;;  %s2337_s18 = spop %2336 }
 0x27c   : > { %v1175_v19 = vmin.f32 %v1173_v18, %v2270_v44  ;;  %v1177_v20 = vstv %s2337_s18  ;;  %s2339_s10 = spop %2338 }
 0x27d   : > { %v755_v21 = vsub.f32 %v754_v17, %v747_v16  ;;  %v1179_v22 = vmax.f32 %v1177_v20, %v2268_v46  ;;  %v1185_v23 = vstv %s2339_s10  ;;  %s2341_s8 = spop %2340  ;;  %v453_v26 = vrot.slane %v446_v15, 1 }
 0x27e   : > { %v1187_v24 = vmin.f32 %v1185_v23, %v3435_v40  ;;  %v1191_v25 = vstv %s2341_s8  ;;  %s2343_s13 = spop %2342  ;;  %v454_v30 = vrot.slane %v446_v15, 2  ;;  %v455_v32 = vrot.slane %v446_v15, 3 }
 0x27f   : > { %2559 = vrcp.f32 %v755_v21  ;;  %v1180_v28 = vsub.f32 %v1175_v19, %v1179_v22  ;;  %v1193_v29 = vmax.f32 %v1191_v25, %v3438_v42  ;;  %v1201_v33 = vstv %s2343_s13 }
 0x280   : > { %v456_v34 = vrot.slane %v446_v15, 4  ;;  %v457_v35 = vrot.slane %v446_v15, 5  ;;  %v3478_v38 = vsel %vm5676_vm6, %v453_v26, 0.0  ;;  %v3482_v40 = vsel %vm5676_vm6, %v454_v30, 0.0 }
 0x281   : > { %v1194_v31 = vsub.f32 %v1187_v24, %v1193_v29  ;;  %v1181_v36 = vmax.f32 %v1180_v28, 0.0  ;;  %v458_v41 = vrot.slane %v446_v15, 6  ;;  %v1203_v43 = vadd.f32 %v3445_v55, %v1201_v33 }
 0x282   : > { %v459_v44 = vrot.slane %v446_v15, 7  ;;  %v3487_v45 = vsel %vm5676_vm6, %v455_v32, 0.0  ;;  %v3491_v46 = vsel %vm5676_vm6, %v456_v34, 0.0  ;;  %v492_v47 = vrot.slane %v3478_v38, 7 }
 0x283   : > { %v1195_v37 = vmax.f32 %v1194_v31, 0.0  ;;  %v495_v48 = vrot.slane %v3482_v40, 6  ;;  %v3497_v50 = vsel %vm5676_vm6, %v446_v15, 0.0  ;;  %v3501_v51 = vsel %vm5676_vm6, %v457_v35, 0.0 }
 0x284   : > { %v3505_v52 = vsel %vm5676_vm6, %v458_v41, 0.0  ;;  %v494_v53 = vsel %vm5707_vm7, %v492_v47, %v3497_v50  ;;  %v498_v54 = vrot.slane %v3487_v45, 5  ;;  %v3512_v56 = vsel %vm5676_vm6, %v459_v44, 0.0 }
 0x285   : > { %v1196_v42 = vmul.f32 %v1195_v37, %v1181_v36  ;;  %v497_v57 = vsel %vm5689_vm8, %v495_v48, %v494_v53  ;;  %v501_v58 = vrot.slane %v3491_v46, 4  ;;  %v504_v61 = vrot.slane %v3501_v51, 3 }
 0x286   : > { %v500_v60 = vsel %vm5685_vm9, %v498_v54, %v497_v57  ;;  %v507_v63 = vrot.slane %v3505_v52, 2  ;;  %v510_v1 = vrot.slane %v3512_v56, 1 }
 0x287   : > { %v1204_v49 = vsub.f32 %v1203_v43, %v1196_v42  ;;  %v503_v62 = vsel %vm5686_vm10, %v501_v58, %v500_v60 }
 0x288   : > { %v506_v0 = vsel %vm5688_vm11, %v504_v61, %v503_v62 }
 0x289   : > { %v2560_v55 = vpop.eup %2559  ;;  %2561 = vrcp.f32 %v1204_v49  ;;  %v509_v5 = vsel %vm5687_vm12, %v507_v63, %v506_v0 }
 0x28a   : > { %v757_v59 = vmul.f32 %v2560_v55, %v747_v16  ;;  %v512_v11 = vsel %vm5679_vm13, %v510_v1, %v509_v5 }
 0x28b   : > { %514 = vmax.xlane.f32.xlu1 %v512_v11 }
 0x28c   : > { %v765_v3 = vrot.slane %v757_v59, 6  ;;  %v759_v6 = vrot.slane %v757_v59, 7  ;;  %v760_v8 = vrot.slane %v757_v59, 1  ;;  %v761_v9 = vrot.slane %v757_v59, 2 }
 0x28d   : > { %v762_v13 = vrot.slane %v757_v59, 3  ;;  %v763_v14 = vrot.slane %v757_v59, 4  ;;  %v764_v16 = vrot.slane %v757_v59, 5  ;;  %v3531_v17 = vsel %vm5676_vm6, %v757_v59, 0.0 }
 0x28e   : > { %v3526_v12 = vsel %vm5676_vm6, %v765_v3, 0.0  ;;  %v3535_v18 = vsel %vm5676_vm6, %v759_v6, 0.0  ;;  %v3539_v19 = vsel %vm5676_vm6, %v760_v8, 0.0  ;;  %v3543_v20 = vsel %vm5676_vm6, %v761_v9, 0.0 }
 0x28f   : > { %v826_v15 = vrot.slane %v3526_v12, 1  ;;  %v3547_v21 = vsel %vm5676_vm6, %v762_v13, 0.0  ;;  %v814_v22 = vrot.slane %v3531_v17, 7  ;;  %v816_v23 = vrot.slane %v3539_v19, 6 }
 0x290   : > { %v3554_v25 = vsel %vm5676_vm6, %v763_v14, 0.0  ;;  %v3558_v26 = vsel %vm5676_vm6, %v764_v16, 0.0  ;;  %v818_v28 = vrot.slane %v3543_v20, 5  ;;  %v820_v33 = vrot.slane %v3547_v21, 4 }
 0x291   : > { %v834_v24 = vsel %vm5678_vm14, %v826_v15, -inf  ;;  %v815_v30 = vsel %vm5689_vm8, %v814_v22, %v3535_v18  ;;  %v822_v35 = vrot.slane %v3554_v25, 3  ;;  %v824_v36 = vrot.slane %v3558_v26, 2 }
 0x292   : > { %835 = vmax.xlane.f32.xlu1 %v834_v24  ;;  %v817_v32 = vsel %vm5685_vm9, %v816_v23, %v815_v30 }
 0x293   : > { %v2562_v29 = vpop.eup %2561  ;;  %v819_v34 = vsel %vm5686_vm10, %v818_v28, %v817_v32 }
 0x294   : > { %v1206_v31 = vmul.f32 %v2562_v29, %v1196_v42  ;;  %v821_v37 = vsel %vm5688_vm11, %v820_v33, %v819_v34  ;;  %v379_v29 = vlaneseq }
 0x295   : > { %v823_v47 = vsel %vm5687_vm12, %v822_v35, %v821_v37 }
 0x296   : > { %v1213_v41 = vrot.slane %v1206_v31, 4  ;;  %v1214_v43 = vrot.slane %v1206_v31, 5  ;;  %v1208_v44 = vrot.slane %v1206_v31, 6  ;;  %v1209_v48 = vrot.slane %v1206_v31, 7 }
 0x297   : > { %v1210_v42 = vrot.slane %v1206_v31, 1  ;;  %v1211_v49 = vrot.slane %v1206_v31, 2  ;;  %v825_v53 = vsel %vm5679_vm13, %v824_v36, %v823_v47  ;;  %v1212_v57 = vrot.slane %v1206_v31, 3 }
 0x298   : > { %v3573_v54 = vsel %vm5676_vm6, %v1213_v41, 0.0  ;;  %v3577_v55 = vsel %vm5676_vm6, %v1214_v43, 0.0  ;;  %v830_v58 = vsel %vm5677_vm15, %v825_v53, -inf  ;;  %v3584_v61 = vsel %vm5676_vm6, %v1209_v48, 0.0 }
 0x299   : > { %5825 = vst [vmem:[#allocation30_spill] sm:$0xff] %v3573_v54  ;;  %5826 = vst [vmem:[#allocation31_spill] sm:$0xff] %v3577_v55  ;;  %v1273_v59 = vrot.slane %v3573_v54, 2  ;;  %v1274_v60 = vrot.slane %v3577_v55, 1  ;;  %831 = vmax.xlane.f32.xlu0 %v830_v58  ;;  %v3588_v62 = vsel %vm5676_vm6, %v1206_v31, 0.0  ;;  %v3592_v63 = vsel %vm5676_vm6, %v1210_v42, 0.0 }
 0x29a   : > { %5827 = vst [vmem:[#allocation32_spill] sm:$0xff] %v3584_v61  ;;  %5828 = vst [vmem:[#allocation33_spill] sm:$0xff] %v3588_v62  ;;  %v3597_v1 = vsel %vm5676_vm6, %v1211_v49, 0.0  ;;  %v1263_v3 = vrot.slane %v3584_v61, 7  ;;  %v3603_v6 = vsel %vm5676_vm6, %v1208_v44, 0.0  ;;  %v3607_v8 = vsel %vm5676_vm6, %v1212_v57, 0.0 }
 0x29b   : > { %5829 = vst [vmem:[#allocation34_spill] sm:$0xff] %v3592_v63  ;;  %v1275_v0 = vsel %vm5707_vm7, %v1274_v60, %v1273_v59  ;;  %5830 = vst [vmem:[#allocation35_spill] sm:$0xff] %v3597_v1  ;;  %v1265_v9 = vrot.slane %v3588_v62, 6  ;;  %v1267_v13 = vrot.slane %v3592_v63, 5  ;;  %v1269_v15 = vrot.slane %v3597_v1, 4 }
 0x29c   : > { %v1283_v5 = vsel %vm5684_vm0, %v1275_v0, -inf  ;;  %5831 = vst [vmem:[#allocation36_spill] sm:$0xff] %v3603_v6  ;;  %5832 = vst [vmem:[#allocation37_spill] sm:$0xff] %v3607_v8  ;;  %v1264_v11 = vsel %vm5685_vm9, %v1263_v3, %v3603_v6  ;;  %v1271_v22 = vrot.slane %v3607_v8, 3  ;;  %v380_v31 = vshrl.u32 %v379_v29, 7 }
 0x29d   : > { %1284 = vmax.xlane.f32.xlu1 %v1283_v5  ;;  %v1266_v14 = vsel %vm5686_vm10, %v1265_v9, %v1264_v11  ;;  %v3620_v35 = vand.u32 127, %v379_v29 }
 0x29e   : > { %v1268_v16 = vsel %vm5688_vm11, %v1267_v13, %v1266_v14  ;;  %v381_v34 = vmul.u32 128, %v380_v31 }
 0x29f   : > { %v1270_v23 = vsel %vm5687_vm12, %v1269_v15, %v1268_v16  ;;  %5833 = vst [vmem:[#allocation38_spill] sm:$0xff] %v3620_v35 }
 0x2a0   : > { %v1272_v24 = vsel %vm5679_vm13, %v1271_v22, %v1270_v23  ;;  %v3623_v43 = vadd.s32 %v3620_v35, %v381_v34 }
 0x2a1   : > { %v1279_v28 = vsel %vm5683_vm1, %v1272_v24, -inf }
 0x2a2   : > { %1280 = vmax.xlane.f32.xlu0 %v1279_v28  ;;  %v3628_v53 = vrot.slane %v3623_v43, 1  ;;  %v3631_v57 = vrot.slane %v3623_v43, 2  ;;  %v3636_v59 = vrot.slane %v3623_v43, 3  ;;  %v3640_v60 = vrot.slane %v3623_v43, 4 }
 0x2a3   : > { %v3643_v0 = vrot.slane %v3623_v43, 5  ;;  %v3647_v5 = vrot.slane %v3623_v43, 6  ;;  %v3650_v9 = vrot.slane %v3623_v43, 7 }
 0x318   : > { %v515_v30 = vpop.xlane.xlu1 %514 }
 0x319   : > { %v516_v32 = vrot.slane %v515_v30, 4 }
 0x31b   : > { %v517_v33 = vmax.f32 %v515_v30, %v516_v32 }
 0x31d   : > { %v518_v36 = vrot.slane %v517_v33, 2 }
 0x31f   : > { %v519_v37 = vmax.f32 %v517_v33, %v518_v36  ;;  %v836_v41 = vpop.xlane.xlu1 %835 }
 0x320   : > { %v838_v47 = vsel %vm5678_vm14, %v836_v41, -inf }
 0x321   : > { %v520_v44 = vrot.slane %v519_v37, 1 }
 0x323   : > { %v521_v48 = vmax.f32 %v519_v37, %v520_v44 }
 0x325   : > { %vm523_vm2 = vcmp.eq.f32.partialorder %v3478_v38, %v521_v48  ;;  %vm524_vm3 = vcmp.eq.f32.partialorder %v3482_v40, %v521_v48  ;;  %vm525_vm4 = vcmp.eq.f32.partialorder %v3487_v45, %v521_v48  ;;  %vm526_vm5 = vcmp.eq.f32.partialorder %v3491_v46, %v521_v48 }
 0x326   : > { %v832_v42 = vpop.xlane.xlu0 %831  ;;  %vm522_vm6 = vcmp.eq.f32.partialorder %v3497_v50, %v521_v48  ;;  %v538_v13 = vsel %vm523_vm2, %v3628_v53, 1073741824  ;;  %v539_v14 = vsel %vm524_vm3, %v3631_v57, 1073741824  ;;  %vm528_vm14 = vcmp.eq.f32.partialorder %v3505_v52, %v521_v48 }
 0x327   : > { %v837_v49 = vsel %vm5677_vm15, %v832_v42, -inf  ;;  %vm527_vm15 = vcmp.eq.f32.partialorder %v3501_v51, %v521_v48  ;;  %vm529_vm13 = vcmp.eq.f32.partialorder %v3512_v56, %v521_v48  ;;  %v540_v16 = vsel %vm525_vm4, %v3636_v59, 1073741824 }
 0x328   : > { %v839_v58 = vmax.f32 %v837_v49, %v838_v47  ;;  %v541_v22 = vsel %vm526_vm5, %v3640_v60, 1073741824  ;;  %v545_v23 = vrot.slane %v538_v13, 7  ;;  %v547_v24 = vrot.slane %v539_v14, 6 }
 0x329   : > { %v537_v30 = vsel %vm522_vm6, %v3623_v43, 1073741824  ;;  %v542_v31 = vsel %vm527_vm15, %v3643_v0, 1073741824  ;;  %v543_v33 = vsel %vm528_vm14, %v3647_v5, 1073741824  ;;  %v544_v34 = vsel %vm529_vm13, %v3650_v9, 1073741824 }
 0x32a   : > { %v840_v3 = vrot.slane %v839_v58, 4  ;;  %v1285_v11 = vpop.xlane.xlu1 %1284  ;;  %v546_v36 = vsel %vm5707_vm7, %v545_v23, %v537_v30  ;;  %v549_v37 = vrot.slane %v540_v16, 5  ;;  %v551_v48 = vrot.slane %v541_v22, 4 }
 0x32b   : > { %v1287_v29 = vsel %vm5684_vm0, %v1285_v11, -inf  ;;  %v548_v47 = vsel %vm5689_vm8, %v547_v24, %v546_v36  ;;  %v555_v13 = vrot.slane %v543_v33, 2  ;;  %v557_v39 = vrot.slane %v544_v34, 1 }
 0x32c   : > { %v841_v15 = vmax.f32 %v839_v58, %v840_v3  ;;  %v550_v49 = vsel %vm5685_vm9, %v549_v37, %v548_v47  ;;  %v553_v58 = vrot.slane %v542_v31, 3  ;;  %vm5834_vm6 = vcmask 1047559  }
 0x32d   : > { %v552_v11 = vsel %vm5686_vm10, %v551_v48, %v550_v49 }
 0x32e   : > { %v842_v28 = vrot.slane %v841_v15, 2  ;;  %v554_v7 = vsel %vm5688_vm11, %v553_v58, %v552_v11 }
 0x32f   : > { %v1281_v32 = vpop.xlane.xlu0 %1280 }
 0x330   : > { %v843_v41 = vmax.f32 %v841_v15, %v842_v28  ;;  %v1286_v44 = vsel %vm5683_vm1, %v1281_v32, -inf  ;;  %v556_v15 = vsel %vm5687_vm12, %v555_v13, %v554_v7  ;;  %vm5835_vm1 = vcmask 1040384  }
 0x331   : > { %v1288_v42 = vmax.f32 %v1286_v44, %v1287_v29  ;;  %v3673_v28 = vsel %vm5834_vm6, %v557_v39, %v556_v15 }
 0x332   : > { %v844_v3 = vrot.slane %v843_v41, 1  ;;  %v560_v22 = vshra.s32 %v3673_v28, 16 }
 0x333   : > { %v1289_v14 = vrot.slane %v1288_v42, 4 }
 0x334   : > { %v845_v23 = vmax.f32 %v843_v41, %v844_v3  ;;  %v3681_v30 = vcvt.s32.f32 %v560_v22 }
 0x335   : > { %v1290_v16 = vmax.f32 %v1288_v42, %v1289_v14 }
 0x336   : > { %vm853_vm13 = vcmp.eq.f32.partialorder %v3526_v12, %v845_v23  ;;  %vm847_vm14 = vcmp.eq.f32.partialorder %v3531_v17, %v845_v23  ;;  %vm846_vm15 = vcmp.eq.f32.partialorder %v3535_v18, %v845_v23  ;;  %vm848_vm2 = vcmp.eq.f32.partialorder %v3539_v19, %v845_v23  ;;  %563 = vmin.xlane.f32.xlu0 %v3681_v30 }
 0x337   : > { %v1291_v24 = vrot.slane %v1290_v16, 2  ;;  %v861_v29 = vsel %vm853_vm13, %v3647_v5, 1073741824  ;;  %vm849_vm3 = vcmp.eq.f32.partialorder %v3543_v20, %v845_v23  ;;  %vm850_vm4 = vcmp.eq.f32.partialorder %v3547_v21, %v845_v23 }
 0x338   : > { %v874_v7 = vrot.slane %v861_v29, 1  ;;  %vm851_vm5 = vcmp.eq.f32.partialorder %v3554_v25, %v845_v23  ;;  %vm852_vm6 = vcmp.eq.f32.partialorder %v3558_v26, %v845_v23  ;;  %v855_v31 = vsel %vm847_vm14, %v3623_v43, 1073741824 }
 0x339   : > { %v1292_v39 = vmax.f32 %v1290_v16, %v1291_v24  ;;  %v856_v33 = vsel %vm848_vm2, %v3628_v53, 1073741824  ;;  %v857_v34 = vsel %vm849_vm3, %v3631_v57, 1073741824  ;;  %v858_v36 = vsel %vm850_vm4, %v3636_v59, 1073741824 }
 0x33a   : > { %v3690_v32 = vsel %vm5835_vm1, %v874_v7, 2147483647  ;;  %v859_v44 = vsel %vm851_vm5, %v3640_v60, 1073741824  ;;  %v860_v47 = vsel %vm852_vm6, %v3643_v0, 1073741824  ;;  %v862_v48 = vrot.slane %v855_v31, 7 }
 0x33b   : > { %v1293_v37 = vrot.slane %v1292_v39, 1  ;;  %v892_v41 = vshra.s32 %v3690_v32, 16  ;;  %v864_v42 = vrot.slane %v856_v33, 6  ;;  %v854_v58 = vsel %vm846_vm15, %v3650_v9, 1073741824 }
 0x33c   : > { %v866_v11 = vrot.slane %v857_v34, 5  ;;  %v863_v13 = vsel %vm5689_vm8, %v862_v48, %v854_v58  ;;  %v868_v14 = vrot.slane %v858_v36, 4  ;;  %v870_v15 = vrot.slane %v859_v44, 3 }
 0x33d   : > { %v1294_v49 = vmax.f32 %v1292_v39, %v1293_v37  ;;  %v3701_v3 = vcvt.s32.f32 %v892_v41  ;;  %v872_v16 = vrot.slane %v860_v47, 2  ;;  %v865_v22 = vsel %vm5685_vm9, %v864_v42, %v863_v13 }
 0x33e   : > { %v867_v24 = vsel %vm5686_vm10, %v866_v11, %v865_v22  ;;  %vm5836_vm4 = vcmask 1047559  }
 0x33f   : > { %vm1296_vm1 = vcmp.eq.f32.partialorder %v3584_v61, %v1294_v49  ;;  %895 = vmin.xlane.f32.xlu0 %v3701_v3  ;;  %vm1301_vm13 = vcmp.eq.f32.partialorder %v3573_v54, %v1294_v49  ;;  %vm1302_vm14 = vcmp.eq.f32.partialorder %v3577_v55, %v1294_v49  ;;  %v869_v31 = vsel %vm5688_vm11, %v868_v14, %v867_v24 }
 0x340   : > { %v1304_v23 = vsel %vm1296_vm1, %v3650_v9, 1073741824  ;;  %v1309_v29 = vsel %vm1301_vm13, %v3640_v60, 1073741824  ;;  %v1310_v7 = vsel %vm1302_vm14, %v3643_v0, 1073741824  ;;  %v871_v36 = vsel %vm5687_vm12, %v870_v15, %v869_v31  ;;  %vm5838_vm13 = vmmov %vm5836_vm4 }
 0x341   : > { %v1311_v39 = vrot.slane %v1304_v23, 7  ;;  %v1321_v33 = vrot.slane %v1309_v29, 2  ;;  %v1322_v34 = vrot.slane %v1310_v7, 1  ;;  %vm1295_vm15 = vcmp.eq.f32.partialorder %v3603_v6, %v1294_v49 }
 0x342   : > { %vm1297_vm2 = vcmp.eq.f32.partialorder %v3588_v62, %v1294_v49  ;;  %vm1298_vm3 = vcmp.eq.f32.partialorder %v3592_v63, %v1294_v49  ;;  %v873_v9 = vsel %vm5836_vm4, %v872_v16, %v871_v36  ;;  %vm1299_vm5 = vcmp.eq.f32.partialorder %v3597_v1, %v1294_v49 }
 0x343   : > { %v1323_v37 = vsel %vm5707_vm7, %v1322_v34, %v1321_v33  ;;  %vm1300_vm6 = vcmp.eq.f32.partialorder %v3607_v8, %v1294_v49  ;;  %vm5837_vm1 = vcmask 1047553   ;;  %v1303_v41 = vsel %vm1295_vm15, %v3647_v5, 1073741824 }
 0x344   : > { %v875_v60 = vsel %vm5837_vm1, %v873_v9, 2147483647  ;;  %v1339_v0 = vsel %vm5684_vm0, %v1323_v37, 2147483647  ;;  %v1305_v44 = vsel %vm1297_vm2, %v3623_v43, 1073741824  ;;  %v1306_v42 = vsel %vm1298_vm3, %v3628_v53, 1073741824 }
 0x345   : > { %v877_v47 = vshra.s32 %v875_v60, 16  ;;  %v1341_v48 = vshra.s32 %v1339_v0, 16  ;;  %v1307_v58 = vsel %vm1299_vm5, %v3631_v57, 1073741824  ;;  %v1308_v11 = vsel %vm1300_vm6, %v3636_v59, 1073741824 }
 0x346   : > { %v1312_v13 = vsel %vm5685_vm9, %v1311_v39, %v1303_v41  ;;  %v1313_v14 = vrot.slane %v1305_v44, 6  ;;  %v1315_v16 = vrot.slane %v1306_v42, 5  ;;  %v1317_v23 = vrot.slane %v1307_v58, 4 }
 0x347   : > { %v879_v49 = vcvt.s32.f32 %v877_v47  ;;  %v1343_v15 = vcvt.s32.f32 %v1341_v48  ;;  %v1319_v24 = vrot.slane %v1308_v11, 3  ;;  %vm5839_vm14 = vcmask 1047554  }
 0x348   : > { %v1314_v22 = vsel %vm5686_vm10, %v1313_v14, %v1312_v13  ;;  %v5840_v39 = vrot.slane %v3401_v10, 2  ;;  %v1506_v31 = vrot.slane %v3388_v4, 2  ;;  %v559_v33 = vand.u32 65535, %v3673_v28 }
 0x349   : > { %880 = vmin.xlane.f32.xlu1 %v879_v49  ;;  %1344 = vmin.xlane.f32.xlu0 %v1343_v15  ;;  %v1316_v5 = vsel %vm5688_vm11, %v1315_v16, %v1314_v22  ;;  %v891_v9 = vand.u32 65535, %v3690_v32  ;;  %v1340_v11 = vand.u32 65535, %v1339_v0  ;;  %v5842_v22 = vmov 0  }
 0x34a   : > { %v1318_v53 = vsel %vm5687_vm12, %v1317_v23, %v1316_v5  ;;  %v561_v36 = vcvt.s32.f32 %v559_v33  ;;  %vm5843_vm6 = vcmp.eq.s32.totalorder %v3472_v27, 1  ;;  %vm477_vm1 = vcmp.gt.f32.partialorder %v3478_v38, 0.0 }
 0x34b   : > { %v1320_v57 = vsel %vm5838_vm13, %v1319_v24, %v1318_v53  ;;  %v893_v10 = vcvt.s32.f32 %v891_v9  ;;  %v1342_v14 = vcvt.s32.f32 %v1340_v11  ;;  %v583_v23 = vsel %vm5843_vm6, 1, %v5842_v22 }
 0x34c   : > { %v1324_v59 = vsel %vm5839_vm14, %v1320_v57, 2147483647  ;;  %v584_v5 = vrot.slane %v583_v23, 7  ;;  %v586_v24 = vrot.slane %v583_v23, 6  ;;  %v3763_v57 = vrot.slane %v583_v23, 2 }
 0x34d   : > { %v1326_v29 = vshra.s32 %v1324_v59, 16  ;;  %v1325_v47 = vand.u32 65535, %v1324_v59  ;;  %vm478_vm13 = vcmp.gt.f32.partialorder %v3482_v40, 0.0  ;;  %vm476_vm14 = vcmp.gt.f32.partialorder %v3497_v50, 0.0 }
 0x34e   : > { %v585_v53 = vsel %vm5707_vm7, %v584_v5, %v583_v23  ;;  %v626_v33 = vsel %vm478_vm13, %v3482_v40, 0.0  ;;  %vm482_vm6 = vcmp.gt.f32.partialorder %v3505_v52, 0.0  ;;  %v5906_v8 = vmov 0 }
 0x34f   : > { %v1328_v7 = vcvt.s32.f32 %v1326_v29  ;;  %v1327_v32 = vcvt.s32.f32 %v1325_v47  ;;  %v587_v0 = vsel %vm5689_vm8, %v586_v24, %v585_v53  ;;  %v625_v29 = vsel %vm477_vm1, %v3478_v38, 0.0 }
 0x350   : > { %v5990_v40 = vmov 0 }
 0x351   : > { %1329 = vmin.xlane.f32.xlu1 %v1328_v7 }
 0x35f   : > { %1469 = vrot.lane.b32.xlu0 %v5840_v39, %s2935_s6  ;;  %v590_v39 = vrot.slane %v583_v23, 4  ;;  %s2345_s6 = spop %2344 }
 0x362   : > { %1507 = vrot.lane.b32.xlu1 %v1506_v31, %s2934_s21  ;;  %s5841_s21 = smov 125  }
 0x363   : > { %1581 = vrot.lane.b32.xlu0 %v3382_v2, %s2936_s2 }
 0x3c3   : > { %v564_v34 = vpop.xlane.xlu0 %563 }
 0x3c4   : > { %vm565_vm15 = vcmp.eq.f32.partialorder %v3681_v30, %v564_v34  ;;  %v570_v59 = vcvt.f32.s32 %v564_v34  ;;  %v640_v34 = vrot.slane %v625_v29, 7 }
 0x3c5   : > { %v566_v37 = vsel %vm565_vm15, %v561_v36, inf  ;;  %vm479_vm15 = vcmp.gt.f32.partialorder %v3487_v45, 0.0 }
 0x3c6   : > { %567 = vmin.xlane.f32.xlu1 %v566_v37  ;;  %v571_v37 = vshll.u32 %v570_v59, 16 }
 0x3cc   : > { %v3745_v41 = vpop.xlane.xlu0 %895 }
 0x3cd   : > { %vm897_vm2 = vcmp.eq.f32.partialorder %v3701_v3, %v3745_v41  ;;  %v876_v3 = vand.u32 65535, %v875_v60  ;;  %v596_v60 = vrot.slane %v583_v23, 1 }
 0x3ce   : > { %v898_v4 = vsel %vm897_vm2, %v893_v10, inf  ;;  %vm480_vm2 = vcmp.gt.f32.partialorder %v3491_v46, 0.0 }
 0x3cf   : > { %899 = vmin.xlane.f32.xlu0 %v898_v4  ;;  %v878_v58 = vcvt.s32.f32 %v876_v3  ;;  %v1368_v27 = vsel %vm5707_vm7, %v596_v60, %v3763_v57  ;;  %v628_v59 = vsel %vm480_vm2, %v3491_v46, 0.0  ;;  %v3974_v46 = vld [vmem:[%s3347_s11 + $0x40] sm:$0xff] }
 0x3d0   : > { %v1369_v9 = vsel %vm5689_vm8, %v583_v23, %v1368_v27  ;;  %5870 = vst [vmem:[#allocation45_spill] sm:$0xff] %v3974_v46 }
 0x3d1   : > { %v1370_v3 = vsel %vm5685_vm9, %v584_v5, %v1369_v9  ;;  %v646_v9 = vrot.slane %v628_v59, 4 }
 0x3d6   : > { %v3749_v44 = vpop.xlane.xlu0 %1344  ;;  %v3751_v2 = vpop.xlane.xlu1 %880 }
 0x3d7   : > { %1544 = vrot.lane.b32.xlu1 %v1506_v31, %s5841_s21  ;;  %vm882_vm4 = vcmp.eq.f32.partialorder %v879_v49, %v3751_v2  ;;  %vm1346_vm5 = vcmp.eq.f32.partialorder %v1343_v15, %v3749_v44  ;;  %v588_v49 = vrot.slane %v583_v23, 5  ;;  %v919_v15 = vsel %vm5707_vm7, %v583_v23, %v596_v60 }
 0x3d8   : > { %v883_v13 = vsel %vm882_vm4, %v878_v58, inf  ;;  %v1347_v16 = vsel %vm1346_vm5, %v1342_v14, inf  ;;  %v920_v31 = vsel %vm5689_vm8, %v584_v5, %v919_v15  ;;  %v627_v14 = vsel %vm479_vm15, %v3487_v45, 0.0  ;;  %v3989_v45 = vld [vmem:[%s3347_s11 + $0x50] sm:$0xff] }
 0x3d9   : > { %v921_v47 = vsel %vm5685_vm9, %v586_v24, %v920_v31  ;;  %vm481_vm4 = vcmp.gt.f32.partialorder %v3501_v51, 0.0  ;;  %v644_v27 = vrot.slane %v627_v14, 5  ;;  %vm5844_vm5 = vcmask 1047559   ;;  %5871 = vst [vmem:[#allocation46_spill] sm:$0xff] %v3989_v45 }
 0x3da   : > { %v1470_v28 = vpop.permute.xlu0 %1469  ;;  %v922_v53 = vsel %vm5686_vm10, %v588_v49, %v921_v47  ;;  %v630_v47 = vsel %vm482_vm6, %v3505_v52, 0.0  ;;  %v3836_v14 = vstv %s3454_s27  ;;  %v887_v59 = vcvt.f32.s32 %v3751_v2 }
 0x3db   : > { %2346 = vpush %v1470_v28  ;;  %v592_v28 = vrot.slane %v583_v23, 3  ;;  %v923_v31 = vsel %vm5688_vm11, %v590_v39, %v922_v53  ;;  %v3849_v53 = vstv %s3462_s7  ;;  %v6050_v45 = vmov 0 }
 0x3de   : > { %v3754_v30 = vpop.xlane.xlu1 %1329 }
 0x3df   : > { %vm1331_vm3 = vcmp.eq.f32.partialorder %v1328_v7, %v3754_v30  ;;  %v589_v7 = vsel %vm5685_vm9, %v588_v49, %v587_v0  ;;  %v1371_v0 = vsel %vm5686_vm10, %v586_v24, %v1370_v3  ;;  %v3829_v3 = vstv %s3450_s23 }
 0x3e0   : > { %v1332_v48 = vsel %vm1331_vm3, %v1327_v32, inf  ;;  %v591_v10 = vsel %vm5686_vm10, %v590_v39, %v589_v7  ;;  %v642_v32 = vrot.slane %v626_v33, 6  ;;  %v1372_v33 = vsel %vm5688_vm11, %v588_v49, %v1371_v0 }
 0x3e1   : > { %1333 = vmin.xlane.f32.xlu0 %v1332_v48  ;;  %v624_v48 = vsel %vm476_vm14, %v3497_v50, 0.0  ;;  %v593_v58 = vsel %vm5688_vm11, %v592_v28, %v591_v10  ;;  %v924_v10 = vsel %vm5687_vm12, %v592_v28, %v923_v31  ;;  %v1373_v49 = vsel %vm5687_vm12, %v590_v39, %v1372_v33  ;;  %v4017_v50 = vld [vmem:[%s3347_s11] sm:$0xff] }
 0x3e2   : > { %v1508_v42 = vpop.permute.xlu1 %1507  ;;  %v641_v11 = vsel %vm5707_vm7, %v640_v34, %v624_v48  ;;  %v595_v5 = vsel %vm5687_vm12, %v3763_v57, %v593_v58  ;;  %v629_v34 = vsel %vm481_vm4, %v3501_v51, 0.0  ;;  %v3819_v48 = vstv %s3447_s0  ;;  %5876 = vst [vmem:[#allocation49_spill] sm:$0xff] %v4017_v50 }
 0x3e3   : > { %2348 = vpush %v1508_v42  ;;  %v643_v15 = vsel %vm5689_vm8, %v642_v32, %v641_v11  ;;  %v597_v24 = vsel %vm5844_vm5, %v596_v60, %v595_v5  ;;  %vm483_vm5 = vcmp.gt.f32.partialorder %v3512_v56, 0.0  ;;  %v648_v32 = vrot.slane %v629_v34, 3 }
 0x3e4   : > { %vm598_vm0 = vcmp.ne.s32.totalorder %v597_v24, 0  ;;  %v3832_v58 = vstv %s3452_s14  ;;  %v3852_v0 = vstv %s3464_s29  ;;  %v3876_v31 = vstv %s3466_s3 }
 0x3e5   : > { %5852 = vst [vmem:[#allocation40_spill] sm:$0xff] %v3876_v31  ;;  %v1351_v24 = vcvt.f32.s32 %v3749_v44 }
 0x3fb   : > { %884 = vmin.xlane.f32.xlu1 %v883_v13 }
 0x3ff   : > { %1348 = vmin.xlane.f32.xlu1 %v1347_v16  ;;  %v1582_v16 = vpop.permute.xlu0 %1581 }
 0x40c   : > { %s2347_s2 = spop %2346 }
 0x414   : > { %s2349_s13 = spop %2348 }
 0x453   : > { %v568_v36 = vpop.xlane.xlu1 %567 }
 0x454   : > { %v569_v4 = vcvt.f32.s32 %v568_v36  ;;  %v645_v36 = vsel %vm5685_vm9, %v644_v27, %v643_v15  ;;  %vm5845_vm9 = vcmask 1047559   ;;  %v902_v15 = vcvt.f32.s32 %v3745_v41 }
 0x455   : > { %v647_v60 = vsel %vm5686_vm10, %v646_v9, %v645_v36  ;;  %v3823_v39 = vsel %vm5845_vm9, %v3763_v57, %v924_v10  ;;  %vm5846_vm10 = vmmov %vm5845_vm9  ;;  %v3843_v57 = vstv %s3456_s12  ;;  %v3887_v9 = vstv %s3468_s24 }
 0x456   : > { %v572_v42 = vadd.s32 %v571_v37, %v569_v4  ;;  %5853 = vst [vmem:[#allocation41_spill] sm:$0xff] %v3887_v9  ;;  %v903_v44 = vshll.u32 %v902_v15, 16  ;;  %v1336_v15 = vcvt.f32.s32 %v3754_v30 }
 0x457   : > { %v1545_v13 = vpop.permute.xlu1 %1544 }
 0x458   : > { %v573_v23 = vrot.slane %v572_v42, 4  ;;  %2350 = vpush %v1545_v13  ;;  %v649_v13 = vsel %vm5688_vm11, %v648_v32, %v647_v60  ;;  %v3896_v60 = vshll.u32 %v887_v59, 16  ;;  %v3971_v32 = vld [vmem:[%s3347_s11 + $0x38] sm:$0xff] }
 0x459   : > { %2352 = vpush %v1582_v16  ;;  %v631_v16 = vsel %vm483_vm5, %v3512_v56, 0.0  ;;  %5869 = vst [vmem:[#allocation44_spill] sm:$0xff] %v3971_v32 }
 0x45a   : > { %vm574_vm3 = vcmp.lt.s32.totalorder %v572_v42, %v573_v23  ;;  %v652_v41 = vrot.slane %v631_v16, 1  ;;  %v3993_v16 = vstv %s2347_s2 }
 0x45b   : > { %v575_v29 = vsel %vm574_vm3, %v572_v42, %v573_v23  ;;  %v3826_v42 = vsel %vm5846_vm10, %v592_v28, %v1373_v49  ;;  %v650_v23 = vrot.slane %v630_v47, 2  ;;  %v3846_v28 = vstv %s3460_s9  ;;  %5872 = vst [vmem:[#allocation47_spill] sm:$0xff] %v3993_v16 }
 0x45c   : > { %v576_v7 = vrot.slane %v575_v29, 2  ;;  %5847 = vst [vmem:[#allocation39_spill] sm:$0xff] %v3826_v42 }
 0x45e   : > { %vm577_vm3 = vcmp.lt.s32.totalorder %v575_v29, %v576_v7 }
 0x45f   : > { %v578_v37 = vsel %vm577_vm3, %v575_v29, %v576_v7  ;;  %v651_v7 = vsel %vm5687_vm12, %v650_v23, %v649_v13  ;;  %v3914_v23 = vshll.u32 %v1351_v24, 16  ;;  %v3948_v24 = vld [vmem:[%s3347_s11 + $0x48] sm:$0xff] }
 0x460   : > { %v579_v4 = vrot.slane %v578_v37, 1  ;;  %5866 = vst [vmem:[#allocation43_spill] sm:$0xff] %v3948_v24 }
 0x462   : > { %vm580_vm3 = vcmp.lt.s32.totalorder %v578_v37, %v579_v4 }
 0x463   : > { %v581_v11 = vsel %vm580_vm3, %v578_v37, %v579_v4  ;;  %v3889_v37 = vstv %s2345_s6  ;;  %v900_v4 = vpop.xlane.xlu0 %899 }
 0x464   : > { %vm582_vm9 = vcmp.eq.s32.totalorder %v3623_v43, %v581_v11  ;;  %5854 = vst [vmem:[#allocation42_spill] sm:$0xff] %v3889_v37 }
 0x465   : > { %vm3855_vm10 = vmand %vm582_vm9, %vm598_vm0 }
 0x466   : > { %v3864_v27 = vsel %vm3855_vm10, 1, %v5842_v22  ;;  %vm3870_vm3 = vmor %vm476_vm14, %vm3855_vm10  ;;  %vm5857_vm14 = vcmask 1047559  }
 0x467   : > { %v603_v2 = vrot.slane %v3864_v27, 3  ;;  %v604_v33 = vrot.slane %v3864_v27, 4  ;;  %v601_v36 = vrot.slane %v3864_v27, 1  ;;  %v605_v34 = vrot.slane %v3864_v27, 5 }
 0x468   : > { %v653_v49 = vsel %vm5857_vm14, %v652_v41, %v651_v7  ;;  %v901_v41 = vcvt.f32.s32 %v900_v4  ;;  %v602_v10 = vrot.slane %v3864_v27, 2  ;;  %v607_v51 = vrot.slane %v3864_v27, 7 }
 0x469   : > { %vm3891_vm0 = vcmp.ne.s32.totalorder %v603_v2, 0  ;;  %vm612_vm9 = vcmp.ne.s32.totalorder %v604_v33, 0  ;;  %vm3901_vm12 = vcmp.ne.s32.totalorder %v605_v34, 0  ;;  %vm3917_vm14 = vcmp.ne.s32.totalorder %v601_v36, 0 }
 0x46a   : > { %vm3925_vm11 = vmor %vm479_vm15, %vm3891_vm0  ;;  %v3991_v34 = vshll.u32 %v1336_v15, 16  ;;  %v3995_v33 = vstv %s2349_s13  ;;  %v4012_v59 = vsel %vm3855_vm10, 2.0, %v653_v49  ;;  %v904_v38 = vadd.s32 %v903_v44, %v901_v41  ;;  %v4030_v49 = vld [vmem:[%s3347_s11 + $0x8] sm:$0xff] }
 0x46b   : > { %vm3931_vm8 = vmor %vm480_vm2, %vm612_vm9  ;;  %5873 = vst [vmem:[#allocation48_spill] sm:$0xff] %v3995_v33  ;;  %v606_v44 = vrot.slane %v3864_v27, 6  ;;  %v783_v47 = vrot.slane %v4012_v59, 7  ;;  %vm610_vm2 = vcmp.ne.s32.totalorder %v602_v10, 0  ;;  %v784_v11 = vrot.slane %v4012_v59, 1 }
 0x46c   : > { %vm3954_vm15 = vmor %vm481_vm4, %vm3901_vm12  ;;  %5877 = vst [vmem:[#allocation50_spill] sm:$0xff] %v4030_v49  ;;  %vm615_vm10 = vcmp.ne.s32.totalorder %v607_v51, 0  ;;  %v785_v52 = vrot.slane %v4012_v59, 2  ;;  %v786_v5 = vrot.slane %v4012_v59, 3  ;;  %v787_v13 = vrot.slane %v4012_v59, 4 }
 0x46d   : > { %vm4001_vm12 = vmor %vm477_vm1, %vm3917_vm14  ;;  %vm5878_vm1 = vcmask 1040384   ;;  %vm614_vm4 = vcmp.ne.s32.totalorder %v606_v44, 0  ;;  %vm4056_vm0 = vcmp.gt.f32.partialorder %v3535_v18, %v783_v47  ;;  %v788_v16 = vrot.slane %v4012_v59, 5 }
 0x46e   : > { %v4045_v15 = vsel %vm5878_vm1, %v904_v38, 2147483647  ;;  %vm4064_vm9 = vmor %vm478_vm13, %vm610_vm2  ;;  %vm4079_vm1 = vcmp.gt.f32.partialorder %v3539_v19, %v784_v11  ;;  %v952_v51 = vsel %vm4056_vm0, %v3535_v18, %v783_v47  ;;  %vm4168_vm2 = vcmp.gt.f32.partialorder %v3547_v21, %v786_v5  ;;  %v1334_v56 = vpop.xlane.xlu0 %1333 }
 0x46f   : > { %vm4074_vm14 = vmor %vm482_vm6, %vm614_vm4  ;;  %vm5716_vm6 = vcmp.gt.f32.partialorder %v3531_v17, %v4012_v59  ;;  %v954_v35 = vsel %vm4079_vm1, %v3539_v19, %v784_v11  ;;  %v968_v41 = vrot.slane %v952_v51, 1  ;;  %v5893_v51 = vsel %vm3870_vm3, %v3819_v48, 0.0 }
 0x470   : > { %vm4088_vm13 = vmor %vm483_vm5, %vm615_vm10  ;;  %vm4123_vm5 = vcmp.gt.f32.partialorder %v3543_v20, %v785_v52  ;;  %v953_v19 = vsel %vm5716_vm6, %v3531_v17, %v4012_v59  ;;  %v970_v47 = vrot.slane %v954_v35, 7  ;;  %v4181_v35 = vrot.slane %v5893_v51, 7 }
 0x471   : > { %v969_v49 = vsel %vm5707_vm7, %v953_v19, %v968_v41  ;;  %v955_v2 = vsel %vm4123_vm5, %v3543_v20, %v785_v52  ;;  %v789_v20 = vrot.slane %v4012_v59, 6  ;;  %vm4189_vm4 = vcmp.gt.f32.partialorder %v3554_v25, %v787_v13 }
 0x472   : > { %v5894_v52 = vmov 0  ;;  %vm5896_vm10 = vcmask 1042434   ;;  %v956_v51 = vsel %vm4168_vm2, %v3547_v21, %v786_v5  ;;  %v972_v18 = vrot.slane %v955_v2, 6 }
 0x473   : > { %v5895_v52 = vsel %vm4189_vm4, 4294967295, %v5894_v52  ;;  %v971_v41 = vsel %vm5896_vm10, %v970_v47, %v969_v49  ;;  %v5897_v19 = vsel %vm3870_vm3, %v3829_v3, 0.0  ;;  %v5898_v49 = vsel %vm3870_vm3, %v3832_v58, 1.0 }
 0x474   : > { %v4207_v46 = vrot.slane %v5897_v19, 7  ;;  %v4213_v21 = vrot.slane %v5898_v49, 7  ;;  %v5899_v2 = vsel %vm3870_vm3, %v3836_v14, 1.0  ;;  %v1335_v47 = vcvt.f32.s32 %v1334_v56 }
 0x475   : > { %v4219_v5 = vrot.slane %v5899_v2, 7  ;;  %v5901_v50 = vsel %vm3925_vm11, %v3819_v48, 0.0  ;;  %v5902_v37 = vsel %vm3870_vm3, %v3843_v57, 0.0  ;;  %vm5904_vm10 = vcmask 1043459  }
 0x476   : > { %v4225_v19 = vrot.slane %v5901_v50, 7  ;;  %v4231_v49 = vrot.slane %v5902_v37, 7  ;;  %v973_v54 = vsel %vm5904_vm10, %v972_v18, %v971_v41  ;;  %v5905_v56 = vsel %vm3931_vm8, %v3819_v48, 0.0 }
 0x477   : > { %5900 = vst [vmem:[#allocation51_spill] sm:$0xff] %v4219_v5  ;;  %v4238_v2 = vrot.slane %v5905_v56, 7  ;;  %vm4241_vm7 = vcmp.gt.f32.partialorder %v3558_v26, %v788_v16  ;;  %v957_v29 = vsel %vm4189_vm4, %v3554_v25, %v787_v13  ;;  %v974_v50 = vrot.slane %v956_v51, 5 }
 0x478   : > { %5903 = vst [vmem:[#allocation52_spill] sm:$0xff] %v4231_v49  ;;  %v5907_v8 = vsel %vm4241_vm7, 4294967295, %v5906_v8  ;;  %v5908_v37 = vsel %vm3954_vm15, %v3819_v48, 0.0  ;;  %v5909_v18 = vsel %vm3925_vm11, %v3829_v3, 0.0  ;;  %vm4261_vm3 = vcmp.gt.f32.partialorder %v3526_v12, %v789_v20 }
 0x479   : > { %v4258_v41 = vrot.slane %v5909_v18, 7  ;;  %v5910_v56 = vmov 0  ;;  %v5912_v13 = vsel %vm3931_vm8, %v3829_v3, 0.0  ;;  %v1338_v18 = vadd.s32 %v3991_v34, %v1335_v47 }
 0x47a   : > { %v5911_v56 = vsel %vm4261_vm3, 4294967295, %v5910_v56  ;;  %v4270_v51 = vrot.slane %v5912_v13, 7  ;;  %vm5914_vm10 = vcmask 1044484   ;;  %vm5915_vm6 = vcmask 1047553  }
 0x47b   : > { %v975_v63 = vsel %vm5914_vm10, %v974_v50, %v973_v54  ;;  %v5916_v6 = vsel %vm3925_vm11, %v3832_v58, 1.0  ;;  %v5917_v34 = vsel %vm3931_vm8, %v3832_v58, 1.0  ;;  %vm5920_vm10 = vcmask 1045509  }
 0x47c   : > { %v4288_v49 = vrot.slane %v5916_v6, 7  ;;  %v4294_v54 = vrot.slane %v5917_v34, 7  ;;  %v5921_v50 = vsel %vm3925_vm11, %v3836_v14, 1.0  ;;  %v5939_v4 = vsel %vm4088_vm13, %v3819_v48, 0.0 }
 0x47d   : > { %v5943_v5 = vsel %vm4064_vm9, %v3832_v58, 1.0  ;;  %v5955_v44 = vsel %vm3954_vm15, %v3843_v57, 0.0  ;;  %v5957_v7 = vsel %vm4074_vm14, %v3843_v57, 0.0  ;;  %v5959_v30 = vsel %vm4088_vm13, %v3843_v57, 0.0 }
 0x47e   : > { %v6019_v11 = vmov 0 }
 0x488   : > { %v885_v32 = vpop.xlane.xlu1 %884 }
 0x489   : > { %v886_v55 = vcvt.f32.s32 %v885_v32  ;;  %v4252_v32 = vrot.slane %v5908_v37, 7  ;;  %v5913_v37 = vsel %vm3954_vm15, %v3829_v3, 0.0  ;;  %s2351_s10 = spop %2350 }
 0x48a   : > { %v4276_v1 = vrot.slane %v5913_v37, 7  ;;  %s2353_s0 = spop %2352  ;;  %v4480_v10 = vstv %s2351_s10 }
 0x48b   : > { %v889_v25 = vadd.s32 %v3896_v60, %v886_v55  ;;  %v958_v55 = vsel %vm4241_vm7, %v3558_v26, %v788_v16  ;;  %v976_v60 = vrot.slane %v957_v29, 4  ;;  %v959_v26 = vsel %vm4261_vm3, %v3526_v12, %v789_v20  ;;  %5967 = vst [vmem:[#allocation68_spill] sm:$0xff] %v4480_v10 }
 0x48c   : > { %v1349_v62 = vpop.xlane.xlu1 %1348  ;;  %v5923_v12 = vsel %vm3931_vm8, %v3836_v14, 1.0  ;;  %v978_v34 = vrot.slane %v958_v55, 3  ;;  %vm5929_vm7 = vcmask 1046534  }
 0x48d   : > { %v905_v61 = vsel %vm5915_vm6, %v889_v25, 2147483647  ;;  %v1350_v13 = vcvt.f32.s32 %v1349_v62  ;;  %v5918_v62 = vsel %vm3954_vm15, %v3832_v58, 1.0  ;;  %v977_v47 = vsel %vm5920_vm10, %v976_v60, %v975_v63 }
 0x48e   : > { %vm907_vm6 = vcmp.lt.s32.totalorder %v905_v61, %v4045_v15  ;;  %v4304_v16 = vrot.slane %v5918_v62, 7  ;;  %v4313_v25 = vrot.slane %v5921_v50, 7  ;;  %v4319_v20 = vrot.slane %v5923_v12, 7 }
 0x48f   : > { %v908_v6 = vsel %vm907_vm6, %v905_v61, %v4045_v15  ;;  %v1353_v29 = vadd.s32 %v3914_v23, %v1350_v13  ;;  %v5925_v61 = vsel %vm3954_vm15, %v3836_v14, 1.0  ;;  %vm5927_vm6 = vcmask 1047554  }
 0x490   : > { %5919 = vst [vmem:[#allocation53_spill] sm:$0xff] %v4304_v16  ;;  %5922 = vst [vmem:[#allocation54_spill] sm:$0xff] %v4313_v25  ;;  %v909_v37 = vrot.slane %v908_v6, 4  ;;  %v4325_v63 = vrot.slane %v5925_v61, 7  ;;  %v1354_v23 = vsel %vm5927_vm6, %v1338_v18, 2147483647  ;;  %v979_v13 = vsel %vm5929_vm7, %v978_v34, %v977_v47 }
 0x491   : > { %5924 = vst [vmem:[#allocation55_spill] sm:$0xff] %v4319_v20  ;;  %v980_v15 = vrot.slane %v959_v26, 2  ;;  %vm5928_vm10 = vcmask 1041408   ;;  %v5930_v62 = vsel %vm4001_vm12, %v3819_v48, 0.0  ;;  %v5931_v12 = vsel %vm4001_vm12, %v3829_v3, 0.0 }
 0x492   : > { %5926 = vst [vmem:[#allocation56_spill] sm:$0xff] %v4325_v63  ;;  %v1355_v60 = vsel %vm5928_vm10, %v1353_v29, 2147483647  ;;  %vm910_vm3 = vcmp.lt.s32.totalorder %v908_v6, %v909_v37  ;;  %v4334_v50 = vrot.slane %v5930_v62, 7  ;;  %v4340_v61 = vrot.slane %v5931_v12, 7 }
 0x493   : > { %vm1356_vm4 = vcmp.lt.s32.totalorder %v1354_v23, %v1355_v60  ;;  %v911_v55 = vsel %vm910_vm3, %v908_v6, %v909_v37  ;;  %v5932_v18 = vsel %vm4001_vm12, %v3832_v58, 1.0  ;;  %vm926_vm7 = vcmp.ne.s32.totalorder %v3823_v39, 0 }
 0x494   : > { %v4346_v26 = vrot.slane %v5932_v18, 7  ;;  %v1357_v47 = vsel %vm1356_vm4, %v1354_v23, %v1355_v60  ;;  %v912_v29 = vrot.slane %v911_v55, 2  ;;  %v5933_v6 = vsel %vm4001_vm12, %v3836_v14, 1.0 }
 0x495   : > { %v4353_v37 = vrot.slane %v5933_v6, 7  ;;  %v5935_v34 = vsel %vm4001_vm12, %v3843_v57, 0.0  ;;  %v1358_v12 = vrot.slane %v1357_v47, 4  ;;  %vm5936_vm3 = vcmask 1047559  }
 0x496   : > { %v4359_v62 = vrot.slane %v5935_v34, 7  ;;  %v981_v18 = vsel %vm5936_vm3, %v980_v15, %v979_v13  ;;  %v5937_v23 = vsel %vm4064_vm9, %v3819_v48, 0.0  ;;  %v5938_v6 = vsel %vm4074_vm14, %v3819_v48, 0.0 }
 0x497   : > { %5934 = vst [vmem:[#allocation57_spill] sm:$0xff] %v4353_v37  ;;  %v4366_v60 = vrot.slane %v5937_v23, 7  ;;  %v4372_v63 = vrot.slane %v5938_v6, 7  ;;  %v4378_v34 = vrot.slane %v5939_v4, 7  ;;  %vm913_vm12 = vcmp.lt.s32.totalorder %v911_v55, %v912_v29  ;;  %v6011_v37 = vld [vmem:[#allocation33_spill] sm:$0xff] }
 0x498   : > { %vm1359_vm4 = vcmp.lt.s32.totalorder %v1357_v47, %v1358_v12  ;;  %v5940_v15 = vsel %vm4064_vm9, %v3829_v3, 0.0  ;;  %v5941_v23 = vsel %vm4074_vm14, %v3829_v3, 0.0  ;;  %v914_v20 = vsel %vm913_vm12, %v911_v55, %v912_v29 }
 0x499   : > { %v4384_v13 = vrot.slane %v5940_v15, 7  ;;  %v4390_v6 = vrot.slane %v5941_v23, 7  ;;  %v1360_v25 = vsel %vm1359_vm4, %v1357_v47, %v1358_v12  ;;  %v5942_v48 = vsel %vm4088_vm13, %v3829_v3, 0.0 }
 0x49a   : > { %v4396_v4 = vrot.slane %v5942_v48, 7  ;;  %v4402_v15 = vrot.slane %v5943_v5, 7  ;;  %v915_v42 = vrot.slane %v914_v20, 1  ;;  %v1361_v16 = vrot.slane %v1360_v25, 2 }
 0x49b   : > { %v5944_v23 = vsel %vm4074_vm14, %v3832_v58, 1.0  ;;  %v5945_v3 = vsel %vm4088_vm13, %v3832_v58, 1.0  ;;  %v5947_v5 = vsel %vm4064_vm9, %v3836_v14, 1.0  ;;  %v5949_v12 = vsel %vm4064_vm9, %v3843_v57, 0.0 }
 0x49c   : > { %v4408_v55 = vrot.slane %v5944_v23, 7  ;;  %v4414_v47 = vrot.slane %v5945_v3, 7  ;;  %v4420_v29 = vrot.slane %v5947_v5, 7  ;;  %v4426_v48 = vrot.slane %v5949_v12, 7 }
 0x49d   : > { %v5951_v23 = vsel %vm3925_vm11, %v3843_v57, 0.0  ;;  %v5953_v3 = vsel %vm3931_vm8, %v3843_v57, 0.0  ;;  %vm916_vm6 = vcmp.lt.s32.totalorder %v914_v20, %v915_v42  ;;  %v4444_v5 = vrot.slane %v5955_v44, 7 }
 0x49e   : > { %5946 = vst [vmem:[#allocation58_spill] sm:$0xff] %v4414_v47  ;;  %5948 = vst [vmem:[#allocation59_spill] sm:$0xff] %v4420_v29  ;;  %v4432_v58 = vrot.slane %v5951_v23, 7  ;;  %v4438_v47 = vrot.slane %v5953_v3, 7  ;;  %v4450_v12 = vrot.slane %v5957_v7, 7  ;;  %v4456_v23 = vrot.slane %v5959_v30, 7 }
 0x49f   : > { %5950 = vst [vmem:[#allocation60_spill] sm:$0xff] %v4426_v48  ;;  %5956 = vst [vmem:[#allocation63_spill] sm:$0xff] %v4444_v5  ;;  %v917_v3 = vsel %vm916_vm6, %v914_v20, %v915_v42  ;;  %vm4458_vm8 = vcmp.lt.s32.totalorder %v1360_v25, %v1361_v16  ;;  %v5963_v44 = vsel %vm4074_vm14, %v3836_v14, 1.0  ;;  %v5965_v7 = vsel %vm4088_vm13, %v3836_v14, 1.0  ;;  %v6024_v48 = vld [vmem:[#allocation31_spill] sm:$0xff] }
 0x4a0   : > { %5952 = vst [vmem:[#allocation61_spill] sm:$0xff] %v4432_v58  ;;  %5954 = vst [vmem:[#allocation62_spill] sm:$0xff] %v4438_v47  ;;  %v4466_v5 = vrot.slane %v5963_v44, 7  ;;  %vm918_vm11 = vcmp.eq.s32.totalorder %v3623_v43, %v917_v3  ;;  %vm5968_vm9 = vcmp.gt.f32.partialorder %v3531_v17, %v4012_v59  ;;  %v5969_v3 = vmov 0  ;;  %v6021_v47 = vld [vmem:[#allocation30_spill] sm:$0xff] }
 0x4a1   : > { %5958 = vst [vmem:[#allocation64_spill] sm:$0xff] %v4450_v12  ;;  %5960 = vst [vmem:[#allocation65_spill] sm:$0xff] %v4456_v23  ;;  %v4472_v12 = vrot.slane %v5965_v7, 7  ;;  %v4495_v39 = vstv %s2353_s0  ;;  %v4499_v30 = vsel %vm4458_vm8, %v1360_v25, %v1361_v16  ;;  %v6016_v23 = vmov 0 }
 0x4a2   : > { %5964 = vst [vmem:[#allocation66_spill] sm:$0xff] %v4466_v5  ;;  %vm927_vm15 = vmand %vm918_vm11, %vm926_vm7  ;;  %v5731_v25 = vrot.slane %v4499_v30, 1  ;;  %v6022_v58 = vmov 0 }
 0x4a3   : > { %5966 = vst [vmem:[#allocation67_spill] sm:$0xff] %v4472_v12  ;;  %v928_v44 = vsel %vm927_vm15, 1, %v5842_v22  ;;  %vm4489_vm14 = vmor %vm5968_vm9, %vm927_vm15  ;;  %v4493_v7 = vsel %vm927_vm15, 2.0, %v981_v18  ;;  %vm5992_vm9 = vnez %v5907_v8  ;;  %v6025_v18 = vmov 0 }
 0x4a4   : > { %v5970_v3 = vsel %vm4489_vm14, 4294967295, %v5969_v3  ;;  %5972 = vst [vmem:[#allocation70_spill] sm:$0xff] %v4495_v39  ;;  %v929_v33 = vrot.slane %v928_v44, 7  ;;  %v930_v20 = vrot.slane %v928_v44, 1  ;;  %v931_v14 = vrot.slane %v928_v44, 2  ;;  %v6015_v39 = vld [vmem:[#allocation35_spill] sm:$0xff] }
 0x4a5   : > { %5971 = vst [vmem:[#allocation69_spill] sm:$0xff] %v5970_v3  ;;  %v932_v57 = vrot.slane %v928_v44, 3  ;;  %v933_v42 = vrot.slane %v928_v44, 4  ;;  %v1013_v17 = vsel %vm4489_vm14, %v3846_v28, %v4334_v50  ;;  %v1050_v59 = vsel %vm4489_vm14, %v3849_v53, %v4340_v61  ;;  %v6012_v3 = vld [vmem:[#allocation34_spill] sm:$0xff] }
 0x4a6   : > { %v1088_v16 = vsel %vm4489_vm14, %v3852_v0, %v4346_v26  ;;  %vm936_vm13 = vcmp.ne.s32.totalorder %v929_v33, 0  ;;  %vm939_vm10 = vcmp.ne.s32.totalorder %v931_v14, 0  ;;  %vm4514_vm3 = vcmp.ne.s32.totalorder %v930_v20, 0 }
 0x4a7   : > { %vm940_vm7 = vcmp.ne.s32.totalorder %v932_v57, 0  ;;  %vm4520_vm12 = vmor %vm4056_vm0, %vm936_vm13  ;;  %v1162_v26 = vsel %vm4489_vm14, %v3887_v9, %v4359_v62  ;;  %v4532_v36 = vrot.slane %v1013_v17, 7  ;;  %v4540_v57 = vrot.slane %v1050_v59, 7  ;;  %v6005_v59 = vld [vmem:[#allocation36_spill] sm:$0xff]  ;;  %v6115_v50 = vld [vmem:[#allocation62_spill] sm:$0xff] }
 0x4a8   : > { %vm4536_vm4 = vmor %vm4123_vm5, %vm939_vm10  ;;  %v4542_v20 = vrot.slane %v1088_v16, 7  ;;  %v4544_v33 = vrot.slane %v1162_v26, 7  ;;  %v934_v14 = vrot.slane %v928_v44, 5  ;;  %v5983_v61 = vmov 0  ;;  %v5998_v16 = vld [vmem:[#allocation53_spill] sm:$0xff] }
 0x4a9   : > { %5977 = vst [vmem:[#allocation71_spill] sm:$0xff] %v4532_v36  ;;  %5980 = vst [vmem:[#allocation72_spill] sm:$0xff] %v4540_v57  ;;  %v935_v62 = vrot.slane %v928_v44, 6  ;;  %vm941_vm6 = vcmp.ne.s32.totalorder %v933_v42, 0  ;;  %vm4563_vm5 = vcmp.lt.s32.totalorder %v4499_v30, %v5731_v25  ;;  %vm5995_vm10 = vnez %v5911_v56  ;;  %v6000_v44 = vld [vmem:[#allocation58_spill] sm:$0xff]  ;;  %v6018_v25 = vld [vmem:[#allocation37_spill] sm:$0xff] }
 0x4aa   : > { %5981 = vst [vmem:[#allocation73_spill] sm:$0xff] %v4542_v20  ;;  %5982 = vst [vmem:[#allocation74_spill] sm:$0xff] %v4544_v33  ;;  %v5996_v26 = vmov 0  ;;  %v1232_v12 = vrot.slane %v4493_v7, 6  ;;  %v1233_v5 = vrot.slane %v4493_v7, 7  ;;  %v1234_v8 = vrot.slane %v4493_v7, 1 }
 0x4ab   : > { %vm4548_vm0 = vmor %vm4168_vm2, %vm940_vm7  ;;  %vm942_vm2 = vcmp.ne.s32.totalorder %v934_v14, 0  ;;  %vm943_vm11 = vcmp.ne.s32.totalorder %v935_v62, 0  ;;  %v5999_v62 = vld [vmem:[#allocation39_spill] sm:$0xff]  ;;  %v1235_v20 = vrot.slane %v4493_v7, 2  ;;  %v1236_v56 = vrot.slane %v4493_v7, 3  ;;  %v6008_v14 = vld [vmem:[#allocation32_spill] sm:$0xff] }
 0x4ac   : > { %v5984_v61 = vsel %vm4548_vm0, 4294967295, %v5983_v61  ;;  %vm4571_vm8 = vmor %vm4079_vm1, %vm4514_vm3  ;;  %vm5989_vm1 = vnez %v5895_v52  ;;  %v5993_v52 = vmov 0  ;;  %v1237_v57 = vrot.slane %v4493_v7, 4  ;;  %v6117_v42 = vld [vmem:[#allocation63_spill] sm:$0xff] }
 0x4ad   : > { %vm4589_vm15 = vmor %vm5989_vm1, %vm941_vm6  ;;  %v1238_v36 = vrot.slane %v4493_v7, 5  ;;  %vm4714_vm6 = vcmp.gt.f32.partialorder %v6005_v59, %v1232_v12  ;;  %vm4726_vm1 = vcmp.gt.f32.partialorder %v6012_v3, %v1234_v8  ;;  %v6027_v9 = vrot.slane %v4499_v30, 1 }
 0x4ae   : > { %v5991_v40 = vsel %vm4589_vm15, 4294967295, %v5990_v40  ;;  %vm4607_vm13 = vmor %vm5992_vm9, %vm942_vm2  ;;  %vm4719_vm2 = vcmp.gt.f32.partialorder %v6008_v14, %v1233_v5  ;;  %vm4731_vm9 = vcmp.gt.f32.partialorder %v6015_v39, %v1235_v20  ;;  %vm4741_vm3 = vcmp.gt.f32.partialorder %v6021_v47, %v1237_v57 }
 0x4af   : > { %v5994_v52 = vsel %vm4607_vm13, 4294967295, %v5993_v52  ;;  %vm4629_vm7 = vmor %vm5995_vm10, %vm943_vm11  ;;  %v6017_v23 = vsel %vm4731_vm9, 4294967295, %v6016_v23  ;;  %vm4736_vm10 = vcmp.gt.f32.partialorder %v6018_v25, %v1236_v56  ;;  %v6023_v58 = vsel %vm4741_vm3, 4294967295, %v6022_v58 }
 0x4b0   : > { %v5997_v26 = vsel %vm4629_vm7, 4294967295, %v5996_v26  ;;  %v6020_v11 = vsel %vm4736_vm10, 4294967295, %v6019_v11  ;;  %vm4746_vm11 = vcmp.gt.f32.partialorder %v6024_v48, %v1238_v36  ;;  %v1366_v10 = vsel %vm4563_vm5, %v4499_v30, %v6027_v9 }
 0x4b1   : > { %v6026_v18 = vsel %vm4746_vm11, 4294967295, %v6025_v18  ;;  %v1401_v29 = vsel %vm4714_vm6, %v6005_v59, %v1232_v12  ;;  %v1402_v17 = vsel %vm4719_vm2, %v6008_v14, %v1233_v5  ;;  %vm1367_vm14 = vcmp.eq.s32.totalorder %v3623_v43, %v1366_v10 }
 0x4b2   : > { %vm6028_vm7 = vcmp.gt.f32.partialorder %v6011_v37, %v4493_v7  ;;  %v1404_v9 = vsel %vm4726_vm1, %v6012_v3, %v1234_v8  ;;  %v1405_v12 = vsel %vm4731_vm9, %v6015_v39, %v1235_v20  ;;  %vm6029_vm5 = vcmp.ne.s32.totalorder %v5999_v62, 0 }
 0x4b3   : > { %v1403_v31 = vsel %vm6028_vm7, %v6011_v37, %v4493_v7  ;;  %vm4775_vm13 = vmand %vm1367_vm14, %vm6029_vm5  ;;  %v6030_v5 = vmov 0  ;;  %v1406_v43 = vsel %vm4736_vm10, %v6018_v25, %v1236_v56  ;;  %v1407_v10 = vsel %vm4741_vm3, %v6021_v47, %v1237_v57 }
 0x4b4   : > { %v6031_v5 = vsel %vm4775_vm13, 4294967295, %v6030_v5  ;;  %v1408_v30 = vsel %vm4746_vm11, %v6024_v48, %v1238_v36  ;;  %v1417_v3 = vrot.slane %v1401_v29, 2  ;;  %v1377_v39 = vsel %vm4775_vm13, 1, %v5842_v22  ;;  %vm6032_vm14 = vmmov %vm6028_vm7 }
 0x4b5   : > { %vm4796_vm7 = vmor %vm6032_vm14, %vm4775_vm13  ;;  %v6033_v25 = vmov 0  ;;  %v1418_v20 = vrot.slane %v1402_v17, 1  ;;  %v1421_v47 = vrot.slane %v1404_v9, 7  ;;  %v1423_v57 = vrot.slane %v1405_v12, 6 }
 0x4b6   : > { %v6034_v25 = vsel %vm4796_vm7, 4294967295, %v6033_v25  ;;  %v1378_v27 = vrot.slane %v1377_v39, 6  ;;  %v1379_v59 = vrot.slane %v1377_v39, 7  ;;  %v1380_v48 = vrot.slane %v1377_v39, 1 }
 0x4b7   : > { %v1381_v29 = vrot.slane %v1377_v39, 2  ;;  %v1382_v36 = vrot.slane %v1377_v39, 3  ;;  %v1383_v14 = vrot.slane %v1377_v39, 4  ;;  %v1384_v62 = vrot.slane %v1377_v39, 5 }
 0x4b8   : > { %vm6035_vm5 = vcmask 1041409   ;;  %vm1385_vm11 = vcmp.ne.s32.totalorder %v1378_v27, 0  ;;  %vm1386_vm3 = vcmp.ne.s32.totalorder %v1379_v59, 0  ;;  %vm1388_vm10 = vcmp.ne.s32.totalorder %v1380_v48, 0 }
 0x4b9   : > { %v1419_v8 = vsel %vm6035_vm5, %v1418_v20, %v1417_v3  ;;  %vm4801_vm15 = vcmp.ne.s32.totalorder %v1381_v29, 0  ;;  %vm4805_vm14 = vcmp.ne.s32.totalorder %v1382_v36, 0  ;;  %v6038_v7 = vmov 0  ;;  %vm4819_vm5 = vmor %vm4714_vm6, %vm1385_vm11 }
 0x4ba   : > { %v6039_v7 = vsel %vm4805_vm14, 4294967295, %v6038_v7  ;;  %vm4809_vm13 = vcmp.ne.s32.totalorder %v1383_v14, 0  ;;  %vm4813_vm7 = vcmp.ne.s32.totalorder %v1384_v62, 0  ;;  %v6042_v56 = vmov 0  ;;  %vm4826_vm9 = vmor %vm4719_vm2, %vm1386_vm3 }
 0x4bb   : > { %v6043_v56 = vsel %vm4813_vm7, 4294967295, %v6042_v56  ;;  %vm6046_vm0 = vcmask 1042434   ;;  %v6047_v3 = vmov 0  ;;  %vm6049_vm14 = vcmask 1043459   ;;  %vm4833_vm7 = vmor %vm4726_vm1, %vm1388_vm10 }
 0x4bc   : > { %v1420_v12 = vsel %vm6046_vm0, %v1403_v31, %v1419_v8  ;;  %v6048_v3 = vsel %vm4826_vm9, 4294967295, %v6047_v3  ;;  %v1425_v20 = vrot.slane %v1406_v43, 5  ;;  %v1427_v27 = vrot.slane %v1407_v10, 4 }
 0x4bd   : > { %v1422_v39 = vsel %vm6049_vm14, %v1421_v47, %v1420_v12  ;;  %v1429_v59 = vrot.slane %v1408_v30, 3  ;;  %v6051_v45 = vsel %vm4833_vm7, 4294967295, %v6050_v45  ;;  %vm6052_vm6 = vcmask 1044484  }
 0x4be   : > { %v1424_v48 = vsel %vm6052_vm6, %v1423_v57, %v1422_v39  ;;  %v6053_v31 = vsel %vm4520_vm12, %v3846_v28, %v4181_v35  ;;  %v6054_v43 = vsel %vm4571_vm8, %v3846_v28, %v4366_v60  ;;  %v6055_v33 = vsel %vm4536_vm4, %v3846_v28, %v4225_v19 }
 0x4bf   : > { %v4843_v24 = vrot.slane %v6053_v31, 7  ;;  %v4850_v10 = vrot.slane %v6054_v43, 7  ;;  %v4857_v30 = vrot.slane %v6055_v33, 7  ;;  %vm6056_vm0 = vnez %v6017_v23 }
 0x4c0   : > { %vm4863_vm3 = vmor %vm6056_vm0, %vm4801_vm15  ;;  %v6057_v35 = vmov 0  ;;  %vm6059_vm2 = vcmask 1045509   ;;  %vm6060_vm11 = vnez %v5984_v61  ;;  %vm6062_vm1 = vnez %v5991_v40 }
 0x4c1   : > { %v6058_v35 = vsel %vm4863_vm3, 4294967295, %v6057_v35  ;;  %v1426_v47 = vsel %vm6059_vm2, %v1425_v20, %v1424_v48  ;;  %v6061_v60 = vsel %vm6060_vm11, %v3846_v28, %v4238_v2  ;;  %v6063_v19 = vsel %vm6062_vm1, %v3846_v28, %v4252_v32 }
 0x4c2   : > { %v4873_v57 = vrot.slane %v6061_v60, 7  ;;  %v4880_v29 = vrot.slane %v6063_v19, 7  ;;  %vm6064_vm15 = vnez %v5994_v52  ;;  %vm6066_vm10 = vnez %v6039_v7  ;;  %v6091_v19 = vld [vmem:[#allocation47_spill] sm:$0xff] }
 0x4c3   : > { %v6065_v23 = vsel %vm6064_vm15, %v3846_v28, %v4372_v63  ;;  %vm6067_vm14 = vnez %v6020_v11  ;;  %v6068_v2 = vmov 0  ;;  %vm6070_vm0 = vcmask 1046534   ;;  %v6073_v63 = vld [vmem:[#allocation42_spill] sm:$0xff]  ;;  %v6132_v11 = vld [vmem:[#allocation43_spill] sm:$0xff] }
 0x4c4   : > { %v4887_v36 = vrot.slane %v6065_v23, 7  ;;  %vm4893_vm6 = vmor %vm6067_vm14, %vm6066_vm10  ;;  %v1428_v14 = vsel %vm6070_vm0, %v1427_v27, %v1426_v47  ;;  %vm6071_vm2 = vnez %v5997_v26  ;;  %vm6074_vm10 = vnez %v6034_v25  ;;  %v6123_v23 = vld [vmem:[#allocation70_spill] sm:$0xff] }
 0x4c5   : > { %v6069_v2 = vsel %vm4893_vm6, 4294967295, %v6068_v2  ;;  %v6072_v32 = vsel %vm6071_vm2, %v3846_v28, %v4378_v34  ;;  %vm6075_vm14 = vnez %v6023_v58  ;;  %vm6078_vm9 = vcmask 1047559  }
 0x4c6   : > { %v4903_v62 = vrot.slane %v6072_v32, 7  ;;  %vm4917_vm0 = vmor %vm6075_vm14, %vm4809_vm13  ;;  %v4922_v28 = vsel %vm6078_vm9, %v1429_v59, %v1428_v14  ;;  %vm6079_vm13 = vnez %v6043_v56  ;;  %vm6080_vm9 = vnez %v6026_v18 }
 0x4c7   : > { %vm4940_vm14 = vmor %vm6080_vm9, %vm6079_vm13  ;;  %vm6083_vm7 = vnez %v6031_v5  ;;  %v6084_v56 = vsel %vm4520_vm12, %v3849_v53, %v4207_v46  ;;  %v6085_v18 = vsel %vm4571_vm8, %v3849_v53, %v4384_v13  ;;  %v6086_v48 = vsel %vm4536_vm4, %v3849_v53, %v4258_v41 }
 0x4c8   : > { %v1432_v12 = vsel %vm6083_vm7, 2.0, %v4922_v28  ;;  %v4956_v20 = vrot.slane %v6084_v56, 7  ;;  %v4963_v27 = vrot.slane %v6085_v18, 7  ;;  %v4974_v46 = vrot.slane %v6086_v48, 7  ;;  %v6103_v18 = vld [vmem:[#allocation51_spill] sm:$0xff]  ;;  %v6107_v56 = vld [vmem:[#allocation68_spill] sm:$0xff] }
 0x4c9   : > { %v6087_v31 = vsel %vm6060_vm11, %v3849_v53, %v4270_v51  ;;  %v6088_v43 = vsel %vm6062_vm1, %v3849_v53, %v4276_v1  ;;  %v6089_v41 = vsel %vm6064_vm15, %v3849_v53, %v4390_v6  ;;  %v6090_v51 = vsel %vm6071_vm2, %v3849_v53, %v4396_v4  ;;  %v6108_v4 = vld [vmem:[#allocation41_spill] sm:$0xff]  ;;  %v6109_v53 = vld [vmem:[#allocation52_spill] sm:$0xff] }
 0x4ca   : > { %v4981_v13 = vrot.slane %v6087_v31, 7  ;;  %v4988_v33 = vrot.slane %v6088_v43, 7  ;;  %v4995_v47 = vrot.slane %v6089_v41, 7  ;;  %v5002_v60 = vrot.slane %v6090_v51, 7 }
 0x4cb   : > { %vm6092_vm13 = vnez %v6051_v45  ;;  %v6093_v14 = vsel %vm4520_vm12, %v3852_v0, %v4213_v21  ;;  %v6094_v48 = vsel %vm4571_vm8, %v3852_v0, %v4402_v15  ;;  %v6095_v21 = vsel %vm4536_vm4, %v3852_v0, %v4288_v49 }
 0x4cc   : > { %v1520_v32 = vrot.slane %v6093_v14, 7  ;;  %v1522_v31 = vrot.slane %v6094_v48, 7  ;;  %v5047_v43 = vrot.slane %v6095_v21, 7  ;;  %v6096_v41 = vsel %vm6060_vm11, %v3852_v0, %v4294_v54 }
 0x4cd   : > { %v5054_v51 = vrot.slane %v6096_v41, 7  ;;  %v6097_v15 = vsel %vm6062_vm1, %v3852_v0, %v5998_v16  ;;  %v6098_v49 = vsel %vm6064_vm15, %v3852_v0, %v4408_v55  ;;  %v6099_v54 = vsel %vm6071_vm2, %v3852_v0, %v6000_v44  ;;  %v6101_v41 = vld [vmem:[#allocation48_spill] sm:$0xff] }
 0x4ce   : > { %v5061_v14 = vrot.slane %v6097_v15, 7  ;;  %v5068_v48 = vrot.slane %v6098_v49, 7  ;;  %v5075_v21 = vrot.slane %v6099_v54, 7  ;;  %v1536_v16 = vsel %vm4819_vm5, %v6101_v41, %v1520_v32  ;;  %v6102_v49 = vld [vmem:[#allocation40_spill] sm:$0xff] }
 0x4cf   : > { %v1538_v15 = vsel %vm6074_vm10, %v6101_v41, %v1522_v31  ;;  %v6104_v0 = vsel %vm4520_vm12, %v6102_v49, %v6103_v18  ;;  %v6110_v54 = vsel %vm4520_vm12, %v6108_v4, %v6109_v53  ;;  %v6111_v18 = vld [vmem:[#allocation60_spill] sm:$0xff]  ;;  %v6118_v53 = vsel %vm6062_vm1, %v6108_v4, %v6117_v42 }
 0x4d0   : > { %6100 = vst [vmem:[#allocation53_spill] sm:$0xff] %v5075_v21  ;;  %v1557_v44 = vrot.slane %v6104_v0, 7  ;;  %v6105_v0 = vld [vmem:[#allocation59_spill] sm:$0xff]  ;;  %v1594_v6 = vrot.slane %v6110_v54, 7  ;;  %v6112_v59 = vsel %vm4571_vm8, %v6108_v4, %v6111_v18  ;;  %v1599_v54 = vrot.slane %v6118_v53, 7  ;;  %v6124_v53 = vld [vmem:[#allocation74_spill] sm:$0xff] }
 0x4d1   : > { %v6106_v32 = vsel %vm4571_vm8, %v6102_v49, %v6105_v0  ;;  %v1596_v39 = vrot.slane %v6112_v59, 7  ;;  %v6119_v59 = vld [vmem:[#allocation64_spill] sm:$0xff]  ;;  %vm6125_vm12 = vnez %v6048_v3  ;;  %v6133_v8 = vrot.slane %v6132_v11, 6 }
 0x4d2   : > { %v1559_v55 = vrot.slane %v6106_v32, 7  ;;  %v1573_v31 = vsel %vm4819_vm5, %v6107_v56, %v1557_v44  ;;  %v6113_v32 = vld [vmem:[#allocation61_spill] sm:$0xff]  ;;  %v6116_v44 = vsel %vm6060_vm11, %v6108_v4, %v6115_v50  ;;  %v6120_v18 = vsel %vm6064_vm15, %v6108_v4, %v6119_v59 }
 0x4d3   : > { %v6114_v0 = vsel %vm4536_vm4, %v6108_v4, %v6113_v32  ;;  %v1598_v7 = vrot.slane %v6116_v44, 7  ;;  %v1600_v34 = vrot.slane %v6120_v18, 7  ;;  %v1610_v42 = vsel %vm4819_vm5, %v6123_v23, %v1594_v6 }
 0x4d4   : > { %v1597_v58 = vrot.slane %v6114_v0, 7  ;;  %v1575_v32 = vsel %vm6074_vm10, %v6107_v56, %v1559_v55  ;;  %v6121_v0 = vld [vmem:[#allocation65_spill] sm:$0xff]  ;;  %v1611_v59 = vsel %vm6125_vm12, %v6123_v23, %v6124_v53  ;;  %v1612_v18 = vsel %vm6074_vm10, %v6123_v23, %v1596_v39 }
 0x4d5   : > { %v6122_v50 = vsel %vm6071_vm2, %v6108_v4, %v6121_v0  ;;  %v1614_v4 = vsel %vm4863_vm3, %v6123_v23, %v1598_v7  ;;  %v1615_v6 = vsel %vm4893_vm6, %v6123_v23, %v1599_v54  ;;  %v6126_v0 = vld [vmem:[#allocation69_spill] sm:$0xff]  ;;  %v1616_v39 = vsel %vm4917_vm0, %v6123_v23, %v1600_v34 }
 0x4d6   : > { %v1601_v44 = vrot.slane %v6122_v50, 7  ;;  %v1613_v55 = vsel %vm6092_vm13, %v6123_v23, %v1597_v58  ;;  %vm6127_vm8 = vnez %v6126_v0  ;;  %v6128_v50 = vld [vmem:[#allocation57_spill] sm:$0xff]  ;;  %vm1619_vm9 = vcmp.gt.f32.partialorder %v1610_v42, 0.0 }
 0x4d7   : > { %v6129_v53 = vsel %vm6127_vm8, %v6102_v49, %v6128_v50  ;;  %vm1620_vm3 = vcmp.gt.f32.partialorder %v1611_v59, 0.0  ;;  %vm1621_vm13 = vcmp.gt.f32.partialorder %v1612_v18, 0.0  ;;  %vm1622_vm2 = vcmp.gt.f32.partialorder %v1613_v55, 0.0 }
 0x4d8   : > { %v1558_v1 = vrot.slane %v6129_v53, 7  ;;  %v1617_v58 = vsel %vm4940_vm14, %v6123_v23, %v1601_v44  ;;  %vm1623_vm15 = vcmp.gt.f32.partialorder %v1614_v4, 0.0  ;;  %vm1624_vm6 = vcmp.gt.f32.partialorder %v1615_v6, 0.0 }
 0x4d9   : > { %vm1625_vm1 = vcmp.gt.f32.partialorder %v1616_v39, 0.0  ;;  %vm1626_vm11 = vcmp.gt.f32.partialorder %v1617_v58, 0.0  ;;  %v1627_v7 = vsel %vm1619_vm9, 1, %v5842_v22  ;;  %v1628_v54 = vsel %vm1620_vm3, 1, %v5842_v22 }
 0x4da   : > { %v1629_v0 = vsel %vm1621_vm13, 1, %v5842_v22  ;;  %v1630_v34 = vsel %vm1622_vm2, 1, %v5842_v22  ;;  %v1631_v50 = vsel %vm1623_vm15, 1, %v5842_v22  ;;  %v1632_v23 = vsel %vm1624_vm6, 1, %v5842_v22 }
 0x4db   : > { %v1633_v44 = vsel %vm1625_vm1, 1, %v5842_v22  ;;  %v1634_v42 = vsel %vm1626_vm11, 1, %v5842_v22  ;;  %v1635_v59 = vrot.slane %v1627_v7, 2  ;;  %v1636_v18 = vrot.slane %v1628_v54, 1  ;;  %v6135_v54 = vld [vmem:[#allocation46_spill] sm:$0xff] }
 0x4dc   : > { %v1639_v55 = vrot.slane %v1630_v34, 7  ;;  %v1641_v4 = vrot.slane %v1631_v50, 6  ;;  %v1643_v6 = vrot.slane %v1632_v23, 5  ;;  %vm5196_vm3 = vcmp.ge.f32.partialorder %v1432_v12, 0.35  ;;  %v6137_v23 = vld [vmem:[#allocation71_spill] sm:$0xff] }
 0x4dd   : > { %v1645_v39 = vrot.slane %v1633_v44, 4  ;;  %v1647_v58 = vrot.slane %v1634_v42, 3  ;;  %v1780_v21 = vmul.f32 %v6133_v8, %v1536_v16  ;;  %v1782_v22 = vmul.f32 %v6132_v11, %v1538_v15  ;;  %v6139_v44 = vld [vmem:[#allocation72_spill] sm:$0xff]  ;;  %v6140_v16 = vld [vmem:[#allocation73_spill] sm:$0xff] }
 0x4de   : > { %vm6134_vm11 = vcmask 1041409   ;;  %v6136_v34 = vrot.slane %v6135_v54, 6  ;;  %v1830_v5 = vmul.f32 %v6135_v54, %v1575_v32  ;;  %v1462_v28 = vsel %vm6125_vm12, %v6073_v63, %v6137_v23  ;;  %v6142_v42 = vld [vmem:[#allocation49_spill] sm:$0xff] }
 0x4df   : > { %v1637_v7 = vsel %vm6134_vm11, %v1636_v18, %v1635_v59  ;;  %vm6138_vm7 = vcmask 1042434   ;;  %2563 = vlog2.f32 %v1780_v21  ;;  %v1499_v8 = vsel %vm6125_vm12, %v6091_v19, %v6139_v44 }
 0x4e0   : > { %v1828_v50 = vmul.f32 %v6136_v34, %v1573_v31  ;;  %v1638_v12 = vsel %vm6138_vm7, %v1629_v0, %v1637_v7  ;;  %v1537_v15 = vsel %vm6125_vm12, %v6101_v41, %v6140_v16  ;;  %vm6141_vm1 = vcmask 1043459  }
 0x4e1   : > { %v1640_v31 = vsel %vm6141_vm1, %v1639_v55, %v1638_v12  ;;  %2565 = vlog2.f32 %v1782_v22  ;;  %v1574_v32 = vsel %vm6125_vm12, %v6107_v56, %v1558_v1  ;;  %v6143_v0 = vrot.slane %v6142_v42, 6  ;;  %v6149_v22 = vld [vmem:[#allocation44_spill] sm:$0xff]  ;;  %v6151_v12 = vld [vmem:[#allocation50_spill] sm:$0xff] }
 0x4e2   : > { %v6144_v21 = vsel %vm4819_vm5, %v6073_v63, %v4843_v24  ;;  %vm6145_vm15 = vcmask 1044484   ;;  %2567 = vlog2.f32 %v1828_v50  ;;  %v6146_v7 = vrot.slane %v6142_v42, 7 }
 0x4e3   : > { %v1684_v59 = vsub.f32 %v6144_v21, %v6143_v0  ;;  %v1642_v18 = vsel %vm6145_vm15, %v1641_v4, %v1640_v31  ;;  %v6147_v3 = vsel %vm6074_vm10, %v6073_v63, %v4850_v10  ;;  %vm6148_vm6 = vcmask 1045509   ;;  %v6159_v21 = vld [vmem:[#allocation45_spill] sm:$0xff] }
 0x4e4   : > { %v1685_v34 = vsub.f32 %v1462_v28, %v6146_v7  ;;  %v1686_v1 = vsub.f32 %v6147_v3, %v6142_v42  ;;  %v1644_v55 = vsel %vm6148_vm6, %v1643_v6, %v1642_v18  ;;  %2569 = vlog2.f32 %v1830_v5 }
 0x4e5   : > { %v6150_v23 = vrot.slane %v6149_v22, 6  ;;  %v6152_v44 = vrot.slane %v6151_v12, 6  ;;  %v6153_v4 = vsel %vm4819_vm5, %v6091_v19, %v4956_v20  ;;  %vm6154_vm2 = vcmask 1046534  }
 0x4e6   : > { %v1646_v28 = vsel %vm6154_vm2, %v1645_v39, %v1644_v55  ;;  %v6155_v16 = vrot.slane %v6149_v22, 7  ;;  %v1710_v31 = vmul.f32 %v6149_v22, %v1686_v1  ;;  %v6156_v6 = vrot.slane %v6151_v12, 7 }
 0x4e7   : > { %v1708_v24 = vmul.f32 %v6150_v23, %v1684_v59  ;;  %v1732_v50 = vsub.f32 %v6153_v4, %v6152_v44  ;;  %vm6157_vm13 = vcmask 1047559   ;;  %v6158_v9 = vsel %vm6074_vm10, %v6091_v19, %v4963_v27  ;;  %vm6167_vm10 = vmmov %vm6134_vm11 }
 0x4e8   : > { %v1709_v10 = vmul.f32 %v6155_v16, %v1685_v34  ;;  %v1733_v5 = vsub.f32 %v1499_v8, %v6156_v6  ;;  %v1648_v0 = vsel %vm6157_vm13, %v1647_v58, %v1646_v28  ;;  %v1734_v20 = vsub.f32 %v6158_v9, %v6151_v12  ;;  %v6170_v16 = vld [vmem:[#allocation56_spill] sm:$0xff]  ;;  %v6172_v6 = vld [vmem:[#allocation66_spill] sm:$0xff]  ;;  %vm6175_vm11 = vmmov %vm6167_vm10 }
 0x4e9   : > { %v6160_v59 = vrot.slane %v6159_v21, 6  ;;  %v6161_v18 = vrot.slane %v6132_v11, 7  ;;  %vm1649_vm5 = vcmp.ne.s32.totalorder %v1648_v0, 0  ;;  %v6162_v34 = vrot.slane %v6159_v21, 7 }
 0x4ea   : > { %v6163_v8 = vrot.slane %v6135_v54, 7  ;;  %v1868_v1 = vrot.slane %v1708_v24, 2  ;;  %vm5273_vm12 = vmand %vm5196_vm3, %vm1649_vm5  ;;  %v1758_v27 = vmul.f32 %v6159_v21, %v1734_v20  ;;  %v1869_v55 = vrot.slane %v1709_v10, 1  ;;  %v6168_v24 = vld [vmem:[#allocation55_spill] sm:$0xff] }
 0x4eb   : > { %v1756_v39 = vmul.f32 %v6160_v59, %v1732_v50  ;;  %v1781_v7 = vmul.f32 %v6161_v18, %v1537_v15  ;;  %v1757_v3 = vmul.f32 %v6162_v34, %v1733_v5  ;;  %v2941_v15 = vmov 0.0   ;;  %v6166_v50 = vld [vmem:[#allocation54_spill] sm:$0xff]  ;;  %v2564_v5 = vpop.eup %2563  ;;  %v6176_v20 = vld [vmem:[#allocation67_spill] sm:$0xff] }
 0x4ec   : > { %v1829_v58 = vmul.f32 %v6163_v8, %v1574_v32  ;;  %v2278_v44 = vsel %vm5273_vm12, 1.0, %v2941_v15  ;;  %v1127_v53 = vsel %vm4536_vm4, %v6102_v49, %v6166_v50  ;;  %v1870_v32 = vsel %vm6167_vm10, %v1869_v55, %v1868_v1  ;;  %vm6174_vm4 = vmmov %vm6138_vm7  ;;  %v5309_v34 = vld [vmem:[%s3360_s4] sm:$0xff]  ;;  %s2923_s4 = smov 0  }
 0x4ed   : > { %2571 = vlog2.f32 %v1781_v7  ;;  %v1898_v23 = vrot.slane %v1756_v39, 2  ;;  %v1899_v4 = vrot.slane %v1757_v3, 1  ;;  %1653 = vadd.xlane.f32.xlu0 %v2278_v44  ;;  %vm6169_vm8 = vnez %v5984_v61  ;;  %v2566_v39 = vpop.eup %2565  ;;  %vm6178_vm1 = vmmov %vm6174_vm4 }
 0x4ee   : > { %2573 = vlog2.f32 %v1829_v58  ;;  %v1128_v28 = vsel %vm6169_vm8, %v6102_v49, %v6168_v24  ;;  %vm6171_vm9 = vnez %v5991_v40  ;;  %vm6173_vm3 = vnez %v5994_v52  ;;  %v2568_v3 = vpop.eup %2567 }
 0x4ef   : > { %v1129_v10 = vsel %vm6171_vm9, %v6102_v49, %v6170_v16  ;;  %v1130_v38 = vsel %vm6173_vm3, %v6102_v49, %v6172_v6  ;;  %v5298_v0 = vsel %vm6174_vm4, %v1710_v31, %v1870_v32  ;;  %v1900_v9 = vsel %vm6175_vm11, %v1899_v4, %v1898_v23 }
 0x4f0   : > { %vm6177_vm7 = vnez %v5997_v26  ;;  %v1560_v59 = vrot.slane %v1127_v53, 7  ;;  %v5306_v40 = vsel %vm6178_vm1, %v1758_v27, %v1900_v9  ;;  %v1561_v18 = vrot.slane %v1128_v28, 7  ;;  %v2570_v27 = vpop.eup %2569 }
 0x4f1   : > { %v1131_v61 = vsel %vm6177_vm7, %v6102_v49, %v6176_v20  ;;  %v1562_v7 = vrot.slane %v1129_v10, 7  ;;  %v1563_v52 = vrot.slane %v1130_v38, 7  ;;  %v1793_v31 = vmul.f32 0.6931472, %v2566_v39 }
 0x4f2   : > { %v1564_v8 = vrot.slane %v1131_v61, 7  ;;  %vm6179_vm15 = vnez %v6051_v45  ;;  %v6180_v26 = vrot.slane %v6142_v42, 1  ;;  %vm6182_vm6 = vnez %v6058_v35 }
 0x4f3   : > { %v1576_v58 = vsel %vm6179_vm15, %v6107_v56, %v1560_v59  ;;  %v6181_v49 = vsel %vm6179_vm15, %v6073_v63, %v4857_v30  ;;  %v1577_v55 = vsel %vm6182_vm6, %v6107_v56, %v1561_v18  ;;  %vm6183_vm2 = vnez %v6069_v2 }
 0x4f4   : > { %v1687_v1 = vsub.f32 %v6181_v49, %v6180_v26  ;;  %v1578_v23 = vsel %vm6183_vm2, %v6107_v56, %v1562_v7  ;;  %v1579_v15 = vsel %vm4917_vm0, %v6107_v56, %v1563_v52  ;;  %v6184_v44 = vrot.slane %v6142_v42, 2 }
 0x4f5   : > { %v6185_v30 = vsel %vm6182_vm6, %v6073_v63, %v4873_v57  ;;  %v1841_v50 = vmul.f32 0.6931472, %v2570_v27  ;;  %v1580_v53 = vsel %vm4940_vm14, %v6107_v56, %v1564_v8  ;;  %v6186_v32 = vrot.slane %v6142_v42, 3 }
 0x4f6   : > { %v1688_v4 = vsub.f32 %v6185_v30, %v6184_v44  ;;  %v6187_v24 = vsel %vm6183_vm2, %v6073_v63, %v4880_v29  ;;  %v1993_v16 = vsub.f32 0.0, %v5309_v34  ;;  %v5348_v10 = vmul.f32 5.0, %v1793_v31 }
 0x4f7   : > { %v1689_v28 = vsub.f32 %v6187_v24, %v6186_v32  ;;  %v6188_v57 = vrot.slane %v6142_v42, 4  ;;  %v6189_v6 = vsel %vm4917_vm0, %v6073_v63, %v4887_v36  ;;  %v6190_v38 = vrot.slane %v6142_v42, 5  ;;  %v2572_v31 = vpop.eup %2571 }
 0x4f8   : > { %v6191_v29 = vsel %vm4940_vm14, %v6073_v63, %v4903_v62  ;;  %v6192_v20 = vrot.slane %v6149_v22, 1  ;;  %v5366_v59 = vmul.f32 5.0, %v1841_v50  ;;  %v6193_v39 = vrot.slane %v6149_v22, 2  ;;  %v2574_v50 = vpop.eup %2573 }
 0x4f9   : > { %v1690_v56 = vsub.f32 %v6189_v6, %v6188_v57  ;;  %v1691_v9 = vsub.f32 %v6191_v29, %v6190_v38  ;;  %v6194_v7 = vrot.slane %v6151_v12, 1  ;;  %v6195_v36 = vsel %vm6179_vm15, %v6091_v19, %v4974_v46 }
 0x4fa   : > { %v1711_v61 = vmul.f32 %v6192_v20, %v1687_v1  ;;  %v1712_v18 = vmul.f32 %v6193_v39, %v1688_v4  ;;  %v6196_v52 = vrot.slane %v6151_v12, 2  ;;  %v6197_v62 = vsel %vm6182_vm6, %v6091_v19, %v4981_v13 }
 0x4fb   : > { %v1735_v42 = vsub.f32 %v6195_v36, %v6194_v7  ;;  %v6198_v8 = vrot.slane %v6149_v22, 3  ;;  %v6199_v49 = vrot.slane %v6149_v22, 4  ;;  %v6200_v27 = vrot.slane %v6151_v12, 3 }
 0x4fc   : > { %v1736_v63 = vsub.f32 %v6197_v62, %v6196_v52  ;;  %v6201_v46 = vsel %vm6183_vm2, %v6091_v19, %v4988_v33  ;;  %v6202_v30 = vrot.slane %v6151_v12, 4  ;;  %v6203_v13 = vsel %vm4917_vm0, %v6091_v19, %v4995_v47 }
 0x4fd   : > { %v1713_v26 = vmul.f32 %v6198_v8, %v1689_v28  ;;  %v1714_v1 = vmul.f32 %v6199_v49, %v1690_v56  ;;  %v1737_v44 = vsub.f32 %v6201_v46, %v6200_v27  ;;  %v6204_v32 = vrot.slane %v6149_v22, 5 }
 0x4fe   : > { %v1738_v4 = vsub.f32 %v6203_v13, %v6202_v30  ;;  %v6205_v28 = vrot.slane %v6151_v12, 5  ;;  %v6206_v33 = vsel %vm4940_vm14, %v6091_v19, %v5002_v60  ;;  %v6207_v6 = vrot.slane %v6159_v21, 1 }
 0x4ff   : > { %v1715_v24 = vmul.f32 %v6204_v32, %v1691_v9  ;;  %v6208_v47 = vsel %vm6179_vm15, %v6101_v41, %v5047_v43  ;;  %v6209_v38 = vrot.slane %v6132_v11, 1  ;;  %v6210_v29 = vrot.slane %v6159_v21, 2 }
 0x500   : > { %v1739_v57 = vsub.f32 %v6206_v33, %v6205_v28  ;;  %v1759_v56 = vmul.f32 %v6207_v6, %v1735_v42  ;;  %v6211_v9 = vrot.slane %v6159_v21, 3  ;;  %v6212_v60 = vsel %vm6182_vm6, %v6101_v41, %v5054_v51 }
 0x501   : > { %v1783_v22 = vmul.f32 %v6209_v38, %v6208_v47  ;;  %v1760_v12 = vmul.f32 %v6210_v29, %v1736_v63  ;;  %v6213_v19 = vrot.slane %v6132_v11, 2  ;;  %v6214_v43 = vsel %vm6183_vm2, %v6101_v41, %v5061_v14  ;;  %v6220_v14 = vld [vmem:[#allocation53_spill] sm:$0xff] }
 0x502   : > { %v1761_v20 = vmul.f32 %v6211_v9, %v1737_v44  ;;  %v6215_v39 = vrot.slane %v6132_v11, 3  ;;  %v6216_v36 = vrot.slane %v6159_v21, 4  ;;  %v6217_v52 = vrot.slane %v6159_v21, 5  ;;  %v2279_v29 = vld [vmem:[%s3354_s26 + $0x8] sm:$0xff] }
 0x503   : > { %v1784_v45 = vmul.f32 %v6213_v19, %v6212_v60  ;;  %v6218_v51 = vsel %vm4917_vm0, %v6101_v41, %v5068_v48  ;;  %v6219_v62 = vrot.slane %v6132_v11, 4  ;;  %v1789_v63 = vmul.f32 0.6931472, %v2564_v5 }
 0x504   : > { %v1785_v7 = vmul.f32 %v6215_v39, %v6214_v43  ;;  %v1762_v42 = vmul.f32 %v6216_v36, %v1738_v4  ;;  %v1763_v35 = vmul.f32 %v6217_v52, %v1739_v57  ;;  %v6221_v8 = vsel %vm4940_vm14, %v6101_v41, %v6220_v14 }
 0x505   : > { %v1786_v2 = vmul.f32 %v6219_v62, %v6218_v51  ;;  %v6222_v49 = vrot.slane %v6132_v11, 5  ;;  %v1791_v46 = vmul.f32 0.6931472, %v2572_v31  ;;  %2575 = vlog2.f32 %v1783_v22 }
 0x506   : > { %v6223_v21 = vrot.slane %v6135_v54, 1  ;;  %2577 = vlog2.f32 %v1784_v45  ;;  %v1804_v44 = vmul.f32 5.0, %v1789_v63  ;;  %v6224_v48 = vrot.slane %v6135_v54, 2 }
 0x507   : > { %v1787_v27 = vmul.f32 %v6222_v49, %v6221_v8  ;;  %v6225_v5 = vrot.slane %v6135_v54, 3  ;;  %2579 = vlog2.f32 %v1785_v7  ;;  %v1805_v17 = vmul.f32 5.0, %v1791_v46 }
 0x508   : > { %v1831_v37 = vmul.f32 %v6223_v21, %v1576_v58  ;;  %v1832_v30 = vmul.f32 %v6224_v48, %v1577_v55  ;;  %v6226_v41 = vrot.slane %v6135_v54, 4  ;;  %v1837_v11 = vmul.f32 0.6931472, %v2568_v3 }
 0x509   : > { %v1833_v13 = vmul.f32 %v6225_v5, %v1578_v23  ;;  %2581 = vlog2.f32 %v1786_v2  ;;  %v6227_v31 = vrot.slane %v6135_v54, 5  ;;  %v1839_v58 = vmul.f32 0.6931472, %v2574_v50  ;;  %v1661_v50 = vld [vmem:[%s3354_s26] sm:$0xff] }
 0x50a   : > { %v1834_v4 = vmul.f32 %v6226_v41, %v1579_v15  ;;  %v1872_v28 = vrot.slane %v1711_v61, 7  ;;  %2583 = vlog2.f32 %v1787_v27  ;;  %v5466_v33 = vmul.f32 5.0, %v1837_v11 }
 0x50b   : > { %v1835_v32 = vmul.f32 %v6227_v31, %v1580_v53  ;;  %v1874_v55 = vrot.slane %v1712_v18, 6  ;;  %v1876_v57 = vrot.slane %v1713_v26, 5  ;;  %2585 = vlog2.f32 %v1831_v37 }
 0x50c   : > { %v5468_v23 = vmul.f32 5.0, %v1839_v58  ;;  %vm6228_vm0 = vcmask 1043459   ;;  %v1878_v15 = vrot.slane %v1714_v1, 4  ;;  %2587 = vlog2.f32 %v1832_v30 }
 0x50d   : > { %v1873_v6 = vsel %vm6228_vm0, %v1872_v28, %v5298_v0  ;;  %vm6229_vm14 = vcmask 1044484   ;;  %v1880_v54 = vrot.slane %v1715_v24, 3  ;;  %v1902_v53 = vrot.slane %v1759_v56, 7  ;;  %vm6232_vm10 = vmmov %vm6228_vm0 }
 0x50e   : > { %v1875_v3 = vsel %vm6229_vm14, %v1874_v55, %v1873_v6  ;;  %2589 = vlog2.f32 %v1833_v13  ;;  %vm6230_vm13 = vcmask 1045509   ;;  %v1904_v47 = vrot.slane %v1760_v12, 6  ;;  %vm6234_vm9 = vmmov %vm6229_vm14 }
 0x50f   : > { %v1877_v61 = vsel %vm6230_vm13, %v1876_v57, %v1875_v3  ;;  %v1906_v18 = vrot.slane %v1761_v20, 5  ;;  %2591 = vlog2.f32 %v1834_v4  ;;  %vm6231_vm5 = vcmask 1046534   ;;  %v2576_v56 = vpop.eup %2575  ;;  %vm6235_vm3 = vmmov %vm6230_vm13 }
 0x510   : > { %v1879_v26 = vsel %vm6231_vm5, %v1878_v15, %v1877_v61  ;;  %v1903_v38 = vsel %vm6232_vm10, %v1902_v53, %v5306_v40  ;;  %v1908_v0 = vrot.slane %v1762_v42, 4  ;;  %2593 = vlog2.f32 %v1835_v32  ;;  %v2578_v19 = vpop.eup %2577  ;;  %vm6236_vm4 = vmmov %vm6231_vm5 }
 0x511   : > { %vm6233_vm8 = vcmask 1047559   ;;  %v1905_v24 = vsel %vm6234_vm9, %v1904_v47, %v1903_v38  ;;  %v1929_v22 = vrot.slane %v1804_v44, 2  ;;  %v1910_v12 = vrot.slane %v1763_v35, 3  ;;  %v2580_v7 = vpop.eup %2579  ;;  %vm6244_vm2 = vmmov %vm6228_vm0 }
 0x512   : > { %v1881_v1 = vsel %vm6233_vm8, %v1880_v54, %v1879_v26  ;;  %v1907_v60 = vsel %vm6235_vm3, %v1906_v18, %v1905_v24  ;;  %v1930_v20 = vrot.slane %v1805_v17, 1  ;;  %v1795_v45 = vmul.f32 0.6931472, %v2576_v56  ;;  %vm6237_vm11 = vmmov %vm6233_vm8 }
 0x513   : > { %v1883_v9 = vsub.f32 %v1661_v50, %v1881_v1  ;;  %v1909_v43 = vsel %vm6236_vm4, %v1908_v0, %v1907_v60  ;;  %v1960_v40 = vrot.slane %v5466_v33, 2  ;;  %v1961_v39 = vrot.slane %v5468_v23, 1  ;;  %v2582_v62 = vpop.eup %2581  ;;  %vm6245_vm0 = vmmov %vm6234_vm9 }
 0x514   : > { %v1797_v36 = vmul.f32 0.6931472, %v2578_v19  ;;  %v1911_v51 = vsel %vm6237_vm11, %v1910_v12, %v1909_v43  ;;  %v1799_v2 = vmul.f32 0.6931472, %v2580_v7  ;;  %vm6238_vm7 = vcmask 1041409   ;;  %v2584_v8 = vpop.eup %2583  ;;  %vm6247_vm13 = vmmov %vm6235_vm3 }
 0x515   : > { %v1884_v42 = vand.u32 2147483647, %v1883_v9  ;;  %v1886_v52 = vmul.f32 0.5, %v1883_v9  ;;  %v1913_v63 = vsub.f32 %v2279_v29, %v1911_v51  ;;  %v1931_v35 = vsel %vm6238_vm7, %v1930_v20, %v1929_v22  ;;  %v2586_v37 = vpop.eup %2585  ;;  %vm6246_vm14 = vmmov %vm6238_vm7  ;;  %v2280_v29 = vld [vmem:[%s3354_s26 + $0x10] sm:$0xff]  ;;  %v2281_v51 = vld [vmem:[%s3354_s26 + $0x18] sm:$0xff] }
 0x516   : > { %v5492_v14 = vsel %vm5273_vm12, %v1993_v16, %v5309_v34  ;;  %v1801_v49 = vmul.f32 0.6931472, %v2582_v62  ;;  %v1807_v27 = vmul.f32 5.0, %v1795_v45  ;;  %v1808_v46 = vmul.f32 5.0, %v1797_v36  ;;  %v2588_v13 = vpop.eup %2587  ;;  %vm6249_vm10 = vmmov %vm6236_vm4 }
 0x517   : > { %v1887_v21 = vmul.f32 %v1886_v52, %v1883_v9  ;;  %v1803_v44 = vmul.f32 0.6931472, %v2584_v8  ;;  %vm5494_vm1 = vcmp.lt.f32.partialorder %v1884_v42, 1.0  ;;  %v2282_v30 = vadd.f32 -0.5, %v1884_v42  ;;  %vm6250_vm9 = vmmov %vm6244_vm2 }
 0x518   : > { %v1914_v5 = vand.u32 2147483647, %v1913_v63  ;;  %v1809_v17 = vmul.f32 5.0, %v1799_v2  ;;  %v1843_v41 = vmul.f32 0.6931472, %v2586_v37  ;;  %v1916_v4 = vmul.f32 0.5, %v1913_v63  ;;  %v2590_v16 = vpop.eup %2589  ;;  %vm6251_vm3 = vmmov %vm6245_vm0 }
 0x519   : > { %vm6241_vm15 = vcmask 1042434   ;;  %v1810_v11 = vmul.f32 5.0, %v1801_v49  ;;  %v1811_v31 = vmul.f32 5.0, %v1803_v44  ;;  %v1845_v32 = vmul.f32 0.6931472, %v2588_v13  ;;  %v2592_v28 = vpop.eup %2591  ;;  %vm6252_vm4 = vmmov %vm6247_vm13 }
 0x51a   : > { %v1932_v34 = vsel %vm6241_vm15, %v5348_v10, %v1931_v35  ;;  %vm5500_vm6 = vcmp.lt.f32.partialorder %v1914_v5, 1.0  ;;  %v1847_v33 = vmul.f32 0.6931472, %v2590_v16  ;;  %v1889_v55 = vsel %vm5494_vm1, %v1887_v21, %v2282_v30  ;;  %v2594_v6 = vpop.eup %2593  ;;  %vm6248_vm5 = vmmov %vm6241_vm15 }
 0x51b   : > { %v1917_v57 = vmul.f32 %v1916_v4, %v1913_v63  ;;  %v2283_v23 = vadd.f32 -0.5, %v1914_v5  ;;  %v1849_v15 = vmul.f32 0.6931472, %v2592_v28  ;;  %v1855_v3 = vmul.f32 5.0, %v1843_v41  ;;  %vm6253_vm11 = vmmov %vm6249_vm10 }
 0x51c   : > { %v1856_v10 = vmul.f32 5.0, %v1845_v32  ;;  %v1933_v54 = vrot.slane %v1807_v27, 7  ;;  %v1851_v53 = vmul.f32 0.6931472, %v2594_v6  ;;  %v1857_v50 = vmul.f32 5.0, %v1847_v33  ;;  %vm6254_vm7 = vmmov %vm6233_vm8 }
 0x51d   : > { %v1919_v61 = vsel %vm5500_vm6, %v1917_v57, %v2283_v23  ;;  %v1935_v47 = vrot.slane %v1808_v46, 6  ;;  %v1858_v18 = vmul.f32 5.0, %v1849_v15  ;;  %v1937_v0 = vrot.slane %v1809_v17, 5 }
 0x51e   : > { %v1920_v26 = vadd.f32 %v1919_v61, %v1889_v55  ;;  %v1934_v38 = vsel %vm6244_vm2, %v1933_v54, %v1932_v34  ;;  %v1859_v1 = vmul.f32 5.0, %v1851_v53  ;;  %v1939_v22 = vrot.slane %v1810_v11, 4 }
 0x51f   : > { %v1936_v24 = vsel %vm6245_vm0, %v1935_v47, %v1934_v38  ;;  %v1962_v56 = vsel %vm6246_vm14, %v1961_v39, %v1960_v40  ;;  %v1941_v60 = vrot.slane %v1811_v31, 3  ;;  %v1964_v20 = vrot.slane %v1855_v3, 7  ;;  %v2277_v31 = vld [vmem:[%s3347_s11 + $0x58] sm:$0xff]  ;;  %s6255_s11 = sand.u32 1, %s2853_s16  }
 0x520   : > { %v1938_v9 = vsel %vm6247_vm13, %v1937_v0, %v1936_v24  ;;  %v1963_v12 = vsel %vm6248_vm5, %v5366_v59, %v1962_v56  ;;  %v1966_v45 = vrot.slane %v1856_v10, 6  ;;  %v1968_v36 = vrot.slane %v1857_v50, 5  ;;  %s5545_s26 = scalar_lea.vmem [#allocation10], %s6255_s11 }
 0x521   : > { %v1940_v19 = vsel %vm6249_vm10, %v1939_v22, %v1938_v9  ;;  %v1965_v7 = vsel %vm6250_vm9, %v1964_v20, %v1963_v12  ;;  %v1996_v42 = vand.u32 2147483647, %v5492_v14  ;;  %v1970_v39 = vrot.slane %v1858_v18, 4 }
 0x522   : > { %v1942_v43 = vsel %vm6233_vm8, %v1941_v60, %v1940_v19  ;;  %v1967_v40 = vsel %vm6251_vm3, %v1966_v45, %v1965_v7  ;;  %v1972_v2 = vrot.slane %v1859_v1, 3  ;;  %v1995_v58 = vmax.f32 %v5492_v14, 0.0 }
 0x523   : > { %v1944_v52 = vsub.f32 %v2280_v29, %v1942_v43  ;;  %v1969_v62 = vsel %vm6252_vm4, %v1968_v36, %v1967_v40  ;;  %v1997_v59 = vsub.f32 0.0, %v1996_v42  ;;  %vm2942_vm6 = vmmov 1  }
 0x524   : > { %v1971_v8 = vsel %vm6253_vm11, %v1970_v39, %v1969_v62  ;;  %vm2013_vm2 = vmxor %vm5273_vm12, %vm2942_vm6  ;;  %vm2014_vm0 = vcmp.gt.f32.partialorder %v2277_v31, 0.0  ;;  %v2919_v40 = vmov 0.0  }
 0x525   : > { %v1945_v63 = vand.u32 2147483647, %v1944_v52  ;;  %v1947_v35 = vmul.f32 0.5, %v1944_v52  ;;  %v1973_v49 = vsel %vm6254_vm7, %v1972_v2, %v1971_v8  ;;  %v1998_v27 = vmul.f32 1.442695, %v1997_v59  ;;  %vm2015_vm14 = vmand %vm2013_vm2, %vm2014_vm0 }
 0x526   : > { %v1975_v37 = vsub.f32 %v2281_v51, %v1973_v49 }
 0x527   : > { %vm1946_vm1 = vcmp.lt.f32.partialorder %v1945_v63, 1.0  ;;  %v1948_v46 = vmul.f32 %v1947_v35, %v1944_v52  ;;  %v2284_v21 = vadd.f32 -0.5, %v1945_v63  ;;  %2595 = vpow2.f32 %v1998_v27 }
 0x528   : > { %v1976_v48 = vand.u32 2147483647, %v1975_v37  ;;  %v1978_v30 = vmul.f32 0.5, %v1975_v37 }
 0x529   : > { %v1950_v44 = vsel %vm1946_vm1, %v1948_v46, %v2284_v21 }
 0x52a   : > { %v1951_v5 = vadd.f32 %v1950_v44, %v1920_v26  ;;  %vm1977_vm15 = vcmp.lt.f32.partialorder %v1976_v48, 1.0  ;;  %v1979_v13 = vmul.f32 %v1978_v30, %v1975_v37  ;;  %v2285_v17 = vadd.f32 -0.5, %v1976_v48 }
 0x52c   : > { %v1981_v41 = vsel %vm1977_vm15, %v1979_v13, %v2285_v17 }
 0x52d   : > { %v1982_v4 = vadd.f32 %v1981_v41, %v1951_v5 }
 0x52f   : > { %v1983_v34 = vsel %vm5273_vm12, %v1982_v4, 0.0 }
 0x530   : > { %1984 = vadd.xlane.f32.xlu0 %v1983_v34 }
 0x531   : > { %v2596_v16 = vpop.eup %2595 }
 0x532   : > { %v2000_v11 = vadd.f32 1.0, %v2596_v16 }
 0x534   : > { %2597 = vlog2.f32 %v2000_v11 }
 0x53e   : > { %v2598_v32 = vpop.eup %2597 }
 0x53f   : > { %v2002_v28 = vmul.f32 0.6931472, %v2598_v32 }
 0x541   : > { %v2003_v33 = vadd.f32 %v2002_v28, %v1995_v58 }
 0x543   : > { %v5530_v55 = vsel %vm2015_vm14, %v2003_v33, 0.0  ;;  %v2004_v57 = vsel %vm5273_vm12, %v2003_v33, 0.0 }
 0x544   : > { %2019 = vmax.xlane.f32.xlu1 %v5530_v55 }
 0x548   : > { %2005 = vadd.xlane.f32.xlu1 %v2004_v57 }
 0x57a   : > { %v1654_v23 = vpop.xlane.xlu0 %1653 }
 0x57b   : > { %v1655_v6 = vrot.slane %v1654_v23, 4 }
 0x57d   : > { %v1656_v15 = vadd.f32 %v1655_v6, %v1654_v23 }
 0x57f   : > { %v1657_v14 = vrot.slane %v1656_v15, 2 }
 0x581   : > { %v1658_v3 = vadd.f32 %v1657_v14, %v1656_v15 }
 0x583   : > { %v1659_v10 = vrot.slane %v1658_v3, 1 }
 0x585   : > { %v5535_v54 = vadd.f32 %v1659_v10, %v1658_v3 }
 0x587   : > { %v5538_v53 = vmul.f32 3.0, %v5535_v54 }
 0x589   : > { %v2018_v50 = vmin.f32 %v5538_v53, 255.0 }
 0x5bd   : > { %v1985_v61 = vpop.xlane.xlu0 %1984 }
 0x5be   : > { %v1986_v47 = vrot.slane %v1985_v61, 4 }
 0x5c0   : > { %v1987_v18 = vadd.f32 %v1986_v47, %v1985_v61 }
 0x5c2   : > { %v1988_v26 = vrot.slane %v1987_v18, 2 }
 0x5c4   : > { %v1989_v25 = vadd.f32 %v1988_v26, %v1987_v18 }
 0x5c6   : > { %v1990_v38 = vrot.slane %v1989_v25, 1 }
 0x5c8   : > { %v5541_v0 = vadd.f32 %v1990_v38, %v1989_v25 }
 0x5d1   : > { %v2020_v1 = vpop.xlane.xlu1 %2019 }
 0x5d2   : > { %v2021_v24 = vrot.slane %v2020_v1, 4 }
 0x5d4   : > { %v2022_v22 = vmax.f32 %v2020_v1, %v2021_v24 }
 0x5d5   : > { %v2006_v56 = vpop.xlane.xlu1 %2005 }
 0x5d6   : > { %v2023_v29 = vrot.slane %v2022_v22, 2  ;;  %v2007_v9 = vrot.slane %v2006_v56, 4 }
 0x5d8   : > { %v2024_v60 = vmax.f32 %v2022_v22, %v2023_v29  ;;  %v2008_v12 = vadd.f32 %v2007_v9, %v2006_v56 }
 0x5da   : > { %v2025_v20 = vrot.slane %v2024_v60, 1  ;;  %v2009_v19 = vrot.slane %v2008_v12, 2 }
 0x5dc   : > { %v2026_v45 = vmax.f32 %v2024_v60, %v2025_v20  ;;  %v2010_v43 = vadd.f32 %v2009_v19, %v2008_v12 }
 0x5de   : > { %v2027_v7 = vadd.f32 1.0, %v2026_v45   ;;  %v2011_v36 = vrot.slane %v2010_v43, 1 }
 0x5e0   : > { %v2012_v42 = vadd.f32 %v2011_v36, %v2010_v43  ;;  %v2915_v52 = vmov %v2027_v7  }
 0x5e1 LB: >> { %v2036_v39 = vadd.f32 %v2917_v52, %v2921_v40  ;;  %v2943_v62 = vmov 0.0   ;;  %s2033_s4 = sadd.s32 1, %s2925_s4   ;;  %s2925_s4 = sphi %s2923_s4, %s2033_s4   ;;  %v2921_v40 = vphi %v2919_v40, %v2920_v40   ;;  %v2917_v52 = vphi %v2915_v52, %v2050_v52  }
 0x5e2   : >> { %p2030_p8 = scmp.ge.s32.totalorder %s2033_s4, 24  }
 0x5e3   : >> { %v2037_v51 = vmul.f32 0.5, %v2036_v39  ;;  %s6256_s23 = sld [smem:[#allocation20_spill]] (%p2030_p8)  ;;  %s6257_s14 = sld [smem:[#allocation19_spill]] (%p2030_p8)  ;;  %v6258_v11 = vld [vmem:[#allocation38_spill] sm:$0xff] (%p2030_p8)  ;;  %vm2068_vm8 = vcmask (%p2030_p8), 16384  }
 0x5e4   : > { %vm2065_vm5 = vcmp.eq.s32.totalorder (%p2030_p8), %v6258_v11, 1  ;;  %s2085_s7 = sshll.u32 (%p2030_p8), %s5545_s26, 4  ;;  %vm2064_vm10 = vcmp.eq.s32.totalorder (%p2030_p8), %v6258_v11, 0  ;;  %s6259_s24 = sld [smem:[#allocation79_spill]] (%p2030_p8)  ;;  %s5564_s7 = int_to_ptr.vmem [resolvable:$true] %s2085_s7 }
 0x5e5   : >> { %vm2038_vm12 = vcmp.ge.f32.partialorder %v5530_v55, %v2037_v51  ;;  %s6261_s18 = sand.u32 (%p2030_p8), 1, %s2853_s16   ;;  %s2719_s6 = scalar_lea.vmem (%p2030_p8), %s5564_s7, 16 }
 0x5e6   : >> { %v2039_v2 = vsel %vm2038_vm12, 1.0, %v2943_v62  ;;  %s2071_s21 = scalar_lea.sflag (%p2030_p8), [#allocation4], %s6261_s18  ;;  %p2720_p7 = scmp.ne.s32.totalorder (%p2030_p8), %s5564_s7, %s2719_s6 }
 0x5e7   : >> { %2040 = vadd.xlane.f32.xlu0 %v2039_v2  ;;  %p6262_p2 = scmp.ne.s32.totalorder (%p2030_p8), %s5807_s28, 0  ;;  %s2944_s2 = smov (%p2030_p8), [#allocation10]  }
 0x5e8   : > { %s2723_s13 = sshll.u32 (%p2030_p8), %s2944_s2, 4  ;;  %s2724_s13 = int_to_ptr.vmem [resolvable:$false] %s2723_s13 }
 0x5e9   : > { %s2286_s27 = sshll.u32 (%p2030_p8), %s6256_s23, 1  ;;  %p2721_p5 = pnand (%p2030_p8), %p2720_p7, %p6262_p2 }
 0x5ea   : > { %s2081_s12 = sadd.s32 (%p2030_p8), %s6257_s14, %s2286_s27  ;;  %s6260_s8 = smov (%p2030_p8), %s6259_s24 }
 0x5eb   : > { %s2287_s9 = sshll.u32 (%p2030_p8), %s2081_s12, 4  ;;  %p2722_p11 = pneg (%p2030_p8), %p2721_p5 }
 0x5ec   : > { %s5562_s22 = scalar_lea.hbm (%p2030_p8), %s6259_s24, %s2287_s9  ;;  %s2725_s10 = scalar_lea.vmem (%p2030_p8), %s2724_s13, 32 }
 0x5ed   : > { %p2726_p13 = scmp.lt.s32.totalorder (%p2030_p8), %s5564_s7, %s2724_s13  ;;  %p2727_p6 = scmp.lt.s32.totalorder (%p2030_p8), %s2725_s10, %s2719_s6 }
 0x5ef   : > { %p2728_p4 = por (%p2030_p8), %p2727_p6, %p2726_p13 }
 0x5f1   : > { %p2729_p0 = pnand (%p2030_p8), %p2728_p4, %p2722_p11 }
 0x674   : >> { %v2041_v59 = vpop.xlane.xlu0 %2040 }
 0x675   : >> { %v2042_v63 = vrot.slane %v2041_v59, 4 }
 0x677   : >> { %v2043_v35 = vadd.f32 %v2042_v63, %v2041_v59 }
 0x679   : >> { %v2044_v8 = vrot.slane %v2043_v35, 2 }
 0x67b   : >> { %v2045_v49 = vadd.f32 %v2044_v8, %v2043_v35 }
 0x67d   : >> { %v2046_v27 = vrot.slane %v2045_v49, 1  ;;  %2032 = sbr.rel (!%p2030_p8) target bundleno = 1505 (0x5e1), region = 139 }
 0x67f   : >> { %v2047_v46 = vadd.f32 %v2046_v27, %v2045_v49 }
 0x681   : >> { %vm2048_vm13 = vcmp.ge.f32.partialorder %v2047_v46, %v2018_v50 }
 0x682   : >> { %v2049_v21 = vsel %vm2048_vm13, %v2037_v51, %v2921_v40   ;;  %v2050_v52 = vsel %vm2048_vm13, %v2917_v52, %v2037_v51  }
 0x683   : >> { %v2920_v40 = vmov %v2049_v21   ;;  %v2052_v37 = vsub.f32 (%p2030_p8), %v5530_v55, %v2049_v21  ;;  %v2051_v41 = vmul.f32 (%p2030_p8), %v2049_v21, %v2018_v50 }
 0x685   : > { %v2053_v44 = vmax.f32 %v2052_v37, 0.0 }
 0x687   : > { %2054 = vadd.xlane.f32.xlu0 %v2053_v44 }
 0x714   : > { %v2055_v48 = vpop.xlane.xlu0 %2054 }
 0x715   : > { %v2056_v30 = vrot.slane %v2055_v48, 4 }
 0x717   : > { %v2057_v5 = vadd.f32 %v2056_v30, %v2055_v48 }
 0x719   : > { %v2058_v13 = vrot.slane %v2057_v5, 2 }
 0x71b   : > { %v2059_v17 = vadd.f32 %v2058_v13, %v2057_v5 }
 0x71d   : > { %v2060_v4 = vrot.slane %v2059_v17, 1 }
 0x71f   : > { %v2061_v34 = vadd.f32 %v2060_v4, %v2059_v17 }
 0x721   : > { %v2062_v16 = vadd.f32 %v2061_v34, %v2051_v41 }
 0x723   : > { %v2063_v31 = vadd.f32 %v2062_v16, %v2012_v42 }
 0x725   : > { %v2066_v32 = vsel %vm2065_vm5, %v2063_v31, %v5535_v54 }
 0x726   : > { %v2067_v58 = vsel %vm2064_vm10, %v5541_v0, %v2066_v32 }
 0x727   : > { %2069 = vst.msk [vmem:[%s5545_s26] sm:$0x1] %vm2068_vm8, %v2067_v58 }
 0x728   : > { %2732 = shalt.err (!%p2729_p0)
}
 0x729   : > { %s2733_s0 = scalar_lea.hbm %s5562_s22, 16  ;;  %s2737_s4 = scalar_lea.hbm %s6260_s8, 96 }
 0x72a   : > { %p2734_p3 = scmp.ne.s32.totalorder %s5562_s22, %s2733_s0  ;;  %p2738_p10 = scmp.lt.u32.totalorder %s5562_s22, %s6260_s8 }
 0x72b   : > { %p2739_p9 = scmp.lt.u32.totalorder %s2737_s4, %s2733_s0  ;;  %p2741_p7 = scmp.lt.u32.totalorder %s2733_s0, %s5562_s22 }
 0x72c   : > { %p2735_p12 = pnand %p2734_p3, %p6262_p2 }
 0x72d   : > { %p2740_p8 = por %p2739_p9, %p2738_p10 }
 0x72e   : > { %p2736_p1 = pneg %p2735_p12 }
 0x72f   : > { %p2742_p5 = por %p2741_p7, %p2740_p8 }
 0x731   : > { %p2743_p11 = pnand %p2742_p5, %p2736_p1 }
 0x733   : > { %2746 = shalt.err (!%p2743_p11)
}
 0x734   : > { %2362 = dma.vmem_to_hbm [thread:$0]  (%p6262_p2), %s5564_s7, 16, %s5562_s22, %s2071_s21  }
 0x735 PF: > { %p2382_p13 = scmp.ge.s32.totalorder %s2913_s5, 2  ;;  %s2097_s27 = sand.u32 1, %s2849_s15  }
 0x736   : > { %p6263_p6 = scmp.ne.s32.totalorder %s5808_s30, 0  ;;  %s2098_s12 = scalar_lea.sflag [#allocation4], %s2097_s27 }
 0x738   : > { %p2378_p4 = pnand %p2382_p13, %p6263_p6 }
 0x73a   : > { %2844 = dma.done.wait (!%p2378_p4), %s2098_s12, 16  }
 0x73b   : > { %2846 = vsyncadd (!%p2378_p4), %s2098_s12, 4294967280  ;;  %s26_s5 = sadd.s32 1, %s2913_s5   ;;  %s6265_s28 = sld [smem:[#allocation29_spill]] }
 0x73c   : > { %p5596_p0 = scmp.ge.s32.totalorder %s26_s5, 8   ;;  %s6266_s7 = sld [smem:[#allocation28_spill]] }
 0x73d   : > { %s6267_s21 = sld [smem:[#allocation16_spill]]  ;;  %s6268_s22 = sld [smem:[#allocation17_spill]] }
 0x73e   : > { %s6269_s23 = sld [smem:[#allocation27_spill]]  ;;  %s6270_s30 = sld [smem:[#allocation18_spill]] }
 0x73f   : > { %s6271_s26 = sld [smem:[#allocation25_spill]]  ;;  %s6272_s27 = sld [smem:[#allocation21_spill]] }
 0x740   : > { %s6273_s29 = sld [smem:[#allocation22_spill]]  ;;  %s6274_s3 = sld [smem:[#allocation23_spill]] }
 0x741   : > { %s6275_s6 = sld [smem:[#allocation24_spill]]  ;;  %s6276_s15 = smov %s2853_s16 }
 0x742   : > { %s6277_s16 = smov %s2857_s17  ;;  %s6278_s17 = smov %s6265_s28 }
 0x743   : > { %s6279_s18 = smov %s2865_s19  ;;  %s6280_s19 = smov %s2869_s20 }
 0x744   : > { %s6281_s20 = smov %s6266_s7  ;;  %s6282_s24 = smov %s2889_s25 }
 0x745   : > { %s6283_s25 = smov %s6270_s30  ;;  %25 = sbr.rel (!%p5596_p0) target bundleno = 22 (0x16), region = 150 }
 0x746   : > { %s6284_s28 = smov %s6273_s29  ;;  %s6285_s29 = smov %s6274_s3 }
 0x747   : > { %s6286_s30 = smov %s6275_s6 }
 0x74c   :  { %2102 = vsyncpa [#allocation3], 1 }
 0x74d   :  { %2104 = vsyncpa [#allocation3 + $0x1], 1 }
 0x74e   :  { %2105 = vsyncpa [#allocation6], 1 }
 0x74f   :  { %2107 = vsyncpa [#allocation6 + $0x1], 1 }
 0x750   :  { %2108 = vsyncpa [#allocation9], 1 }
 0x751   :  { %2110 = vsyncpa [#allocation9 + $0x1], 1 }
 0x752   :  { %2111 = vsyncpa [#allocation4], 1 }
 0x753   :  { %2113 = vsyncpa [#allocation4 + $0x1], 1 }

</bundles_post_ra>
